<compile_context>
chip_gen: v5e
topology: v5e:2x2
jax: 0.10.0
libtpu: 0.0.40
codegen_flags: <defaults>
</compile_context>

<pallas_src>
import jax
import jax.numpy as jnp
from jax.experimental import pallas as pl
from jax.experimental.pallas import tpu as pltpu

H = 30          # model hidden size (module default)
HP = 128        # per-gate padded width (lane aligned)
G4 = 4 * HP     # packed gate width, gate order (i, f, o, g)


# ----------------------------------------------------------------------------
# Kernel
# ----------------------------------------------------------------------------
def seq2seq_kernel(x_ref, lstm_w_ref, rows_ref, mlp_w_ref, misc_ref,
                   out_ref, hs_ref):
    T, B, _ = x_ref.shape
    S3 = 3 * HP

    def lstm_cell(gates, c):
        # gate order (i, f, o, g): one sigmoid over 3*HP lanes, one tanh on HP.
        sig = jax.nn.sigmoid(gates[:, :S3])
        g = jnp.tanh(gates[:, S3:])
        i = sig[:, 0:HP]
        f = sig[:, HP:2 * HP]
        o = sig[:, 2 * HP:S3]
        c_new = f * c + i * g
        return o * jnp.tanh(c_new), c_new

    # Hoisted once, off the recurrence critical path.
    w_hh_enc = lstm_w_ref[0:HP, :]          # (HP, 4HP) encoder W_hh^T
    x_row = rows_ref[0:1, :]                # (1, 4HP) encoder W_ih^T (scalar in)
    b_row = rows_ref[1:2, :]                # (1, 4HP) encoder bias

    h = jnp.zeros((B, HP), jnp.float32)
    c = jnp.zeros((B, HP), jnp.float32)
    # ---------------- encoder LSTM, fully unrolled (T static & small) --------
    for t in range(T):
        gates = (x_ref[t] * x_row + b_row
                 + jnp.dot(h, w_hh_enc, preferred_element_type=jnp.float32))
        h, c = lstm_cell(gates, c)
        hs_ref[t * B:(t + 1) * B, :] = h    # encoder output -> VMEM scratch

    # ---------------- attention, batched over all T steps --------------------
    hs_all = hs_ref[...]                                           # (T*B, HP)
    eparts = jnp.dot(hs_all, mlp_w_ref[HP:2 * HP, :],
                     preferred_element_type=jnp.float32)           # (T*B, HP)
    h_part = jnp.dot(h, mlp_w_ref[0:HP, :],
                     preferred_element_type=jnp.float32)           # (B, HP)
    a_b1 = misc_ref[0:1, :]
    a_w2 = misc_ref[1:2, :]

    pre = jnp.tanh(eparts.reshape(T, B, HP) + h_part[None] + a_b1[None])
    energy = jnp.sum(pre * a_w2[None], axis=2, keepdims=True)      # (T, B, 1)
    # a_b2 dropped: softmax over T is shift invariant.
    m = jnp.max(energy, axis=0, keepdims=True)                     # (1, B, 1)
    e = jnp.exp(energy - m)                                        # one EUP push
    denom = jnp.sum(e, axis=0)                                     # (B, 1)
    ctx = jnp.sum(e * hs_all.reshape(T, B, HP), axis=0)            # (B, HP)
    context = ctx / denom                                          # (B, HP)

    # -------- decoder LSTM, single step; fused K=2*HP contraction ------------
    # rows_ref[2] already folds dec_input==1.0 * W_ih^T[:,0] + decoder bias.
    dec_in = jnp.concatenate([context, h], axis=1)                 # (B, 2HP)
    gates_d = rows_ref[2:3, :] + jnp.dot(dec_in, lstm_w_ref[HP:3 * HP, :],
                                         preferred_element_type=jnp.float32)
    h_dec, _ = lstm_cell(gates_d, c)

    # ---------------- output MLP ---------------------------------------------
    hid = jnp.tanh(jnp.dot(h_dec, mlp_w_ref[2 * HP:3 * HP, :],
                           preferred_element_type=jnp.float32)
                   + misc_ref[2:3, :])
    out_ref[...] = (jnp.sum(hid * misc_ref[3:4, :], axis=1, keepdims=True)
                    + misc_ref[4:5, 0:1])                          # + o_b2


# ----------------------------------------------------------------------------
# Wrapper: parameter packing (gate permutation + lane padding + slab fusion)
# ----------------------------------------------------------------------------
def _pad_cols(a, width):
    return jnp.pad(a, ((0, 0), (0, width - a.shape[1])))


def _pad_rows(a, rows):
    return jnp.pad(a, ((0, rows - a.shape[0]), (0, 0)))


def _pack_lstm_wT(w):
    """PyTorch LSTM weight (4H, K), gate rows (i,f,g,o) ->
       (K, 4*HP) columns ordered (i,f,o,g), each gate zero-padded to HP lanes."""
    wi, wf, wg, wo = w[0:H], w[H:2 * H], w[2 * H:3 * H], w[3 * H:4 * H]
    return jnp.concatenate([_pad_cols(g.T, HP) for g in (wi, wf, wo, wg)], axis=1)


def _pack_lstm_bias(b):
    return _pack_lstm_wT(b.reshape(4 * H, 1))          # (1, 4*HP)


def _pad_vec(v):
    return jnp.pad(v, (0, HP - v.shape[0])).reshape(1, HP)


def pack_params(p):
    # LSTM hidden-sized weight slab (3*HP, 4*HP):
    #   [0:HP]    encoder W_hh^T
    #   [HP:2HP]  decoder W_ih^T rows for the context vector   (fused decoder
    #   [2HP:3HP] decoder W_hh^T                                K=256 matmul)
    lstm_w = jnp.concatenate([
        _pad_rows(_pack_lstm_wT(p["e_whh"]), HP),
        _pad_rows(_pack_lstm_wT(p["d_wih"][:, 1:]), HP),
        _pad_rows(_pack_lstm_wT(p["d_whh"]), HP)], axis=0)

    # Row slab (8, 4*HP): r0 = encoder W_ih^T (scalar input), r1 = encoder bias,
    # r2 = decoder constant gates = 1.0 * W_ih^T[:,0] + decoder bias.
    rows = jnp.concatenate([
        _pack_lstm_wT(p["e_wih"]),
        _pack_lstm_bias(p["e_bih"] + p["e_bhh"]),
        _pack_lstm_wT(p["d_wih"][:, 0:1]) + _pack_lstm_bias(p["d_bih"] + p["d_bhh"]),
        jnp.zeros((5, G4), jnp.float32)], axis=0)

    # MLP weight slab (3*HP, HP): attn W1 hidden part, attn W1 encoder part, out W1.
    mlp_w = jnp.concatenate([
        _pad_rows(_pad_cols(p["a_w1"][:, :H].T, HP), HP),
        _pad_rows(_pad_cols(p["a_w1"][:, H:].T, HP), HP),
        _pad_rows(_pad_cols(p["o_w1"].T, HP), HP)], axis=0)

    # Misc row slab (8, HP): attn b1, attn w2 row, out b1, out w2 row,
    # out b2 (scalar in lane 0 of row 4).
    o_b2_row = jnp.zeros((1, HP), jnp.float32).at[0, 0].set(p["o_b2"][0])
    misc = jnp.concatenate([
        _pad_vec(p["a_b1"]), _pad_vec(p["a_w2"][0]),
        _pad_vec(p["o_b1"]), _pad_vec(p["o_w2"][0]),
        o_b2_row,
        jnp.zeros((3, HP), jnp.float32)], axis=0)

    return lstm_w, rows, mlp_w, misc


def seq2seq_pallas(counter_seq, p, block_b=8):
    """counter_seq: (B, T, 1) float32, batch-first like the PyTorch module.
       B must be a multiple of block_b (block_b a multiple of 8)."""
    B_total, T, _ = counter_seq.shape
    assert block_b % 8 == 0 and B_total % block_b == 0
    x_tm = jnp.transpose(counter_seq, (1, 0, 2))        # (T, B, 1) time-major
    lstm_w, rows, mlp_w, misc = pack_params(p)

    grid = (B_total // block_b,)
    return pl.pallas_call(
        seq2seq_kernel,
        out_shape=jax.ShapeDtypeStruct((B_total, 1), jnp.float32),
        grid_spec=pltpu.PrefetchScalarGridSpec(
            num_scalar_prefetch=0,
            grid=grid,
            in_specs=[
                pl.BlockSpec((T, block_b, 1), lambda b: (0, b, 0)),   # x tile
                pl.BlockSpec((3 * HP, G4), lambda b: (0, 0)),         # lstm_w
                pl.BlockSpec((8, G4), lambda b: (0, 0)),              # rows
                pl.BlockSpec((3 * HP, HP), lambda b: (0, 0)),         # mlp_w
                pl.BlockSpec((8, HP), lambda b: (0, 0)),              # misc
            ],
            out_specs=pl.BlockSpec((block_b, 1), lambda b: (b, 0)),
            scratch_shapes=[pltpu.VMEM((T * block_b, HP), jnp.float32)],
        ),
        compiler_params=pltpu.CompilerParams(
            dimension_semantics=("parallel",)),
    )(x_tm, lstm_w, rows, mlp_w, misc)


# ----------------------------------------------------------------------------
# Synthetic parameters + pure-JAX reference of the PyTorch forward
# ----------------------------------------------------------------------------
def init_params(key):
    k = 1.0 / jnp.sqrt(jnp.float32(H))
    names_shapes = [
        ("e_wih", (4 * H, 1)), ("e_whh", (4 * H, H)),
        ("e_bih", (4 * H,)), ("e_bhh", (4 * H,)),
        ("d_wih", (4 * H, 1 + H)), ("d_whh", (4 * H, H)),
        ("d_bih", (4 * H,)), ("d_bhh", (4 * H,)),
        ("a_w1", (H, 2 * H)), ("a_b1", (H,)),
        ("a_w2", (1, H)), ("a_b2", (1,)),
        ("o_w1", (H, H)), ("o_b1", (H,)),
        ("o_w2", (1, H)), ("o_b2", (1,)),
    ]
    keys = jax.random.split(key, len(names_shapes))
    return {n: jax.random.uniform(kk, s, jnp.float32, -k, k)
            for kk, (n, s) in zip(keys, names_shapes)}


def seq2seq_reference(counter_seq, p):
    B, T, _ = counter_seq.shape

    def cell(x, h, c, wih, whh, b):
        gates = x @ wih.T + h @ whh.T + b
        i, f, g, o = jnp.split(gates, 4, axis=-1)
        i, f, o = jax.nn.sigmoid(i), jax.nn.sigmoid(f), jax.nn.sigmoid(o)
        g = jnp.tanh(g)
        c = f * c + i * g
        return jnp.tanh(c) * o, c

    h = jnp.zeros((B, H)); c = jnp.zeros((B, H)); outs = []
    for t in range(T):
        h, c = cell(counter_seq[:, t, :], h, c,
                    p["e_wih"], p["e_whh"], p["e_bih"] + p["e_bhh"])
        outs.append(h)
    enc_out = jnp.stack(outs, axis=1)                      # (B, T, H)

    h_rep = jnp.broadcast_to(h[:, None, :], (B, T, H))
    cat = jnp.concatenate([h_rep, enc_out], axis=2)        # (B, T, 2H)
    energy = jnp.tanh(cat @ p["a_w1"].T + p["a_b1"]) @ p["a_w2"].T + p["a_b2"]
    attn = jax.nn.softmax(energy, axis=1)                  # (B, T, 1)
    context = jnp.sum(attn * enc_out, axis=1)              # (B, H)

    lstm_in = jnp.concatenate([jnp.ones((B, 1)), context], axis=1)
    h_dec, _ = cell(lstm_in, h, c,
                    p["d_wih"], p["d_whh"], p["d_bih"] + p["d_bhh"])
    hid = jnp.tanh(h_dec @ p["o_w1"].T + p["o_b1"])
    return hid @ p["o_w2"].T + p["o_b2"]


if __name__ == "__main__":
    B_total, T = 16, 8          # two grid steps of an 8-sequence batch tile
    key = jax.random.PRNGKey(0)
    k_x, k_p = jax.random.split(key)
    counter_seq = jax.random.normal(k_x, (B_total, T, 1), jnp.float32)
    params = init_params(k_p)

    pred = jax.block_until_ready(seq2seq_pallas(counter_seq, params))
    ref = jax.block_until_ready(seq2seq_reference(counter_seq, params))

    assert pred.shape == (B_total, 1), pred.shape
    assert jnp.allclose(pred, ref, atol=2e-4, rtol=2e-4), (pred, ref)
    print("KERNEL_OK")
</pallas_src>

<mosaic_0001>
module attributes {stable_mosaic.version = 11 : i64} {
  func.func @seq2seq_kernel(%arg0: i32, %arg1: memref<8x8x1xf32, #tpu.memory_space<vmem>>, %arg2: memref<384x512xf32, #tpu.memory_space<vmem>>, %arg3: memref<8x512xf32, #tpu.memory_space<vmem>>, %arg4: memref<384x128xf32, #tpu.memory_space<vmem>>, %arg5: memref<8x128xf32, #tpu.memory_space<vmem>>, %arg6: memref<8x1xf32, #tpu.memory_space<vmem>>, %arg7: memref<64x128xf32, #tpu.memory_space<vmem>>) attributes {dimension_semantics = [#tpu.dimension_semantics<parallel>], iteration_bounds = array<i64: 2>, scalar_prefetch = 0 : i64, scratch_operands = 1 : i64, tpu.core_type = #tpu.core_type<tc>, window_params = [{transform_indices = @transform_0, window_bounds = array<i64: 8, 8, 1>}, {pipeline_mode = #tpu.pipeline_mode<synchronous>, transform_indices = @transform_1, window_bounds = array<i64: 384, 512>}, {pipeline_mode = #tpu.pipeline_mode<synchronous>, transform_indices = @transform_2, window_bounds = array<i64: 8, 512>}, {pipeline_mode = #tpu.pipeline_mode<synchronous>, transform_indices = @transform_3, window_bounds = array<i64: 384, 128>}, {pipeline_mode = #tpu.pipeline_mode<synchronous>, transform_indices = @transform_4, window_bounds = array<i64: 8, 128>}, {transform_indices = @transform_5, window_bounds = array<i64: 8, 1>}]} {
    %c0 = arith.constant 0 : index
    %c0_0 = arith.constant 0 : index
    %0 = vector.load %arg2[%c0, %c0_0] : memref<384x512xf32, #tpu.memory_space<vmem>>, vector<128x512xf32>
    %c0_1 = arith.constant 0 : index
    %c0_2 = arith.constant 0 : index
    %1 = vector.load %arg3[%c0_1, %c0_2] : memref<8x512xf32, #tpu.memory_space<vmem>>, vector<1x512xf32>
    %c1 = arith.constant 1 : index
    %c0_3 = arith.constant 0 : index
    %2 = vector.load %arg3[%c1, %c0_3] : memref<8x512xf32, #tpu.memory_space<vmem>>, vector<1x512xf32>
    %cst = arith.constant 0.000000e+00 : f32
    %3 = vector.broadcast %cst : f32 to vector<8x128xf32>
    %cst_4 = arith.constant 0.000000e+00 : f32
    %4 = vector.broadcast %cst_4 : f32 to vector<8x128xf32>
    %c0_5 = arith.constant 0 : index
    %c0_6 = arith.constant 0 : index
    %c0_7 = arith.constant 0 : index
    %5 = vector.load %arg1[%c0_5, %c0_6, %c0_7] : memref<8x8x1xf32, #tpu.memory_space<vmem>>, vector<1x8x1xf32>
    %6 = vector.shape_cast %5 : vector<1x8x1xf32> to vector<8x1xf32>
    %7 = vector.broadcast %6 : vector<8x1xf32> to vector<8x512xf32>
    %8 = vector.broadcast %1 : vector<1x512xf32> to vector<8x512xf32>
    %9 = arith.mulf %7, %8 : vector<8x512xf32>
    %10 = vector.broadcast %2 : vector<1x512xf32> to vector<8x512xf32>
    %11 = arith.addf %9, %10 : vector<8x512xf32>
    %cst_8 = arith.constant dense<0.000000e+00> : vector<8x512xf32>
    %12 = tpu.matmul %3, %0, %cst_8 {dimension_numbers = #tpu.dot_dimension_numbers<[1], [0], [0], [1], [0, 0, 1, 1], [], []>} : vector<8x128xf32>, vector<128x512xf32>, vector<8x512xf32> -> vector<8x512xf32>
    %13 = arith.addf %11, %12 : vector<8x512xf32>
    %14 = vector.extract_strided_slice %13 {offsets = [0, 0], sizes = [8, 384], strides = [1, 1]} : vector<8x512xf32> to vector<8x384xf32>
    %15 = arith.negf %14 : vector<8x384xf32>
    %16 = math.exp %15 : vector<8x384xf32>
    %cst_9 = arith.constant 1.000000e+00 : f32
    %17 = vector.broadcast %cst_9 : f32 to vector<8x384xf32>
    %18 = arith.addf %17, %16 : vector<8x384xf32>
    %19 = arith.divf %17, %18 : vector<8x384xf32>
    %20 = vector.extract_strided_slice %13 {offsets = [0, 384], sizes = [8, 128], strides = [1, 1]} : vector<8x512xf32> to vector<8x128xf32>
    %21 = math.tanh %20 : vector<8x128xf32>
    %22 = vector.extract_strided_slice %19 {offsets = [0, 0], sizes = [8, 128], strides = [1, 1]} : vector<8x384xf32> to vector<8x128xf32>
    %23 = vector.extract_strided_slice %19 {offsets = [0, 128], sizes = [8, 128], strides = [1, 1]} : vector<8x384xf32> to vector<8x128xf32>
    %24 = vector.extract_strided_slice %19 {offsets = [0, 256], sizes = [8, 128], strides = [1, 1]} : vector<8x384xf32> to vector<8x128xf32>
    %25 = arith.mulf %23, %4 : vector<8x128xf32>
    %26 = arith.mulf %22, %21 : vector<8x128xf32>
    %27 = arith.addf %25, %26 : vector<8x128xf32>
    %28 = math.tanh %27 : vector<8x128xf32>
    %29 = arith.mulf %24, %28 : vector<8x128xf32>
    %c0_10 = arith.constant 0 : index
    %c0_11 = arith.constant 0 : index
    %30 = vector.load %arg7[%c0_10, %c0_11] : memref<64x128xf32, #tpu.memory_space<vmem>>, vector<8x128xf32>
    tpu.vector_store %arg7[%c0_10, %c0_11], %29 {strides = array<i32>} : memref<64x128xf32, #tpu.memory_space<vmem>>, vector<8x128xf32>,
    %c1_12 = arith.constant 1 : index
    %c0_13 = arith.constant 0 : index
    %c0_14 = arith.constant 0 : index
    %31 = vector.load %arg1[%c1_12, %c0_13, %c0_14] : memref<8x8x1xf32, #tpu.memory_space<vmem>>, vector<1x8x1xf32>
    %32 = vector.shape_cast %31 : vector<1x8x1xf32> to vector<8x1xf32>
    %33 = vector.broadcast %32 : vector<8x1xf32> to vector<8x512xf32>
    %34 = vector.broadcast %1 : vector<1x512xf32> to vector<8x512xf32>
    %35 = arith.mulf %33, %34 : vector<8x512xf32>
    %36 = vector.broadcast %2 : vector<1x512xf32> to vector<8x512xf32>
    %37 = arith.addf %35, %36 : vector<8x512xf32>
    %cst_15 = arith.constant dense<0.000000e+00> : vector<8x512xf32>
    %38 = tpu.matmul %29, %0, %cst_15 {dimension_numbers = #tpu.dot_dimension_numbers<[1], [0], [0], [1], [0, 0, 1, 1], [], []>} : vector<8x128xf32>, vector<128x512xf32>, vector<8x512xf32> -> vector<8x512xf32>
    %39 = arith.addf %37, %38 : vector<8x512xf32>
    %40 = vector.extract_strided_slice %39 {offsets = [0, 0], sizes = [8, 384], strides = [1, 1]} : vector<8x512xf32> to vector<8x384xf32>
    %41 = arith.negf %40 : vector<8x384xf32>
    %42 = math.exp %41 : vector<8x384xf32>
    %cst_16 = arith.constant 1.000000e+00 : f32
    %43 = vector.broadcast %cst_16 : f32 to vector<8x384xf32>
    %44 = arith.addf %43, %42 : vector<8x384xf32>
    %45 = arith.divf %43, %44 : vector<8x384xf32>
    %46 = vector.extract_strided_slice %39 {offsets = [0, 384], sizes = [8, 128], strides = [1, 1]} : vector<8x512xf32> to vector<8x128xf32>
    %47 = math.tanh %46 : vector<8x128xf32>
    %48 = vector.extract_strided_slice %45 {offsets = [0, 0], sizes = [8, 128], strides = [1, 1]} : vector<8x384xf32> to vector<8x128xf32>
    %49 = vector.extract_strided_slice %45 {offsets = [0, 128], sizes = [8, 128], strides = [1, 1]} : vector<8x384xf32> to vector<8x128xf32>
    %50 = vector.extract_strided_slice %45 {offsets = [0, 256], sizes = [8, 128], strides = [1, 1]} : vector<8x384xf32> to vector<8x128xf32>
    %51 = arith.mulf %49, %27 : vector<8x128xf32>
    %52 = arith.mulf %48, %47 : vector<8x128xf32>
    %53 = arith.addf %51, %52 : vector<8x128xf32>
    %54 = math.tanh %53 : vector<8x128xf32>
    %55 = arith.mulf %50, %54 : vector<8x128xf32>
    %c8 = arith.constant 8 : index
    %c0_17 = arith.constant 0 : index
    %56 = vector.load %arg7[%c8, %c0_17] : memref<64x128xf32, #tpu.memory_space<vmem>>, vector<8x128xf32>
    tpu.vector_store %arg7[%c8, %c0_17], %55 {strides = array<i32>} : memref<64x128xf32, #tpu.memory_space<vmem>>, vector<8x128xf32>,
    %c2 = arith.constant 2 : index
    %c0_18 = arith.constant 0 : index
    %c0_19 = arith.constant 0 : index
    %57 = vector.load %arg1[%c2, %c0_18, %c0_19] : memref<8x8x1xf32, #tpu.memory_space<vmem>>, vector<1x8x1xf32>
    %58 = vector.shape_cast %57 : vector<1x8x1xf32> to vector<8x1xf32>
    %59 = vector.broadcast %58 : vector<8x1xf32> to vector<8x512xf32>
    %60 = vector.broadcast %1 : vector<1x512xf32> to vector<8x512xf32>
    %61 = arith.mulf %59, %60 : vector<8x512xf32>
    %62 = vector.broadcast %2 : vector<1x512xf32> to vector<8x512xf32>
    %63 = arith.addf %61, %62 : vector<8x512xf32>
    %cst_20 = arith.constant dense<0.000000e+00> : vector<8x512xf32>
    %64 = tpu.matmul %55, %0, %cst_20 {dimension_numbers = #tpu.dot_dimension_numbers<[1], [0], [0], [1], [0, 0, 1, 1], [], []>} : vector<8x128xf32>, vector<128x512xf32>, vector<8x512xf32> -> vector<8x512xf32>
    %65 = arith.addf %63, %64 : vector<8x512xf32>
    %66 = vector.extract_strided_slice %65 {offsets = [0, 0], sizes = [8, 384], strides = [1, 1]} : vector<8x512xf32> to vector<8x384xf32>
    %67 = arith.negf %66 : vector<8x384xf32>
    %68 = math.exp %67 : vector<8x384xf32>
    %cst_21 = arith.constant 1.000000e+00 : f32
    %69 = vector.broadcast %cst_21 : f32 to vector<8x384xf32>
    %70 = arith.addf %69, %68 : vector<8x384xf32>
    %71 = arith.divf %69, %70 : vector<8x384xf32>
    %72 = vector.extract_strided_slice %65 {offsets = [0, 384], sizes = [8, 128], strides = [1, 1]} : vector<8x512xf32> to vector<8x128xf32>
    %73 = math.tanh %72 : vector<8x128xf32>
    %74 = vector.extract_strided_slice %71 {offsets = [0, 0], sizes = [8, 128], strides = [1, 1]} : vector<8x384xf32> to vector<8x128xf32>
    %75 = vector.extract_strided_slice %71 {offsets = [0, 128], sizes = [8, 128], strides = [1, 1]} : vector<8x384xf32> to vector<8x128xf32>
    %76 = vector.extract_strided_slice %71 {offsets = [0, 256], sizes = [8, 128], strides = [1, 1]} : vector<8x384xf32> to vector<8x128xf32>
    %77 = arith.mulf %75, %53 : vector<8x128xf32>
    %78 = arith.mulf %74, %73 : vector<8x128xf32>
    %79 = arith.addf %77, %78 : vector<8x128xf32>
    %80 = math.tanh %79 : vector<8x128xf32>
    %81 = arith.mulf %76, %80 : vector<8x128xf32>
    %c16 = arith.constant 16 : index
    %c0_22 = arith.constant 0 : index
    %82 = vector.load %arg7[%c16, %c0_22] : memref<64x128xf32, #tpu.memory_space<vmem>>, vector<8x128xf32>
    tpu.vector_store %arg7[%c16, %c0_22], %81 {strides = array<i32>} : memref<64x128xf32, #tpu.memory_space<vmem>>, vector<8x128xf32>,
    %c3 = arith.constant 3 : index
    %c0_23 = arith.constant 0 : index
    %c0_24 = arith.constant 0 : index
    %83 = vector.load %arg1[%c3, %c0_23, %c0_24] : memref<8x8x1xf32, #tpu.memory_space<vmem>>, vector<1x8x1xf32>
    %84 = vector.shape_cast %83 : vector<1x8x1xf32> to vector<8x1xf32>
    %85 = vector.broadcast %84 : vector<8x1xf32> to vector<8x512xf32>
    %86 = vector.broadcast %1 : vector<1x512xf32> to vector<8x512xf32>
    %87 = arith.mulf %85, %86 : vector<8x512xf32>
    %88 = vector.broadcast %2 : vector<1x512xf32> to vector<8x512xf32>
    %89 = arith.addf %87, %88 : vector<8x512xf32>
    %cst_25 = arith.constant dense<0.000000e+00> : vector<8x512xf32>
    %90 = tpu.matmul %81, %0, %cst_25 {dimension_numbers = #tpu.dot_dimension_numbers<[1], [0], [0], [1], [0, 0, 1, 1], [], []>} : vector<8x128xf32>, vector<128x512xf32>, vector<8x512xf32> -> vector<8x512xf32>
    %91 = arith.addf %89, %90 : vector<8x512xf32>
    %92 = vector.extract_strided_slice %91 {offsets = [0, 0], sizes = [8, 384], strides = [1, 1]} : vector<8x512xf32> to vector<8x384xf32>
    %93 = arith.negf %92 : vector<8x384xf32>
    %94 = math.exp %93 : vector<8x384xf32>
    %cst_26 = arith.constant 1.000000e+00 : f32
    %95 = vector.broadcast %cst_26 : f32 to vector<8x384xf32>
    %96 = arith.addf %95, %94 : vector<8x384xf32>
    %97 = arith.divf %95, %96 : vector<8x384xf32>
    %98 = vector.extract_strided_slice %91 {offsets = [0, 384], sizes = [8, 128], strides = [1, 1]} : vector<8x512xf32> to vector<8x128xf32>
    %99 = math.tanh %98 : vector<8x128xf32>
    %100 = vector.extract_strided_slice %97 {offsets = [0, 0], sizes = [8, 128], strides = [1, 1]} : vector<8x384xf32> to vector<8x128xf32>
    %101 = vector.extract_strided_slice %97 {offsets = [0, 128], sizes = [8, 128], strides = [1, 1]} : vector<8x384xf32> to vector<8x128xf32>
    %102 = vector.extract_strided_slice %97 {offsets = [0, 256], sizes = [8, 128], strides = [1, 1]} : vector<8x384xf32> to vector<8x128xf32>
    %103 = arith.mulf %101, %79 : vector<8x128xf32>
    %104 = arith.mulf %100, %99 : vector<8x128xf32>
    %105 = arith.addf %103, %104 : vector<8x128xf32>
    %106 = math.tanh %105 : vector<8x128xf32>
    %107 = arith.mulf %102, %106 : vector<8x128xf32>
    %c24 = arith.constant 24 : index
    %c0_27 = arith.constant 0 : index
    %108 = vector.load %arg7[%c24, %c0_27] : memref<64x128xf32, #tpu.memory_space<vmem>>, vector<8x128xf32>
    tpu.vector_store %arg7[%c24, %c0_27], %107 {strides = array<i32>} : memref<64x128xf32, #tpu.memory_space<vmem>>, vector<8x128xf32>,
    %c4 = arith.constant 4 : index
    %c0_28 = arith.constant 0 : index
    %c0_29 = arith.constant 0 : index
    %109 = vector.load %arg1[%c4, %c0_28, %c0_29] : memref<8x8x1xf32, #tpu.memory_space<vmem>>, vector<1x8x1xf32>
    %110 = vector.shape_cast %109 : vector<1x8x1xf32> to vector<8x1xf32>
    %111 = vector.broadcast %110 : vector<8x1xf32> to vector<8x512xf32>
    %112 = vector.broadcast %1 : vector<1x512xf32> to vector<8x512xf32>
    %113 = arith.mulf %111, %112 : vector<8x512xf32>
    %114 = vector.broadcast %2 : vector<1x512xf32> to vector<8x512xf32>
    %115 = arith.addf %113, %114 : vector<8x512xf32>
    %cst_30 = arith.constant dense<0.000000e+00> : vector<8x512xf32>
    %116 = tpu.matmul %107, %0, %cst_30 {dimension_numbers = #tpu.dot_dimension_numbers<[1], [0], [0], [1], [0, 0, 1, 1], [], []>} : vector<8x128xf32>, vector<128x512xf32>, vector<8x512xf32> -> vector<8x512xf32>
    %117 = arith.addf %115, %116 : vector<8x512xf32>
    %118 = vector.extract_strided_slice %117 {offsets = [0, 0], sizes = [8, 384], strides = [1, 1]} : vector<8x512xf32> to vector<8x384xf32>
    %119 = arith.negf %118 : vector<8x384xf32>
    %120 = math.exp %119 : vector<8x384xf32>
    %cst_31 = arith.constant 1.000000e+00 : f32
    %121 = vector.broadcast %cst_31 : f32 to vector<8x384xf32>
    %122 = arith.addf %121, %120 : vector<8x384xf32>
    %123 = arith.divf %121, %122 : vector<8x384xf32>
    %124 = vector.extract_strided_slice %117 {offsets = [0, 384], sizes = [8, 128], strides = [1, 1]} : vector<8x512xf32> to vector<8x128xf32>
    %125 = math.tanh %124 : vector<8x128xf32>
    %126 = vector.extract_strided_slice %123 {offsets = [0, 0], sizes = [8, 128], strides = [1, 1]} : vector<8x384xf32> to vector<8x128xf32>
    %127 = vector.extract_strided_slice %123 {offsets = [0, 128], sizes = [8, 128], strides = [1, 1]} : vector<8x384xf32> to vector<8x128xf32>
    %128 = vector.extract_strided_slice %123 {offsets = [0, 256], sizes = [8, 128], strides = [1, 1]} : vector<8x384xf32> to vector<8x128xf32>
    %129 = arith.mulf %127, %105 : vector<8x128xf32>
    %130 = arith.mulf %126, %125 : vector<8x128xf32>
    %131 = arith.addf %129, %130 : vector<8x128xf32>
    %132 = math.tanh %131 : vector<8x128xf32>
    %133 = arith.mulf %128, %132 : vector<8x128xf32>
    %c32 = arith.constant 32 : index
    %c0_32 = arith.constant 0 : index
    %134 = vector.load %arg7[%c32, %c0_32] : memref<64x128xf32, #tpu.memory_space<vmem>>, vector<8x128xf32>
    tpu.vector_store %arg7[%c32, %c0_32], %133 {strides = array<i32>} : memref<64x128xf32, #tpu.memory_space<vmem>>, vector<8x128xf32>,
    %c5 = arith.constant 5 : index
    %c0_33 = arith.constant 0 : index
    %c0_34 = arith.constant 0 : index
    %135 = vector.load %arg1[%c5, %c0_33, %c0_34] : memref<8x8x1xf32, #tpu.memory_space<vmem>>, vector<1x8x1xf32>
    %136 = vector.shape_cast %135 : vector<1x8x1xf32> to vector<8x1xf32>
    %137 = vector.broadcast %136 : vector<8x1xf32> to vector<8x512xf32>
    %138 = vector.broadcast %1 : vector<1x512xf32> to vector<8x512xf32>
    %139 = arith.mulf %137, %138 : vector<8x512xf32>
    %140 = vector.broadcast %2 : vector<1x512xf32> to vector<8x512xf32>
    %141 = arith.addf %139, %140 : vector<8x512xf32>
    %cst_35 = arith.constant dense<0.000000e+00> : vector<8x512xf32>
    %142 = tpu.matmul %133, %0, %cst_35 {dimension_numbers = #tpu.dot_dimension_numbers<[1], [0], [0], [1], [0, 0, 1, 1], [], []>} : vector<8x128xf32>, vector<128x512xf32>, vector<8x512xf32> -> vector<8x512xf32>
    %143 = arith.addf %141, %142 : vector<8x512xf32>
    %144 = vector.extract_strided_slice %143 {offsets = [0, 0], sizes = [8, 384], strides = [1, 1]} : vector<8x512xf32> to vector<8x384xf32>
    %145 = arith.negf %144 : vector<8x384xf32>
    %146 = math.exp %145 : vector<8x384xf32>
    %cst_36 = arith.constant 1.000000e+00 : f32
    %147 = vector.broadcast %cst_36 : f32 to vector<8x384xf32>
    %148 = arith.addf %147, %146 : vector<8x384xf32>
    %149 = arith.divf %147, %148 : vector<8x384xf32>
    %150 = vector.extract_strided_slice %143 {offsets = [0, 384], sizes = [8, 128], strides = [1, 1]} : vector<8x512xf32> to vector<8x128xf32>
    %151 = math.tanh %150 : vector<8x128xf32>
    %152 = vector.extract_strided_slice %149 {offsets = [0, 0], sizes = [8, 128], strides = [1, 1]} : vector<8x384xf32> to vector<8x128xf32>
    %153 = vector.extract_strided_slice %149 {offsets = [0, 128], sizes = [8, 128], strides = [1, 1]} : vector<8x384xf32> to vector<8x128xf32>
    %154 = vector.extract_strided_slice %149 {offsets = [0, 256], sizes = [8, 128], strides = [1, 1]} : vector<8x384xf32> to vector<8x128xf32>
    %155 = arith.mulf %153, %131 : vector<8x128xf32>
    %156 = arith.mulf %152, %151 : vector<8x128xf32>
    %157 = arith.addf %155, %156 : vector<8x128xf32>
    %158 = math.tanh %157 : vector<8x128xf32>
    %159 = arith.mulf %154, %158 : vector<8x128xf32>
    %c40 = arith.constant 40 : index
    %c0_37 = arith.constant 0 : index
    %160 = vector.load %arg7[%c40, %c0_37] : memref<64x128xf32, #tpu.memory_space<vmem>>, vector<8x128xf32>
    tpu.vector_store %arg7[%c40, %c0_37], %159 {strides = array<i32>} : memref<64x128xf32, #tpu.memory_space<vmem>>, vector<8x128xf32>,
    %c6 = arith.constant 6 : index
    %c0_38 = arith.constant 0 : index
    %c0_39 = arith.constant 0 : index
    %161 = vector.load %arg1[%c6, %c0_38, %c0_39] : memref<8x8x1xf32, #tpu.memory_space<vmem>>, vector<1x8x1xf32>
    %162 = vector.shape_cast %161 : vector<1x8x1xf32> to vector<8x1xf32>
    %163 = vector.broadcast %162 : vector<8x1xf32> to vector<8x512xf32>
    %164 = vector.broadcast %1 : vector<1x512xf32> to vector<8x512xf32>
    %165 = arith.mulf %163, %164 : vector<8x512xf32>
    %166 = vector.broadcast %2 : vector<1x512xf32> to vector<8x512xf32>
    %167 = arith.addf %165, %166 : vector<8x512xf32>
    %cst_40 = arith.constant dense<0.000000e+00> : vector<8x512xf32>
    %168 = tpu.matmul %159, %0, %cst_40 {dimension_numbers = #tpu.dot_dimension_numbers<[1], [0], [0], [1], [0, 0, 1, 1], [], []>} : vector<8x128xf32>, vector<128x512xf32>, vector<8x512xf32> -> vector<8x512xf32>
    %169 = arith.addf %167, %168 : vector<8x512xf32>
    %170 = vector.extract_strided_slice %169 {offsets = [0, 0], sizes = [8, 384], strides = [1, 1]} : vector<8x512xf32> to vector<8x384xf32>
    %171 = arith.negf %170 : vector<8x384xf32>
    %172 = math.exp %171 : vector<8x384xf32>
    %cst_41 = arith.constant 1.000000e+00 : f32
    %173 = vector.broadcast %cst_41 : f32 to vector<8x384xf32>
    %174 = arith.addf %173, %172 : vector<8x384xf32>
    %175 = arith.divf %173, %174 : vector<8x384xf32>
    %176 = vector.extract_strided_slice %169 {offsets = [0, 384], sizes = [8, 128], strides = [1, 1]} : vector<8x512xf32> to vector<8x128xf32>
    %177 = math.tanh %176 : vector<8x128xf32>
    %178 = vector.extract_strided_slice %175 {offsets = [0, 0], sizes = [8, 128], strides = [1, 1]} : vector<8x384xf32> to vector<8x128xf32>
    %179 = vector.extract_strided_slice %175 {offsets = [0, 128], sizes = [8, 128], strides = [1, 1]} : vector<8x384xf32> to vector<8x128xf32>
    %180 = vector.extract_strided_slice %175 {offsets = [0, 256], sizes = [8, 128], strides = [1, 1]} : vector<8x384xf32> to vector<8x128xf32>
    %181 = arith.mulf %179, %157 : vector<8x128xf32>
    %182 = arith.mulf %178, %177 : vector<8x128xf32>
    %183 = arith.addf %181, %182 : vector<8x128xf32>
    %184 = math.tanh %183 : vector<8x128xf32>
    %185 = arith.mulf %180, %184 : vector<8x128xf32>
    %c48 = arith.constant 48 : index
    %c0_42 = arith.constant 0 : index
    %186 = vector.load %arg7[%c48, %c0_42] : memref<64x128xf32, #tpu.memory_space<vmem>>, vector<8x128xf32>
    tpu.vector_store %arg7[%c48, %c0_42], %185 {strides = array<i32>} : memref<64x128xf32, #tpu.memory_space<vmem>>, vector<8x128xf32>,
    %c7 = arith.constant 7 : index
    %c0_43 = arith.constant 0 : index
    %c0_44 = arith.constant 0 : index
    %187 = vector.load %arg1[%c7, %c0_43, %c0_44] : memref<8x8x1xf32, #tpu.memory_space<vmem>>, vector<1x8x1xf32>
    %188 = vector.shape_cast %187 : vector<1x8x1xf32> to vector<8x1xf32>
    %189 = vector.broadcast %188 : vector<8x1xf32> to vector<8x512xf32>
    %190 = vector.broadcast %1 : vector<1x512xf32> to vector<8x512xf32>
    %191 = arith.mulf %189, %190 : vector<8x512xf32>
    %192 = vector.broadcast %2 : vector<1x512xf32> to vector<8x512xf32>
    %193 = arith.addf %191, %192 : vector<8x512xf32>
    %cst_45 = arith.constant dense<0.000000e+00> : vector<8x512xf32>
    %194 = tpu.matmul %185, %0, %cst_45 {dimension_numbers = #tpu.dot_dimension_numbers<[1], [0], [0], [1], [0, 0, 1, 1], [], []>} : vector<8x128xf32>, vector<128x512xf32>, vector<8x512xf32> -> vector<8x512xf32>
    %195 = arith.addf %193, %194 : vector<8x512xf32>
    %196 = vector.extract_strided_slice %195 {offsets = [0, 0], sizes = [8, 384], strides = [1, 1]} : vector<8x512xf32> to vector<8x384xf32>
    %197 = arith.negf %196 : vector<8x384xf32>
    %198 = math.exp %197 : vector<8x384xf32>
    %cst_46 = arith.constant 1.000000e+00 : f32
    %199 = vector.broadcast %cst_46 : f32 to vector<8x384xf32>
    %200 = arith.addf %199, %198 : vector<8x384xf32>
    %201 = arith.divf %199, %200 : vector<8x384xf32>
    %202 = vector.extract_strided_slice %195 {offsets = [0, 384], sizes = [8, 128], strides = [1, 1]} : vector<8x512xf32> to vector<8x128xf32>
    %203 = math.tanh %202 : vector<8x128xf32>
    %204 = vector.extract_strided_slice %201 {offsets = [0, 0], sizes = [8, 128], strides = [1, 1]} : vector<8x384xf32> to vector<8x128xf32>
    %205 = vector.extract_strided_slice %201 {offsets = [0, 128], sizes = [8, 128], strides = [1, 1]} : vector<8x384xf32> to vector<8x128xf32>
    %206 = vector.extract_strided_slice %201 {offsets = [0, 256], sizes = [8, 128], strides = [1, 1]} : vector<8x384xf32> to vector<8x128xf32>
    %207 = arith.mulf %205, %183 : vector<8x128xf32>
    %208 = arith.mulf %204, %203 : vector<8x128xf32>
    %209 = arith.addf %207, %208 : vector<8x128xf32>
    %210 = math.tanh %209 : vector<8x128xf32>
    %211 = arith.mulf %206, %210 : vector<8x128xf32>
    %c56 = arith.constant 56 : index
    %c0_47 = arith.constant 0 : index
    %212 = vector.load %arg7[%c56, %c0_47] : memref<64x128xf32, #tpu.memory_space<vmem>>, vector<8x128xf32>
    tpu.vector_store %arg7[%c56, %c0_47], %211 {strides = array<i32>} : memref<64x128xf32, #tpu.memory_space<vmem>>, vector<8x128xf32>,
    %c0_48 = arith.constant 0 : index
    %c0_49 = arith.constant 0 : index
    %213 = vector.load %arg7[%c0_48, %c0_49] : memref<64x128xf32, #tpu.memory_space<vmem>>, vector<64x128xf32>
    %c128 = arith.constant 128 : index
    %c0_50 = arith.constant 0 : index
    %214 = vector.load %arg4[%c128, %c0_50] : memref<384x128xf32, #tpu.memory_space<vmem>>, vector<128x128xf32>
    %cst_51 = arith.constant dense<0.000000e+00> : vector<64x128xf32>
    %215 = tpu.matmul %213, %214, %cst_51 {dimension_numbers = #tpu.dot_dimension_numbers<[1], [0], [0], [1], [0, 0, 1, 1], [], []>} : vector<64x128xf32>, vector<128x128xf32>, vector<64x128xf32> -> vector<64x128xf32>
    %c0_52 = arith.constant 0 : index
    %c0_53 = arith.constant 0 : index
    %216 = vector.load %arg4[%c0_52, %c0_53] : memref<384x128xf32, #tpu.memory_space<vmem>>, vector<128x128xf32>
    %cst_54 = arith.constant dense<0.000000e+00> : vector<8x128xf32>
    %217 = tpu.matmul %211, %216, %cst_54 {dimension_numbers = #tpu.dot_dimension_numbers<[1], [0], [0], [1], [0, 0, 1, 1], [], []>} : vector<8x128xf32>, vector<128x128xf32>, vector<8x128xf32> -> vector<8x128xf32>
    %c0_55 = arith.constant 0 : index
    %c0_56 = arith.constant 0 : index
    %218 = vector.load %arg5[%c0_55, %c0_56] : memref<8x128xf32, #tpu.memory_space<vmem>>, vector<1x128xf32>
    %c1_57 = arith.constant 1 : index
    %c0_58 = arith.constant 0 : index
    %219 = vector.load %arg5[%c1_57, %c0_58] : memref<8x128xf32, #tpu.memory_space<vmem>>, vector<1x128xf32>
    %220 = vector.shape_cast %215 : vector<64x128xf32> to vector<8x8x128xf32>
    %221 = vector.shape_cast %217 : vector<8x128xf32> to vector<1x8x128xf32>
    %222 = vector.broadcast %221 : vector<1x8x128xf32> to vector<8x8x128xf32>
    %223 = arith.addf %220, %222 : vector<8x8x128xf32>
    %224 = vector.shape_cast %218 : vector<1x128xf32> to vector<1x1x128xf32>
    %225 = vector.broadcast %224 : vector<1x1x128xf32> to vector<8x8x128xf32>
    %226 = arith.addf %223, %225 : vector<8x8x128xf32>
    %227 = math.tanh %226 : vector<8x8x128xf32>
    %228 = vector.shape_cast %219 : vector<1x128xf32> to vector<1x1x128xf32>
    %229 = vector.broadcast %228 : vector<1x1x128xf32> to vector<8x8x128xf32>
    %230 = arith.mulf %227, %229 : vector<8x8x128xf32>
    %cst_59 = arith.constant dense<0.000000e+00> : vector<8x8xf32>
    %231 = vector.multi_reduction <add>, %230, %cst_59 [2] : vector<8x8x128xf32> to vector<8x8xf32>
    %232 = vector.shape_cast %231 : vector<8x8xf32> to vector<8x8x1xf32>
    %cst_60 = arith.constant dense<0xFF800000> : vector<8x1xf32>
    %233 = vector.multi_reduction <maximumf>, %232, %cst_60 [0] : vector<8x8x1xf32> to vector<8x1xf32>
    %234 = vector.shape_cast %233 : vector<8x1xf32> to vector<1x8x1xf32>
    %235 = vector.broadcast %234 : vector<1x8x1xf32> to vector<8x8x1xf32>
    %236 = arith.subf %232, %235 : vector<8x8x1xf32>
    %237 = math.exp %236 : vector<8x8x1xf32>
    %cst_61 = arith.constant dense<0.000000e+00> : vector<8x1xf32>
    %238 = vector.multi_reduction <add>, %237, %cst_61 [0] : vector<8x8x1xf32> to vector<8x1xf32>
    %239 = vector.shape_cast %213 : vector<64x128xf32> to vector<8x8x128xf32>
    %240 = vector.broadcast %237 : vector<8x8x1xf32> to vector<8x8x128xf32>
    %241 = arith.mulf %240, %239 : vector<8x8x128xf32>
    %cst_62 = arith.constant dense<0.000000e+00> : vector<8x128xf32>
    %242 = vector.multi_reduction <add>, %241, %cst_62 [0] : vector<8x8x128xf32> to vector<8x128xf32>
    %243 = vector.broadcast %238 : vector<8x1xf32> to vector<8x128xf32>
    %244 = arith.divf %242, %243 : vector<8x128xf32>
    %245 = tpu.concatenate %244, %211 in 1 : vector<8x128xf32>, vector<8x128xf32> -> vector<8x256xf32>
    %c2_63 = arith.constant 2 : index
    %c0_64 = arith.constant 0 : index
    %246 = vector.load %arg3[%c2_63, %c0_64] : memref<8x512xf32, #tpu.memory_space<vmem>>, vector<1x512xf32>
    %c128_65 = arith.constant 128 : index
    %c0_66 = arith.constant 0 : index
    %247 = vector.load %arg2[%c128_65, %c0_66] : memref<384x512xf32, #tpu.memory_space<vmem>>, vector<256x512xf32>
    %cst_67 = arith.constant dense<0.000000e+00> : vector<8x512xf32>
    %248 = tpu.matmul %245, %247, %cst_67 {dimension_numbers = #tpu.dot_dimension_numbers<[1], [0], [0], [1], [0, 0, 1, 1], [], []>} : vector<8x256xf32>, vector<256x512xf32>, vector<8x512xf32> -> vector<8x512xf32>
    %249 = vector.broadcast %246 : vector<1x512xf32> to vector<8x512xf32>
    %250 = arith.addf %249, %248 : vector<8x512xf32>
    %251 = vector.extract_strided_slice %250 {offsets = [0, 0], sizes = [8, 384], strides = [1, 1]} : vector<8x512xf32> to vector<8x384xf32>
    %252 = arith.negf %251 : vector<8x384xf32>
    %253 = math.exp %252 : vector<8x384xf32>
    %cst_68 = arith.constant 1.000000e+00 : f32
    %254 = vector.broadcast %cst_68 : f32 to vector<8x384xf32>
    %255 = arith.addf %254, %253 : vector<8x384xf32>
    %256 = arith.divf %254, %255 : vector<8x384xf32>
    %257 = vector.extract_strided_slice %250 {offsets = [0, 384], sizes = [8, 128], strides = [1, 1]} : vector<8x512xf32> to vector<8x128xf32>
    %258 = math.tanh %257 : vector<8x128xf32>
    %259 = vector.extract_strided_slice %256 {offsets = [0, 0], sizes = [8, 128], strides = [1, 1]} : vector<8x384xf32> to vector<8x128xf32>
    %260 = vector.extract_strided_slice %256 {offsets = [0, 128], sizes = [8, 128], strides = [1, 1]} : vector<8x384xf32> to vector<8x128xf32>
    %261 = vector.extract_strided_slice %256 {offsets = [0, 256], sizes = [8, 128], strides = [1, 1]} : vector<8x384xf32> to vector<8x128xf32>
    %262 = arith.mulf %260, %209 : vector<8x128xf32>
    %263 = arith.mulf %259, %258 : vector<8x128xf32>
    %264 = arith.addf %262, %263 : vector<8x128xf32>
    %265 = math.tanh %264 : vector<8x128xf32>
    %266 = arith.mulf %261, %265 : vector<8x128xf32>
    %c256 = arith.constant 256 : index
    %c0_69 = arith.constant 0 : index
    %267 = vector.load %arg4[%c256, %c0_69] : memref<384x128xf32, #tpu.memory_space<vmem>>, vector<128x128xf32>
    %cst_70 = arith.constant dense<0.000000e+00> : vector<8x128xf32>
    %268 = tpu.matmul %266, %267, %cst_70 {dimension_numbers = #tpu.dot_dimension_numbers<[1], [0], [0], [1], [0, 0, 1, 1], [], []>} : vector<8x128xf32>, vector<128x128xf32>, vector<8x128xf32> -> vector<8x128xf32>
    %c2_71 = arith.constant 2 : index
    %c0_72 = arith.constant 0 : index
    %269 = vector.load %arg5[%c2_71, %c0_72] : memref<8x128xf32, #tpu.memory_space<vmem>>, vector<1x128xf32>
    %270 = vector.broadcast %269 : vector<1x128xf32> to vector<8x128xf32>
    %271 = arith.addf %268, %270 : vector<8x128xf32>
    %272 = math.tanh %271 : vector<8x128xf32>
    %c3_73 = arith.constant 3 : index
    %c0_74 = arith.constant 0 : index
    %273 = vector.load %arg5[%c3_73, %c0_74] : memref<8x128xf32, #tpu.memory_space<vmem>>, vector<1x128xf32>
    %274 = vector.broadcast %273 : vector<1x128xf32> to vector<8x128xf32>
    %275 = arith.mulf %272, %274 : vector<8x128xf32>
    %cst_75 = arith.constant dense<0.000000e+00> : vector<8xf32>
    %276 = vector.multi_reduction <add>, %275, %cst_75 [1] : vector<8x128xf32> to vector<8xf32>
    %277 = vector.shape_cast %276 : vector<8xf32> to vector<8x1xf32>
    %c4_76 = arith.constant 4 : index
    %c0_77 = arith.constant 0 : index
    %278 = vector.load %arg5[%c4_76, %c0_77] : memref<8x128xf32, #tpu.memory_space<vmem>>, vector<1x1xf32>
    %279 = vector.broadcast %278 : vector<1x1xf32> to vector<8x1xf32>
    %280 = arith.addf %277, %279 : vector<8x1xf32>
    %c0_78 = arith.constant 0 : index
    %c0_79 = arith.constant 0 : index
    %281 = vector.load %arg6[%c0_78, %c0_79] : memref<8x1xf32, #tpu.memory_space<vmem>>, vector<8x1xf32>
    tpu.vector_store %arg6[%c0_78, %c0_79], %280 {strides = array<i32>} : memref<8x1xf32, #tpu.memory_space<vmem>>, vector<8x1xf32>,
    return
  }
  func.func @transform_0(%arg0: i32) -> (i32, i32, i32) {
    %c0_i32 = arith.constant 0 : i32
    %c0_i32_0 = arith.constant 0 : i32
    %c0_i32_1 = arith.constant 0 : i32
    return %c0_i32, %arg0, %c0_i32_0 : i32, i32, i32
  }
  func.func @transform_1(%arg0: i32) -> (i32, i32) {
    %c0_i32 = arith.constant 0 : i32
    %c0_i32_0 = arith.constant 0 : i32
    %c0_i32_1 = arith.constant 0 : i32
    return %c0_i32, %c0_i32_0 : i32, i32
  }
  func.func @transform_2(%arg0: i32) -> (i32, i32) {
    %c0_i32 = arith.constant 0 : i32
    %c0_i32_0 = arith.constant 0 : i32
    %c0_i32_1 = arith.constant 0 : i32
    return %c0_i32, %c0_i32_0 : i32, i32
  }
  func.func @transform_3(%arg0: i32) -> (i32, i32) {
    %c0_i32 = arith.constant 0 : i32
    %c0_i32_0 = arith.constant 0 : i32
    %c0_i32_1 = arith.constant 0 : i32
    return %c0_i32, %c0_i32_0 : i32, i32
  }
  func.func @transform_4(%arg0: i32) -> (i32, i32) {
    %c0_i32 = arith.constant 0 : i32
    %c0_i32_0 = arith.constant 0 : i32
    %c0_i32_1 = arith.constant 0 : i32
    return %c0_i32, %c0_i32_0 : i32, i32
  }
  func.func @transform_5(%arg0: i32) -> (i32, i32) {
    %c0_i32 = arith.constant 0 : i32
    %c0_i32_0 = arith.constant 0 : i32
    return %arg0, %c0_i32 : i32, i32
  }
}

</mosaic_0001>

<bundles_post_ra>
// kernel: tpu_custom_call.1
= control target key start
LH: loop header
LB: loop body
LE: loop exit
PB: predicated region body
PF: predicated region fallthrough
CT: control target
= control target key end

     0   :  { %10 = vsyncpa [#allocation5], 0  ;;  %s4034_s0 = inlined_call_operand.vmem [shape: f32[8,16,1], index: 0, kind: input, shape index: {}]   ;;  %s4035_s1 = inlined_call_operand.hbm [shape: f32[384,512], index: 1, kind: input, shape index: {}]   ;;  %s4036_s2 = inlined_call_operand.vmem [shape: f32[8,512], index: 2, kind: input, shape index: {}]   ;;  %s4037_s3 = inlined_call_operand.hbm [shape: f32[384,128], index: 3, kind: input, shape index: {}]   ;;  %s4038_s4 = inlined_call_operand.vmem [shape: f32[8,128], index: 4, kind: input, shape index: {}]   ;;  %s4039_s5 = inlined_call_operand.vmem [shape: f32[16,1], index: 5, kind: output, shape index: {}]  }
   0x1   :  { %11 = vsyncpa [#allocation7], 0  ;;  %s2909_s18 = smov 0   ;;  %s2911_s19 = smov 0  }
   0x2   :  { %s2913_s20 = smov 0  }
   0x3 LB: > { %s2925_s21 = sadd.s32 4294967295, %s2869_s20   ;;  %s2928_s22 = sadd.s32 1, %s2869_s20   ;;  %s2869_s20 = sphi %s2913_s20, %s4372_s20   ;;  %s2865_s19 = sphi %s2911_s19, %s4371_s19   ;;  %s2861_s18 = sphi %s2909_s18, %s4370_s18  }
   0x4   : > { %s21_s23 = ssub.s32 %s2869_s20, %s2928_s22  ;;  %s24_s24 = sadd.s32 1, %s2865_s19 }
   0x5   : > { %p22_p0 = scmp.eq.s32.totalorder %s21_s23, 0  ;;  %p31_p1 = scmp.ne.s32.totalorder %s2865_s19, %s2861_s18 }
   0x6   : > { %p32_p2 = scmp.eq.s32.totalorder %s2869_s20, 0  ;;  %p2427_p3 = scmp.ge.s32.totalorder %s2869_s20, 1 }
   0x7   : > { %s2938_s25 = scalar_select %p22_p0, %s2865_s19, %s24_s24  }
   0x8   : > { %p2940_p4 = por %p32_p2, %p31_p1  ;;  %p158_p5 = scmp.lt.s32.totalorder %s2869_s20, 3 }
   0x9   : > { %p2491_p6 = scmp.eq.s32.totalorder %s2925_s21, 0  ;;  %s169_s30 = sshll.u32 %s4035_s1, 4  ;;  %s170_s30 = int_to_ptr.hbm [resolvable:$true] %s169_s30 }
   0xa   : > { %p2946_p7 = pnand %p2427_p3, %p158_p5  ;;  %s2871_s6 = smov [#allocation4]  }
   0xb   : > { %s171_s7 = sshll.u32 %s2871_s6, 4  ;;  %s186_s10 = sshll.u32 %s4037_s3, 4  ;;  %s172_s7 = int_to_ptr.vmem [resolvable:$true] %s171_s7  ;;  %s187_s10 = int_to_ptr.hbm [resolvable:$true] %s186_s10 }
   0xc   : > { %p2484_p8 = pneg %p2946_p7  ;;  %s2872_s11 = smov 512  }
   0xd   : > { %s2873_s12 = smov 32   ;;  %s2874_s13 = smov [#allocation6]  }
   0xe   : > { %p2485_p9 = pnand %p2491_p6, %p2484_p8  ;;  %s188_s14 = sshll.u32 %s2874_s13, 4  ;;  %s189_s14 = int_to_ptr.vmem [resolvable:$true] %s188_s14 }
   0xf   : > { %s2875_s15 = smov 128   ;;  %s2876_s16 = smov 8  }
  0x10   : > { %2487 = dma.hbm_to_vmem [thread:$0]  (!%p2485_p9), %s170_s30, 24576, %s172_s7, [#allocation5], %s2872_s11, %s2872_s11, %s2873_s12  }
  0x11   : > { %2490 = dma.hbm_to_vmem [thread:$0]  (!%p2485_p9), %s187_s10, 6144, %s189_s14, [#allocation7], %s2875_s15, %s2875_s15, %s2876_s16  }
  0x12   : > { %p2430_p10 = scmp.ge.s32.totalorder %s2869_s20, 2 }
  0x14   : > { %201 = sbr.rel (%p2430_p10) target bundleno = 37 (0x25), region = 32 }
  0x19   : > { %204 = sbr.rel (!%p2940_p4) target bundleno = 37 (0x25), region = 36  ;;  %s206_s17 = sand.u32 (%p2940_p4), 1, %s2865_s19  }
  0x1a   : > { %s2432_s23 = sshll.u32 (%p2940_p4), %s2869_s20, 3  ;;  %s2431_s24 = sshll.u32 (%p2940_p4), %s206_s17, 6 }
  0x1b   : > { %s210_s30 = scalar_lea.vmem (%p2940_p4), %s4034_s0, %s2432_s23  ;;  %s208_s6 = scalar_lea.vmem (%p2940_p4), [#allocation3], %s2431_s24 }
  0x1c   : > { %v253_v0 = vld [vmem:[%s210_s30] sm:$0xff] (%p2940_p4)  ;;  %v255_v1 = vld [vmem:[%s210_s30 + $0x10] sm:$0xff] (%p2940_p4) }
  0x1d   : > { %v257_v2 = vld [vmem:[%s210_s30 + $0x20] sm:$0xff] (%p2940_p4)  ;;  %254 = vst [vmem:[%s208_s6] sm:$0xff] (%p2940_p4), %v253_v0  ;;  %v259_v3 = vld [vmem:[%s210_s30 + $0x30] sm:$0xff] (%p2940_p4) }
  0x1e   : > { %256 = vst [vmem:[%s208_s6 + $0x8] sm:$0xff] %v255_v1  ;;  %v261_v4 = vld [vmem:[%s210_s30 + $0x40] sm:$0xff]  ;;  %v263_v5 = vld [vmem:[%s210_s30 + $0x50] sm:$0xff] }
  0x1f   : > { %258 = vst [vmem:[%s208_s6 + $0x10] sm:$0xff] %v257_v2  ;;  %v265_v6 = vld [vmem:[%s210_s30 + $0x60] sm:$0xff]  ;;  %v267_v7 = vld [vmem:[%s210_s30 + $0x70] sm:$0xff] }
  0x20   : > { %260 = vst [vmem:[%s208_s6 + $0x18] sm:$0xff] %v259_v3 }
  0x21   : > { %262 = vst [vmem:[%s208_s6 + $0x20] sm:$0xff] %v261_v4 }
  0x22   : > { %264 = vst [vmem:[%s208_s6 + $0x28] sm:$0xff] %v263_v5 }
  0x23   : > { %266 = vst [vmem:[%s208_s6 + $0x30] sm:$0xff] %v265_v6 }
  0x24   : > { %268 = vst [vmem:[%s208_s6 + $0x38] sm:$0xff] %v267_v7 }
  0x25 PF: > { %277 = sbr.rel (%p2946_p7) target bundleno = 2225 (0x8b1), region = 74 }
  0x2a   : > { %s280_s20 = sand.u32 1, %s2861_s18  }
  0x2b   : > { %s2434_s26 = sshll.u32 %s280_s20, 6 }
  0x2c   : > { %s2971_s7 = scalar_lea.vmem [#allocation3], %s2434_s26 }
  0x2d   : > { %2852 = dma.done.wait (%p2491_p6), [#allocation5], 24576  }
  0x2e   : > { %2854 = vsyncadd (%p2491_p6), [#allocation5], 4294942720 }
  0x2f   : > { %2856 = dma.done.wait (%p2491_p6), [#allocation7], 6144  }
  0x30   : > { %2858 = vsyncadd (%p2491_p6), [#allocation7], 4294961152  ;;  %v2877_v8 = vmov 0   ;;  %v2981_v9 = vld [vmem:[#allocation4 + $0x1e0] sm:$0xff]  ;;  %v2983_v10 = vld [vmem:[#allocation4 + $0x1e8] sm:$0xff]  ;;  %p316_p11 = scmp.lt.s32.totalorder %s2925_s21, 1 }
  0x31   : > { %2527 = vset.pattern.permute.xlu0 %v2877_v8  ;;  %2528 = vset.pattern.permute.xlu1 %v2877_v8  ;;  %v2985_v11 = vld [vmem:[#allocation4 + $0x1f0] sm:$0xff]  ;;  %v2989_v12 = vld [vmem:[#allocation4 + $0x1f8] sm:$0xff]  ;;  %v2991_v13 = vld [vmem:[#allocation4 + $0x1c0] sm:$0xff] }
  0x32   : > { %2529 = vset.pattern.permute.xlu2 %v2877_v8  ;;  %419 = vmatpush.msra.mxu0 %v2981_v9  ;;  %v2993_v14 = vld [vmem:[#allocation4 + $0x1c8] sm:$0xff]  ;;  %v2997_v15 = vld [vmem:[#allocation4 + $0x1d0] sm:$0xff]  ;;  %v2999_v16 = vld [vmem:[#allocation4 + $0x1d8] sm:$0xff]  ;;  %s4374_s21 = smov (!%p316_p11, %s2925_s21), 1 }
  0x33   : > { %439 = vmatpush.msra.mxu1 %v2983_v10  ;;  %459 = vmatpush.msra.mxu2 %v2985_v11  ;;  %v3001_v17 = vld [vmem:[#allocation4 + $0x1a0] sm:$0xff]  ;;  %v3005_v18 = vld [vmem:[#allocation4 + $0x1a8] sm:$0xff]  ;;  %v3007_v19 = vld [vmem:[#allocation4 + $0x1b0] sm:$0xff]  ;;  %s2437_s28 = sshll.u32 %s4374_s21, 3 }
  0x34   : > { %479 = vmatpush.msra.mxu3 %v2989_v12  ;;  %420 = vmatpush.msra.mxu0 %v2991_v13  ;;  %v3009_v20 = vld [vmem:[#allocation4 + $0x1b8] sm:$0xff]  ;;  %v3013_v21 = vld [vmem:[#allocation4 + $0x180] sm:$0xff]  ;;  %v3015_v22 = vld [vmem:[#allocation4 + $0x188] sm:$0xff]  ;;  %s319_s26 = scalar_lea.vmem %s4039_s5, %s2437_s28 }
  0x35   : > { %440 = vmatpush.msra.mxu1 %v2993_v14  ;;  %460 = vmatpush.msra.mxu2 %v2997_v15  ;;  %v3019_v23 = vld [vmem:[#allocation4 + $0x190] sm:$0xff]  ;;  %v3021_v24 = vld [vmem:[#allocation4 + $0x198] sm:$0xff]  ;;  %v3025_v25 = vld [vmem:[#allocation4 + $0x160] sm:$0xff] }
  0x36   : > { %480 = vmatpush.msra.mxu3 %v2999_v16  ;;  %421 = vmatpush.msra.mxu0 %v3001_v17  ;;  %v3027_v26 = vld [vmem:[#allocation4 + $0x168] sm:$0xff]  ;;  %v3031_v27 = vld [vmem:[#allocation4 + $0x170] sm:$0xff]  ;;  %v3033_v28 = vld [vmem:[#allocation4 + $0x178] sm:$0xff] }
  0x37   : > { %441 = vmatpush.msra.mxu1 %v3005_v18  ;;  %461 = vmatpush.msra.mxu2 %v3007_v19  ;;  %v3037_v29 = vld [vmem:[#allocation4 + $0x140] sm:$0xff]  ;;  %v3039_v30 = vld [vmem:[#allocation4 + $0x148] sm:$0xff]  ;;  %v3043_v31 = vld [vmem:[#allocation4 + $0x150] sm:$0xff] }
  0x38   : > { %481 = vmatpush.msra.mxu3 %v3009_v20  ;;  %422 = vmatpush.msra.mxu0 %v3013_v21  ;;  %v3045_v32 = vld [vmem:[#allocation4 + $0x158] sm:$0xff]  ;;  %v3049_v33 = vld [vmem:[#allocation4 + $0x120] sm:$0xff]  ;;  %v3051_v34 = vld [vmem:[#allocation4 + $0x128] sm:$0xff] }
  0x39   : > { %442 = vmatpush.msra.mxu1 %v3015_v22  ;;  %462 = vmatpush.msra.mxu2 %v3019_v23  ;;  %v3055_v35 = vld [vmem:[#allocation4 + $0x130] sm:$0xff]  ;;  %v3057_v36 = vld [vmem:[#allocation4 + $0x138] sm:$0xff]  ;;  %v3061_v37 = vld [vmem:[#allocation4 + $0x100] sm:$0xff] }
  0x3a   : > { %482 = vmatpush.msra.mxu3 %v3021_v24  ;;  %423 = vmatpush.msra.mxu0 %v3025_v25  ;;  %v3063_v38 = vld [vmem:[#allocation4 + $0x108] sm:$0xff]  ;;  %v3067_v39 = vld [vmem:[#allocation4 + $0x110] sm:$0xff]  ;;  %v3069_v40 = vld [vmem:[#allocation4 + $0x118] sm:$0xff] }
  0x3b   : > { %443 = vmatpush.msra.mxu1 %v3027_v26  ;;  %463 = vmatpush.msra.mxu2 %v3031_v27  ;;  %v3073_v41 = vld [vmem:[#allocation4 + $0xe0] sm:$0xff]  ;;  %v3075_v42 = vld [vmem:[#allocation4 + $0xe8] sm:$0xff]  ;;  %v3079_v43 = vld [vmem:[#allocation4 + $0xf0] sm:$0xff] }
  0x3c   : > { %483 = vmatpush.msra.mxu3 %v3033_v28  ;;  %424 = vmatpush.msra.mxu0 %v3037_v29  ;;  %v3081_v44 = vld [vmem:[#allocation4 + $0xf8] sm:$0xff]  ;;  %v3085_v45 = vld [vmem:[#allocation4 + $0xc0] sm:$0xff]  ;;  %v3087_v46 = vld [vmem:[#allocation4 + $0xc8] sm:$0xff] }
  0x3d   : > { %444 = vmatpush.msra.mxu1 %v3039_v30  ;;  %464 = vmatpush.msra.mxu2 %v3043_v31  ;;  %v3091_v47 = vld [vmem:[#allocation4 + $0xd0] sm:$0xff]  ;;  %v3093_v48 = vld [vmem:[#allocation4 + $0xd8] sm:$0xff]  ;;  %v3097_v49 = vld [vmem:[#allocation4 + $0xa0] sm:$0xff] }
  0x3e   : > { %484 = vmatpush.msra.mxu3 %v3045_v32  ;;  %425 = vmatpush.msra.mxu0 %v3049_v33  ;;  %4181 = vst [vmem:[#allocation10_spill] sm:$0xff] %v3091_v47  ;;  %v3099_v50 = vld [vmem:[#allocation4 + $0xa8] sm:$0xff]  ;;  %v3103_v51 = vld [vmem:[#allocation4 + $0xb0] sm:$0xff]  ;;  %v3105_v52 = vld [vmem:[#allocation4 + $0xb8] sm:$0xff] }
  0x3f   : > { %445 = vmatpush.msra.mxu1 %v3051_v34  ;;  %465 = vmatpush.msra.mxu2 %v3055_v35  ;;  %4182 = vst [vmem:[#allocation11_spill] sm:$0xff] %v3093_v48  ;;  %v387_v53 = vld [vmem:[%s2971_s7] sm:$0xff]  ;;  %v3112_v55 = vld [vmem:[#allocation4 + $0x88] sm:$0xff]  ;;  %v3114_v56 = vld [vmem:[#allocation4 + $0x90] sm:$0xff] }
  0x40   : > { %485 = vmatpush.msra.mxu3 %v3057_v36  ;;  %426 = vmatpush.msra.mxu0 %v3061_v37  ;;  %4183 = vst [vmem:[#allocation12_spill] sm:$0xff] %v3097_v49  ;;  %v3110_v54 = vld [vmem:[#allocation4 + $0x80] sm:$0xff]  ;;  %v3118_v57 = vld [vmem:[#allocation4 + $0x98] sm:$0xff]  ;;  %v3122_v59 = vld [vmem:[#allocation4 + $0x68] sm:$0xff] }
  0x41   : > { %446 = vmatpush.msra.mxu1 %v3063_v38  ;;  %466 = vmatpush.msra.mxu2 %v3067_v39  ;;  %4184 = vst [vmem:[#allocation13_spill] sm:$0xff] %v3099_v50  ;;  %v3120_v58 = vld [vmem:[#allocation4 + $0x60] sm:$0xff]  ;;  %v3126_v60 = vld [vmem:[#allocation4 + $0x70] sm:$0xff]  ;;  %v3131_v61 = vld [vmem:[#allocation4 + $0x78] sm:$0xff] }
  0x42   : > { %486 = vmatpush.msra.mxu3 %v3069_v40  ;;  %427 = vmatpush.msra.mxu0 %v3073_v41  ;;  %4185 = vst [vmem:[#allocation14_spill] sm:$0xff] %v3103_v51  ;;  %v3133_v62 = vld [vmem:[#allocation4 + $0x40] sm:$0xff]  ;;  %v3137_v63 = vld [vmem:[#allocation4 + $0x48] sm:$0xff]  ;;  %v3139_v0 = vld [vmem:[#allocation4 + $0x50] sm:$0xff] }
  0x43   : > { %447 = vmatpush.msra.mxu1 %v3075_v42  ;;  %467 = vmatpush.msra.mxu2 %v3079_v43  ;;  %4186 = vst [vmem:[#allocation15_spill] sm:$0xff] %v3105_v52  ;;  %v3143_v1 = vld [vmem:[#allocation4 + $0x58] sm:$0xff]  ;;  %v3145_v2 = vld [vmem:[#allocation4 + $0x20] sm:$0xff]  ;;  %v3149_v3 = vld [vmem:[#allocation4 + $0x28] sm:$0xff] }
  0x44   : > { %487 = vmatpush.msra.mxu3 %v3081_v44  ;;  %428 = vmatpush.msra.mxu0 %v3085_v45  ;;  %4187 = vst [vmem:[#allocation16_spill] sm:$0xff] %v3110_v54  ;;  %v3151_v4 = vld [vmem:[#allocation4 + $0x30] sm:$0xff]  ;;  %v3155_v5 = vld [vmem:[#allocation4 + $0x38] sm:$0xff]  ;;  %v2442_v6 = vld [vmem:[%s2971_s7 + $0x8] sm:$0xff] }
  0x45   : > { %448 = vmatpush.msra.mxu1 %v3087_v46  ;;  %468 = vmatpush.msra.mxu2 %v3091_v47  ;;  %4188 = vst [vmem:[#allocation17_spill] sm:$0xff] %v3112_v55  ;;  %v3160_v7 = vld [vmem:[#allocation4] sm:$0xff]  ;;  %v3162_v8 = vld [vmem:[#allocation4 + $0x8] sm:$0xff] }
  0x46   : > { %488 = vmatpush.msra.mxu3 %v3093_v48  ;;  %4189 = vst [vmem:[#allocation18_spill] sm:$0xff] %v3114_v56  ;;  %429 = vmatpush.msra.mxu0 %v3097_v49 }
  0x47   : > { %449 = vmatpush.msra.mxu1 %v3099_v50  ;;  %4190 = vst [vmem:[#allocation19_spill] sm:$0xff] %v3118_v57  ;;  %469 = vmatpush.msra.mxu2 %v3103_v51 }
  0x48   : > { %4191 = vst [vmem:[#allocation20_spill] sm:$0xff] %v3120_v58  ;;  %489 = vmatpush.msra.mxu3 %v3105_v52  ;;  %390 = vperm.xlu0 %2527, %v387_v53   ;;  %v3166_v53 = vld [vmem:[#allocation4 + $0x10] sm:$0xff] }
  0x49   : > { %4192 = vst [vmem:[#allocation21_spill] sm:$0xff] %v3122_v59  ;;  %430 = vmatpush.msra.mxu0 %v3110_v54  ;;  %450 = vmatpush.msra.mxu1 %v3112_v55 }
  0x4a   : > { %4193 = vst [vmem:[#allocation22_spill] sm:$0xff] %v3126_v60  ;;  %470 = vmatpush.msra.mxu2 %v3114_v56  ;;  %490 = vmatpush.msra.mxu3 %v3118_v57 }
  0x4b   : > { %4194 = vst [vmem:[#allocation23_spill] sm:$0xff] %v3131_v61  ;;  %431 = vmatpush.msra.mxu0 %v3120_v58  ;;  %451 = vmatpush.msra.mxu1 %v3122_v59 }
  0x4c   : > { %4195 = vst [vmem:[#allocation24_spill] sm:$0xff] %v3133_v62  ;;  %471 = vmatpush.msra.mxu2 %v3126_v60  ;;  %491 = vmatpush.msra.mxu3 %v3131_v61 }
  0x4d   : > { %4196 = vst [vmem:[#allocation25_spill] sm:$0xff] %v3137_v63  ;;  %432 = vmatpush.msra.mxu0 %v3133_v62  ;;  %452 = vmatpush.msra.mxu1 %v3137_v63  ;;  %v3168_v63 = vld [vmem:[#allocation4 + $0x18] sm:$0xff] }
  0x4e   : > { %4197 = vst [vmem:[#allocation26_spill] sm:$0xff] %v3139_v0  ;;  %472 = vmatpush.msra.mxu2 %v3139_v0  ;;  %492 = vmatpush.msra.mxu3 %v3143_v1 }
  0x4f   : > { %4198 = vst [vmem:[#allocation27_spill] sm:$0xff] %v3143_v1  ;;  %433 = vmatpush.msra.mxu0 %v3145_v2  ;;  %453 = vmatpush.msra.mxu1 %v3149_v3 }
  0x50   : > { %4199 = vst [vmem:[#allocation28_spill] sm:$0xff] %v3145_v2  ;;  %473 = vmatpush.msra.mxu2 %v3151_v4  ;;  %493 = vmatpush.msra.mxu3 %v3155_v5  ;;  %v2878_v2 = vmov 0.0  }
  0x51   : > { %4200 = vst [vmem:[#allocation29_spill] sm:$0xff] %v3149_v3  ;;  %571 = vperm.xlu0 %2527, %v2442_v6   ;;  %434 = vmatpush.msra.mxu0 %v3160_v7 }
  0x52   : > { %4201 = vst [vmem:[#allocation30_spill] sm:$0xff] %v3151_v4  ;;  %454 = vmatpush.msra.mxu1 %v3162_v8  ;;  %474 = vmatpush.msra.mxu2 %v3166_v53  ;;  %v2462_v4 = vld [vmem:[%s2971_s7 + $0x30] sm:$0xff] }
  0x53   : > { %4202 = vst [vmem:[#allocation31_spill] sm:$0xff] %v3155_v5  ;;  %494 = vmatpush.msra.mxu3 %v3168_v63  ;;  %435 = vmatmul.f32.vlgmr.msra.gmra.mxu0 %v2878_v2 }
  0x54   : > { %4203 = vst [vmem:[#allocation32_spill] sm:$0xff] %v3160_v7  ;;  %455 = vmatmul.f32.vlgmr.msra.gmra.mxu1 %v2878_v2  ;;  %475 = vmatmul.f32.vlgmr.msra.gmra.mxu2 %v2878_v2 }
  0x55   : > { %4204 = vst [vmem:[#allocation33_spill] sm:$0xff] %v3162_v8  ;;  %495 = vmatmul.f32.vlgmr.msra.gmra.mxu3 %v2878_v2  ;;  %582 = vmatpush.msrb.mxu0 %v2981_v9  ;;  %v4207_v2 = vld [vmem:[#allocation25_spill] sm:$0xff] }
  0x56   : > { %4205 = vst [vmem:[#allocation34_spill] sm:$0xff] %v3166_v53  ;;  %602 = vmatpush.msrb.mxu1 %v2983_v10  ;;  %622 = vmatpush.msrb.mxu2 %v2985_v11 }
  0x57   : > { %4206 = vst [vmem:[#allocation35_spill] sm:$0xff] %v3168_v63  ;;  %642 = vmatpush.msrb.mxu3 %v2989_v12  ;;  %583 = vmatpush.msrb.mxu0 %v2991_v13 }
  0x58   : > { %603 = vmatpush.msrb.mxu1 %v2993_v14  ;;  %623 = vmatpush.msrb.mxu2 %v2997_v15 }
  0x59   : > { %1386 = vperm.xlu0 %2527, %v2462_v4   ;;  %643 = vmatpush.msrb.mxu3 %v2999_v16  ;;  %v4208_v4 = vld [vmem:[#allocation28_spill] sm:$0xff]  ;;  %v4209_v6 = vld [vmem:[#allocation30_spill] sm:$0xff] }
  0x5a   : > { %584 = vmatpush.msrb.mxu0 %v3001_v17  ;;  %604 = vmatpush.msrb.mxu1 %v3005_v18 }
  0x5b   : > { %624 = vmatpush.msrb.mxu2 %v3007_v19  ;;  %644 = vmatpush.msrb.mxu3 %v3009_v20 }
  0x5c   : > { %585 = vmatpush.msrb.mxu0 %v3013_v21  ;;  %605 = vmatpush.msrb.mxu1 %v3015_v22 }
  0x5d   : > { %625 = vmatpush.msrb.mxu2 %v3019_v23  ;;  %645 = vmatpush.msrb.mxu3 %v3021_v24 }
  0x5e   : > { %586 = vmatpush.msrb.mxu0 %v3025_v25  ;;  %606 = vmatpush.msrb.mxu1 %v3027_v26 }
  0x5f   : > { %626 = vmatpush.msrb.mxu2 %v3031_v27  ;;  %646 = vmatpush.msrb.mxu3 %v3033_v28 }
  0x60   : > { %587 = vmatpush.msrb.mxu0 %v3037_v29  ;;  %607 = vmatpush.msrb.mxu1 %v3039_v30 }
  0x61   : > { %627 = vmatpush.msrb.mxu2 %v3043_v31  ;;  %647 = vmatpush.msrb.mxu3 %v3045_v32 }
  0x62   : > { %588 = vmatpush.msrb.mxu0 %v3049_v33  ;;  %608 = vmatpush.msrb.mxu1 %v3051_v34 }
  0x63   : > { %628 = vmatpush.msrb.mxu2 %v3055_v35  ;;  %648 = vmatpush.msrb.mxu3 %v3057_v36 }
  0x64   : > { %589 = vmatpush.msrb.mxu0 %v3061_v37  ;;  %609 = vmatpush.msrb.mxu1 %v3063_v38 }
  0x65   : > { %629 = vmatpush.msrb.mxu2 %v3067_v39  ;;  %649 = vmatpush.msrb.mxu3 %v3069_v40 }
  0x66   : > { %590 = vmatpush.msrb.mxu0 %v3073_v41  ;;  %610 = vmatpush.msrb.mxu1 %v3075_v42 }
  0x67   : > { %630 = vmatpush.msrb.mxu2 %v3079_v43  ;;  %650 = vmatpush.msrb.mxu3 %v3081_v44 }
  0x68   : > { %591 = vmatpush.msrb.mxu0 %v3085_v45  ;;  %611 = vmatpush.msrb.mxu1 %v3087_v46 }
  0x69   : > { %631 = vmatpush.msrb.mxu2 %v3091_v47  ;;  %651 = vmatpush.msrb.mxu3 %v3093_v48 }
  0x6a   : > { %592 = vmatpush.msrb.mxu0 %v3097_v49  ;;  %612 = vmatpush.msrb.mxu1 %v3099_v50 }
  0x6b   : > { %632 = vmatpush.msrb.mxu2 %v3103_v51  ;;  %652 = vmatpush.msrb.mxu3 %v3105_v52 }
  0x6c   : > { %593 = vmatpush.msrb.mxu0 %v3110_v54  ;;  %613 = vmatpush.msrb.mxu1 %v3112_v55 }
  0x6d   : > { %633 = vmatpush.msrb.mxu2 %v3114_v56  ;;  %653 = vmatpush.msrb.mxu3 %v3118_v57 }
  0x6e   : > { %594 = vmatpush.msrb.mxu0 %v3120_v58  ;;  %614 = vmatpush.msrb.mxu1 %v3122_v59 }
  0x6f   : > { %634 = vmatpush.msrb.mxu2 %v3126_v60  ;;  %654 = vmatpush.msrb.mxu3 %v3131_v61 }
  0x70   : > { %595 = vmatpush.msrb.mxu0 %v3133_v62  ;;  %615 = vmatpush.msrb.mxu1 %v4207_v2 }
  0x71   : > { %635 = vmatpush.msrb.mxu2 %v3139_v0  ;;  %655 = vmatpush.msrb.mxu3 %v3143_v1 }
  0x72   : > { %596 = vmatpush.msrb.mxu0 %v4208_v4  ;;  %616 = vmatpush.msrb.mxu1 %v3149_v3 }
  0x73   : > { %636 = vmatpush.msrb.mxu2 %v4209_v6  ;;  %656 = vmatpush.msrb.mxu3 %v3155_v5 }
  0x74   : > { %597 = vmatpush.msrb.mxu0 %v3160_v7  ;;  %617 = vmatpush.msrb.mxu1 %v3162_v8 }
  0x75   : > { %637 = vmatpush.msrb.mxu2 %v3166_v53  ;;  %657 = vmatpush.msrb.mxu3 %v3168_v63 }
  0x76   : > { %745 = vmatpush.msra.mxu0 %v2981_v9  ;;  %765 = vmatpush.msra.mxu1 %v2983_v10 }
  0x77   : > { %785 = vmatpush.msra.mxu2 %v2985_v11  ;;  %805 = vmatpush.msra.mxu3 %v2989_v12 }
  0x78   : > { %746 = vmatpush.msra.mxu0 %v2991_v13  ;;  %766 = vmatpush.msra.mxu1 %v2993_v14 }
  0x79   : > { %786 = vmatpush.msra.mxu2 %v2997_v15  ;;  %806 = vmatpush.msra.mxu3 %v2999_v16 }
  0x7a   : > { %747 = vmatpush.msra.mxu0 %v3001_v17  ;;  %767 = vmatpush.msra.mxu1 %v3005_v18 }
  0x7b   : > { %787 = vmatpush.msra.mxu2 %v3007_v19  ;;  %807 = vmatpush.msra.mxu3 %v3009_v20 }
  0x7c   : > { %748 = vmatpush.msra.mxu0 %v3013_v21  ;;  %768 = vmatpush.msra.mxu1 %v3015_v22 }
  0x7d   : > { %788 = vmatpush.msra.mxu2 %v3019_v23  ;;  %808 = vmatpush.msra.mxu3 %v3021_v24 }
  0x7e   : > { %749 = vmatpush.msra.mxu0 %v3025_v25  ;;  %769 = vmatpush.msra.mxu1 %v3027_v26 }
  0x7f   : > { %789 = vmatpush.msra.mxu2 %v3031_v27  ;;  %809 = vmatpush.msra.mxu3 %v3033_v28 }
  0x80   : > { %750 = vmatpush.msra.mxu0 %v3037_v29  ;;  %770 = vmatpush.msra.mxu1 %v3039_v30 }
  0x81   : > { %790 = vmatpush.msra.mxu2 %v3043_v31  ;;  %810 = vmatpush.msra.mxu3 %v3045_v32 }
  0x82   : > { %751 = vmatpush.msra.mxu0 %v3049_v33  ;;  %771 = vmatpush.msra.mxu1 %v3051_v34 }
  0x83   : > { %791 = vmatpush.msra.mxu2 %v3055_v35  ;;  %811 = vmatpush.msra.mxu3 %v3057_v36 }
  0x84   : > { %752 = vmatpush.msra.mxu0 %v3061_v37  ;;  %772 = vmatpush.msra.mxu1 %v3063_v38 }
  0x85   : > { %792 = vmatpush.msra.mxu2 %v3067_v39  ;;  %812 = vmatpush.msra.mxu3 %v3069_v40 }
  0x86   : > { %753 = vmatpush.msra.mxu0 %v3073_v41  ;;  %773 = vmatpush.msra.mxu1 %v3075_v42 }
  0x87   : > { %793 = vmatpush.msra.mxu2 %v3079_v43  ;;  %813 = vmatpush.msra.mxu3 %v3081_v44 }
  0x88   : > { %754 = vmatpush.msra.mxu0 %v3085_v45  ;;  %774 = vmatpush.msra.mxu1 %v3087_v46 }
  0x89   : > { %794 = vmatpush.msra.mxu2 %v3091_v47  ;;  %814 = vmatpush.msra.mxu3 %v3093_v48 }
  0x8a   : > { %755 = vmatpush.msra.mxu0 %v3097_v49  ;;  %775 = vmatpush.msra.mxu1 %v3099_v50 }
  0x8b   : > { %795 = vmatpush.msra.mxu2 %v3103_v51  ;;  %815 = vmatpush.msra.mxu3 %v3105_v52 }
  0x8c   : > { %756 = vmatpush.msra.mxu0 %v3110_v54  ;;  %776 = vmatpush.msra.mxu1 %v3112_v55 }
  0x8d   : > { %796 = vmatpush.msra.mxu2 %v3114_v56  ;;  %816 = vmatpush.msra.mxu3 %v3118_v57 }
  0x8e   : > { %757 = vmatpush.msra.mxu0 %v3120_v58  ;;  %777 = vmatpush.msra.mxu1 %v3122_v59 }
  0x8f   : > { %797 = vmatpush.msra.mxu2 %v3126_v60  ;;  %817 = vmatpush.msra.mxu3 %v3131_v61 }
  0x90   : > { %758 = vmatpush.msra.mxu0 %v3133_v62  ;;  %778 = vmatpush.msra.mxu1 %v4207_v2 }
  0x91   : > { %798 = vmatpush.msra.mxu2 %v3139_v0  ;;  %818 = vmatpush.msra.mxu3 %v3143_v1  ;;  %v384_v1 = vld [vmem:[%s4036_s2] ss:$8 sm:$0xf] }
  0x92   : > { %759 = vmatpush.msra.mxu0 %v4208_v4  ;;  %779 = vmatpush.msra.mxu1 %v3149_v3  ;;  %v3307_v0 = vperm.slane %v384_v1, 0  ;;  %v3309_v4 = vperm.slane %v384_v1, 1  ;;  %v3322_v62 = vperm.slane %v384_v1, 2 }
  0x93   : > { %799 = vmatpush.msra.mxu2 %v4209_v6  ;;  %819 = vmatpush.msra.mxu3 %v3155_v5  ;;  %v2438_v5 = vld [vmem:[%s4036_s2 + $0x1] ss:$8 sm:$0xf] }
  0x94   : > { %760 = vmatpush.msra.mxu0 %v3160_v7  ;;  %780 = vmatpush.msra.mxu1 %v3162_v8  ;;  %4210 = vst [vmem:[#allocation36_spill] sm:$0xff] %v3307_v0  ;;  %v3315_v8 = vperm.slane %v2438_v5, 0  ;;  %v3325_v56 = vperm.slane %v2438_v5, 2 }
  0x95   : > { %800 = vmatpush.msra.mxu2 %v3166_v53  ;;  %820 = vmatpush.msra.mxu3 %v3168_v63  ;;  %4211 = vst [vmem:[#allocation37_spill] sm:$0xff] %v3309_v4  ;;  %v3318_v63 = vperm.slane %v2438_v5, 1 }
  0x96   : > { %4212 = vst [vmem:[#allocation38_spill] sm:$0xff] %v3315_v8 }
  0x97   : > { %4213 = vst [vmem:[#allocation39_spill] sm:$0xff] %v3318_v63 }
  0x98   : > { %4214 = vst [vmem:[#allocation40_spill] sm:$0xff] %v3322_v62 }
  0x99   : > { %4215 = vst [vmem:[#allocation41_spill] sm:$0xff] %v3325_v56 }
  0xba   : > { %v391_v6 = vpop.permute.xlu0 %390 }
  0xbb   : > { %v402_v7 = vmul.f32 %v3307_v0, %v391_v6  ;;  %v403_v53 = vmul.f32 %v3309_v4, %v391_v6  ;;  %v404_v57 = vmul.f32 %v3322_v62, %v391_v6 }
  0xbd   : > { %v415_v3 = vadd.f32 %v3315_v8, %v402_v7  ;;  %v416_v2 = vadd.f32 %v3318_v63, %v403_v53  ;;  %v417_v4 = vadd.f32 %v3325_v56, %v404_v57  ;;  %v3328_v53 = vperm.slane %v384_v1, 3 }
  0xbf   : > { %4216 = vst [vmem:[#allocation42_spill] sm:$0xff] %v3328_v53 }
  0xd0   : > { %v436_v61 = vpop.f32.mrf.mxu0 }
  0xd1   : > { %v456_v60 = vpop.f32.mrf.mxu1  ;;  %v499_v59 = vadd.f32 %v436_v61, %v415_v3  ;;  %v405_v61 = vmul.f32 %v3328_v53, %v391_v6  ;;  %v3331_v3 = vperm.slane %v2438_v5, 3 }
  0xd2   : > { %v500_v58 = vadd.f32 %v456_v60, %v416_v2 }
  0xd3   : > { %v2439_v0 = vmul.f32 -1.442695, %v499_v59  ;;  %4217 = vst [vmem:[#allocation43_spill] sm:$0xff] %v3331_v3  ;;  %v418_v57 = vadd.f32 %v3331_v3, %v405_v61 }
  0xd4   : > { %v2440_v55 = vmul.f32 -1.442695, %v500_v58 }
  0xd5   : > { %2535 = vpow2.f32 %v2439_v0 }
  0xd6   : > { %2537 = vpow2.f32 %v2440_v55 }
  0xd7   : > { %v476_v54 = vpop.f32.mrf.mxu2 }
  0xd8   : > { %v501_v7 = vadd.f32 %v476_v54, %v417_v4  ;;  %v496_v58 = vpop.f32.mrf.mxu3 }
  0xd9   : > { %v502_v0 = vadd.f32 %v496_v58, %v418_v57 }
  0xda   : > { %v2441_v8 = vmul.f32 -1.442695, %v501_v7 }
  0xdb   : > { %v2536_v63 = vpop.eup %2535 }
  0xdc   : > { %v2538_v52 = vpop.eup %2537  ;;  %v512_v51 = vadd.f32 1.0, %v2536_v63  ;;  %2539 = vpow2.f32 %v2441_v8 }
  0xdd   : > { %v513_v60 = vadd.f32 1.0, %v2538_v52 }
  0xde   : > { %2541 = vrcp.f32 %v512_v51  ;;  %v526_v52 = vand.u32 2147483648, %v512_v51  ;;  %v524_v5 = vand.u32 2147483647, %v512_v51  ;;  %vm520_vm2 = vweird.f32 %v512_v51 }
  0xdf   : > { %2543 = vrcp.f32 %v513_v60  ;;  %v541_v7 = vand.u32 2147483648, %v513_v60  ;;  %v539_v56 = vand.u32 2147483647, %v513_v60  ;;  %vm535_vm3 = vweird.f32 %v513_v60 }
  0xe0   : > { %vm525_vm5 = vcmp.eq.f32.partialorder %v524_v5, 8.507059e+37  ;;  %v4244_v5 = vld [vmem:[#allocation35_spill] sm:$0xff] }
  0xe1   : > { %v542_v3 = vor.u32 1.1754944e-38, %v541_v7  ;;  %vm540_vm7 = vcmp.eq.f32.partialorder %v539_v56, 8.507059e+37 }
  0xe2   : > { %v2540_v55 = vpop.eup %2539 }
  0xe3   : > { %v514_v59 = vadd.f32 1.0, %v2540_v55  ;;  %v527_v55 = vor.u32 1.1754944e-38, %v526_v52 }
  0xe4   : > { %v2542_v54 = vpop.eup %2541 }
  0xe5   : > { %v2544_v1 = vpop.eup %2543  ;;  %v516_v2 = vmul.f32 %v2542_v54, %v512_v51  ;;  %2545 = vrcp.f32 %v514_v59  ;;  %vm521_vm0 = vweird.f32 %v2542_v54  ;;  %vm550_vm9 = vweird.f32 %v514_v59 }
  0xe6   : > { %v531_v4 = vmul.f32 %v2544_v1, %v513_v60  ;;  %2547 = vtanh.f32 %v502_v0  ;;  %vm536_vm1 = vweird.f32 %v2544_v1  ;;  %vm522_vm4 = vmor %vm520_vm2, %vm521_vm0  ;;  %v556_v60 = vand.u32 2147483648, %v514_v59 }
  0xe7   : > { %v517_v63 = vsub.f32 1.0, %v516_v2  ;;  %vm537_vm6 = vmor %vm535_vm3, %vm536_vm1 }
  0xe8   : > { %v532_v8 = vsub.f32 1.0, %v531_v4  ;;  %v557_v52 = vor.u32 1.1754944e-38, %v556_v60 }
  0xe9   : > { %v518_v6 = vmul.f32 %v2542_v54, %v517_v63 }
  0xea   : > { %v533_v53 = vmul.f32 %v2544_v1, %v532_v8 }
  0xeb   : > { %v2546_v62 = vpop.eup %2545  ;;  %v519_v61 = vadd.f32 %v2542_v54, %v518_v6 }
  0xec   : > { %v546_v58 = vmul.f32 %v2546_v62, %v514_v59  ;;  %v534_v57 = vadd.f32 %v2544_v1, %v533_v53  ;;  %v2548_v0 = vpop.eup %2547  ;;  %vm551_vm8 = vweird.f32 %v2546_v62  ;;  %v554_v53 = vand.u32 2147483647, %v514_v59  ;;  %v4243_v59 = vld [vmem:[#allocation34_spill] sm:$0xff] }
  0xed   : > { %v523_v2 = vsel %vm522_vm4, %v2542_v54, %v519_v61  ;;  %vm552_vm10 = vmor %vm550_vm9, %vm551_vm8  ;;  %v572_v61 = vpop.permute.xlu0 %571 }
  0xee   : > { %v547_v4 = vsub.f32 1.0, %v546_v58  ;;  %v528_v63 = vsel %vm525_vm5, %v527_v55, %v523_v2  ;;  %v538_v50 = vsel %vm537_vm6, %v2544_v1, %v534_v57  ;;  %vm555_vm11 = vcmp.eq.f32.partialorder %v554_v53, 8.507059e+37  ;;  %v4245_v58 = vld [vmem:[#allocation36_spill] sm:$0xff]  ;;  %v4246_v57 = vld [vmem:[#allocation37_spill] sm:$0xff] }
  0xef   : > { %v543_v8 = vsel %vm540_vm7, %v542_v3, %v538_v50  ;;  %v562_v49 = vmul.f32 %v2548_v0, %v528_v63  ;;  %v4240_v50 = vld [vmem:[#allocation31_spill] sm:$0xff]  ;;  %v4242_v3 = vld [vmem:[#allocation33_spill] sm:$0xff]  ;;  %v574_v55 = vmul.f32 %v572_v61, %v4245_v58  ;;  %v575_v2 = vmul.f32 %v572_v61, %v4246_v57  ;;  %v4247_v0 = vld [vmem:[#allocation38_spill] sm:$0xff] }
  0xf0   : > { %v548_v48 = vmul.f32 %v2546_v62, %v547_v4  ;;  %v561_v47 = vmul.f32 0.0, %v543_v8  ;;  %v4248_v63 = vld [vmem:[#allocation39_spill] sm:$0xff]  ;;  %v4250_v58 = vld [vmem:[#allocation41_spill] sm:$0xff] }
  0xf1   : > { %v578_v4 = vadd.f32 %v574_v55, %v4247_v0  ;;  %v579_v8 = vadd.f32 %v575_v2, %v4248_v63  ;;  %v2450_v2 = vld [vmem:[%s2971_s7 + $0x18] sm:$0xff] }
  0xf2   : > { %v3334_v6 = vadd.f32 %v562_v49, %v561_v47  ;;  %v549_v51 = vadd.f32 %v2546_v62, %v548_v48  ;;  %v4237_v47 = vld [vmem:[#allocation28_spill] sm:$0xff]  ;;  %v4238_v48 = vld [vmem:[#allocation29_spill] sm:$0xff]  ;;  %v4239_v49 = vld [vmem:[#allocation30_spill] sm:$0xff] }
  0xf4   : > { %2549 = vtanh.f32 %v3334_v6  ;;  %v553_v54 = vsel %vm552_vm10, %v2546_v62, %v549_v51  ;;  %v4241_v62 = vld [vmem:[#allocation32_spill] sm:$0xff] }
  0xf5   : > { %v558_v1 = vsel %vm555_vm11, %v557_v52, %v553_v54  ;;  %v4249_v52 = vld [vmem:[#allocation40_spill] sm:$0xff] }
  0xfa   : > { %v2550_v7 = vpop.eup %2549 }
  0xfb   : > { %v3337_v56 = vmul.f32 %v2550_v7, %v558_v1  ;;  %v576_v7 = vmul.f32 %v572_v61, %v4249_v52 }
  0xfd   : > { %4218 = vst [vmem:[#allocation44_spill] sm:$0xff] %v3337_v56  ;;  %598 = vmatmul.f32.vlgmr.msrb.gmra.mxu0 %v3337_v56  ;;  %618 = vmatmul.f32.vlgmr.msrb.gmra.mxu1 %v3337_v56 }
  0xfe   : > { %638 = vmatmul.f32.vlgmr.msrb.gmra.mxu2 %v3337_v56  ;;  %658 = vmatmul.f32.vlgmr.msrb.gmra.mxu3 %v3337_v56 }
  0xff   : > { %908 = vmatpush.msrb.mxu0 %v2981_v9  ;;  %928 = vmatpush.msrb.mxu1 %v2983_v10  ;;  %v4219_v9 = vld [vmem:[#allocation10_spill] sm:$0xff]  ;;  %v4220_v10 = vld [vmem:[#allocation11_spill] sm:$0xff] }
 0x100   : > { %948 = vmatpush.msrb.mxu2 %v2985_v11  ;;  %968 = vmatpush.msrb.mxu3 %v2989_v12  ;;  %v4221_v11 = vld [vmem:[#allocation12_spill] sm:$0xff]  ;;  %v4222_v12 = vld [vmem:[#allocation13_spill] sm:$0xff] }
 0x101   : > { %909 = vmatpush.msrb.mxu0 %v2991_v13  ;;  %929 = vmatpush.msrb.mxu1 %v2993_v14  ;;  %v4223_v13 = vld [vmem:[#allocation14_spill] sm:$0xff]  ;;  %v4224_v14 = vld [vmem:[#allocation15_spill] sm:$0xff] }
 0x102   : > { %949 = vmatpush.msrb.mxu2 %v2997_v15  ;;  %969 = vmatpush.msrb.mxu3 %v2999_v16  ;;  %v4225_v15 = vld [vmem:[#allocation16_spill] sm:$0xff]  ;;  %v4226_v16 = vld [vmem:[#allocation17_spill] sm:$0xff] }
 0x103   : > { %910 = vmatpush.msrb.mxu0 %v3001_v17  ;;  %930 = vmatpush.msrb.mxu1 %v3005_v18  ;;  %v4227_v17 = vld [vmem:[#allocation18_spill] sm:$0xff]  ;;  %v4228_v18 = vld [vmem:[#allocation19_spill] sm:$0xff] }
 0x104   : > { %950 = vmatpush.msrb.mxu2 %v3007_v19  ;;  %970 = vmatpush.msrb.mxu3 %v3009_v20  ;;  %v4229_v19 = vld [vmem:[#allocation20_spill] sm:$0xff]  ;;  %v4230_v20 = vld [vmem:[#allocation21_spill] sm:$0xff] }
 0x105   : > { %911 = vmatpush.msrb.mxu0 %v3013_v21  ;;  %931 = vmatpush.msrb.mxu1 %v3015_v22  ;;  %v4231_v21 = vld [vmem:[#allocation22_spill] sm:$0xff]  ;;  %v4232_v22 = vld [vmem:[#allocation23_spill] sm:$0xff] }
 0x106   : > { %951 = vmatpush.msrb.mxu2 %v3019_v23  ;;  %971 = vmatpush.msrb.mxu3 %v3021_v24  ;;  %v4233_v23 = vld [vmem:[#allocation24_spill] sm:$0xff]  ;;  %v4234_v24 = vld [vmem:[#allocation25_spill] sm:$0xff] }
 0x107   : > { %912 = vmatpush.msrb.mxu0 %v3025_v25  ;;  %932 = vmatpush.msrb.mxu1 %v3027_v26  ;;  %v4235_v25 = vld [vmem:[#allocation26_spill] sm:$0xff]  ;;  %v4236_v26 = vld [vmem:[#allocation27_spill] sm:$0xff] }
 0x108   : > { %952 = vmatpush.msrb.mxu2 %v3031_v27  ;;  %972 = vmatpush.msrb.mxu3 %v3033_v28 }
 0x109   : > { %913 = vmatpush.msrb.mxu0 %v3037_v29  ;;  %933 = vmatpush.msrb.mxu1 %v3039_v30 }
 0x10a   : > { %953 = vmatpush.msrb.mxu2 %v3043_v31  ;;  %973 = vmatpush.msrb.mxu3 %v3045_v32 }
 0x10b   : > { %914 = vmatpush.msrb.mxu0 %v3049_v33  ;;  %934 = vmatpush.msrb.mxu1 %v3051_v34 }
 0x10c   : > { %954 = vmatpush.msrb.mxu2 %v3055_v35  ;;  %974 = vmatpush.msrb.mxu3 %v3057_v36 }
 0x10d   : > { %915 = vmatpush.msrb.mxu0 %v3061_v37  ;;  %935 = vmatpush.msrb.mxu1 %v3063_v38 }
 0x10e   : > { %955 = vmatpush.msrb.mxu2 %v3067_v39  ;;  %975 = vmatpush.msrb.mxu3 %v3069_v40 }
 0x10f   : > { %916 = vmatpush.msrb.mxu0 %v3073_v41  ;;  %936 = vmatpush.msrb.mxu1 %v3075_v42 }
 0x110   : > { %956 = vmatpush.msrb.mxu2 %v3079_v43  ;;  %976 = vmatpush.msrb.mxu3 %v3081_v44 }
 0x111   : > { %917 = vmatpush.msrb.mxu0 %v3085_v45  ;;  %937 = vmatpush.msrb.mxu1 %v3087_v46 }
 0x112   : > { %957 = vmatpush.msrb.mxu2 %v4219_v9  ;;  %977 = vmatpush.msrb.mxu3 %v4220_v10 }
 0x113   : > { %918 = vmatpush.msrb.mxu0 %v4221_v11  ;;  %938 = vmatpush.msrb.mxu1 %v4222_v12 }
 0x114   : > { %958 = vmatpush.msrb.mxu2 %v4223_v13  ;;  %978 = vmatpush.msrb.mxu3 %v4224_v14 }
 0x115   : > { %919 = vmatpush.msrb.mxu0 %v4225_v15  ;;  %939 = vmatpush.msrb.mxu1 %v4226_v16 }
 0x116   : > { %959 = vmatpush.msrb.mxu2 %v4227_v17  ;;  %979 = vmatpush.msrb.mxu3 %v4228_v18 }
 0x117   : > { %920 = vmatpush.msrb.mxu0 %v4229_v19  ;;  %940 = vmatpush.msrb.mxu1 %v4230_v20 }
 0x118   : > { %960 = vmatpush.msrb.mxu2 %v4231_v21  ;;  %980 = vmatpush.msrb.mxu3 %v4232_v22 }
 0x119   : > { %921 = vmatpush.msrb.mxu0 %v4233_v23  ;;  %941 = vmatpush.msrb.mxu1 %v4234_v24 }
 0x11a   : > { %961 = vmatpush.msrb.mxu2 %v4235_v25  ;;  %981 = vmatpush.msrb.mxu3 %v4236_v26 }
 0x11b   : > { %922 = vmatpush.msrb.mxu0 %v4237_v47  ;;  %942 = vmatpush.msrb.mxu1 %v4238_v48 }
 0x11c   : > { %962 = vmatpush.msrb.mxu2 %v4239_v49  ;;  %982 = vmatpush.msrb.mxu3 %v4240_v50 }
 0x11d   : > { %923 = vmatpush.msrb.mxu0 %v4241_v62  ;;  %943 = vmatpush.msrb.mxu1 %v4242_v3 }
 0x11e   : > { %963 = vmatpush.msrb.mxu2 %v4243_v59  ;;  %983 = vmatpush.msrb.mxu3 %v4244_v5  ;;  %v2446_v59 = vld [vmem:[%s2971_s7 + $0x10] sm:$0xff]  ;;  %v580_v5 = vadd.f32 %v576_v7, %v4250_v58 }
 0x11f   : > { %734 = vperm.xlu1 %2528, %v2446_v59  }
 0x127   : > { %897 = vperm.xlu1 %2528, %v2450_v2  }
 0x17a   : > { %v599_v51 = vpop.f32.mrf.mxu0  ;;  %v619_v60 = vpop.f32.mrf.mxu1 }
 0x17b   : > { %v662_v53 = vadd.f32 %v599_v51, %v578_v4  ;;  %v663_v54 = vadd.f32 %v619_v60, %v579_v8  ;;  %v4251_v8 = vld [vmem:[#allocation42_spill] sm:$0xff] }
 0x17c   : > { %v577_v51 = vmul.f32 %v572_v61, %v4251_v8 }
 0x17d   : > { %v2443_v1 = vmul.f32 -1.442695, %v662_v53  ;;  %v2444_v56 = vmul.f32 -1.442695, %v663_v54  ;;  %v2466_v54 = vld [vmem:[%s2971_s7 + $0x38] sm:$0xff] }
 0x17e   : > { %1549 = vperm.xlu1 %2528, %v2466_v54  }
 0x17f   : > { %2551 = vpow2.f32 %v2443_v1 }
 0x180   : > { %2553 = vpow2.f32 %v2444_v56  ;;  %v4252_v56 = vld [vmem:[#allocation43_spill] sm:$0xff] }
 0x181   : > { %v639_v57 = vpop.f32.mrf.mxu2  ;;  %v659_v60 = vpop.f32.mrf.mxu3  ;;  %v581_v53 = vadd.f32 %v577_v51, %v4252_v56 }
 0x182   : > { %v664_v55 = vadd.f32 %v639_v57, %v580_v5 }
 0x183   : > { %v665_v5 = vadd.f32 %v659_v60, %v581_v53 }
 0x184   : > { %v2445_v0 = vmul.f32 -1.442695, %v664_v55 }
 0x185   : > { %v2552_v63 = vpop.eup %2551 }
 0x186   : > { %v2554_v3 = vpop.eup %2553  ;;  %v675_v62 = vadd.f32 1.0, %v2552_v63  ;;  %2555 = vpow2.f32 %v2445_v0 }
 0x187   : > { %v676_v4 = vadd.f32 1.0, %v2554_v3 }
 0x188   : > { %2557 = vrcp.f32 %v675_v62  ;;  %v689_v2 = vand.u32 2147483648, %v675_v62  ;;  %v687_v8 = vand.u32 2147483647, %v675_v62  ;;  %vm683_vm14 = vweird.f32 %v675_v62 }
 0x189   : > { %2559 = vrcp.f32 %v676_v4  ;;  %v704_v58 = vand.u32 2147483648, %v676_v4  ;;  %v702_v51 = vand.u32 2147483647, %v676_v4  ;;  %vm698_vm15 = vweird.f32 %v676_v4 }
 0x18a   : > { %v690_v53 = vor.u32 1.1754944e-38, %v689_v2  ;;  %vm688_vm2 = vcmp.eq.f32.partialorder %v687_v8, 8.507059e+37 }
 0x18b   : > { %vm703_vm3 = vcmp.eq.f32.partialorder %v702_v51, 8.507059e+37  ;;  %v3446_v51 = vld [vmem:[#allocation4 + $0x1d0] sm:$0xff] }
 0x18c   : > { %v2556_v59 = vpop.eup %2555 }
 0x18d   : > { %v677_v7 = vadd.f32 1.0, %v2556_v59 }
 0x18e   : > { %v2558_v1 = vpop.eup %2557 }
 0x18f   : > { %v2560_v57 = vpop.eup %2559  ;;  %v679_v55 = vmul.f32 %v2558_v1, %v675_v62  ;;  %2561 = vrcp.f32 %v677_v7  ;;  %vm684_vm12 = vweird.f32 %v2558_v1  ;;  %v719_v2 = vand.u32 2147483648, %v677_v7 }
 0x190   : > { %v694_v63 = vmul.f32 %v2560_v57, %v676_v4  ;;  %2563 = vtanh.f32 %v665_v5  ;;  %vm699_vm13 = vweird.f32 %v2560_v57  ;;  %vm685_vm0 = vmor %vm683_vm14, %vm684_vm12  ;;  %vm713_vm5 = vweird.f32 %v677_v7 }
 0x191   : > { %v680_v0 = vsub.f32 1.0, %v679_v55  ;;  %vm700_vm1 = vmor %vm698_vm15, %vm699_vm13  ;;  %v705_v55 = vor.u32 1.1754944e-38, %v704_v58  ;;  %v717_v58 = vand.u32 2147483647, %v677_v7  ;;  %v720_v8 = vor.u32 1.1754944e-38, %v719_v2  ;;  %v4269_v2 = vld [vmem:[#allocation43_spill] sm:$0xff] }
 0x192   : > { %v695_v3 = vsub.f32 1.0, %v694_v63 }
 0x193   : > { %v681_v61 = vmul.f32 %v2558_v1, %v680_v0  ;;  %vm718_vm7 = vcmp.eq.f32.partialorder %v717_v58, 8.507059e+37 }
 0x194   : > { %v696_v52 = vmul.f32 %v2560_v57, %v695_v3 }
 0x195   : > { %v2562_v56 = vpop.eup %2561  ;;  %v682_v59 = vadd.f32 %v2558_v1, %v681_v61 }
 0x196   : > { %v709_v60 = vmul.f32 %v2562_v56, %v677_v7  ;;  %v697_v54 = vadd.f32 %v2560_v57, %v696_v52  ;;  %v2564_v5 = vpop.eup %2563  ;;  %vm714_vm4 = vweird.f32 %v2562_v56  ;;  %v3443_v7 = vld [vmem:[#allocation4 + $0x1c8] sm:$0xff] }
 0x197   : > { %v686_v63 = vsel %vm685_vm0, %v2558_v1, %v682_v59  ;;  %vm715_vm6 = vmor %vm713_vm5, %vm714_vm4  ;;  %v3449_v59 = vld [vmem:[#allocation4 + $0x1d8] sm:$0xff] }
 0x198   : > { %v710_v50 = vsub.f32 1.0, %v709_v60  ;;  %v691_v0 = vsel %vm688_vm2, %v690_v53, %v686_v63  ;;  %v701_v49 = vsel %vm700_vm1, %v2560_v57, %v697_v54  ;;  %v3452_v60 = vld [vmem:[#allocation4 + $0x1a0] sm:$0xff]  ;;  %v3455_v53 = vld [vmem:[#allocation4 + $0x1a8] sm:$0xff]  ;;  %v3458_v54 = vld [vmem:[#allocation4 + $0x1b0] sm:$0xff] }
 0x199   : > { %v706_v3 = vsel %vm703_vm3, %v705_v55, %v701_v49  ;;  %v725_v48 = vmul.f32 %v2564_v5, %v691_v0  ;;  %v3461_v55 = vld [vmem:[#allocation4 + $0x1b8] sm:$0xff]  ;;  %v3464_v63 = vld [vmem:[#allocation4 + $0x180] sm:$0xff]  ;;  %v3467_v5 = vld [vmem:[#allocation4 + $0x188] sm:$0xff] }
 0x19a   : > { %v711_v47 = vmul.f32 %v2562_v56, %v710_v50  ;;  %v724_v61 = vmul.f32 %v706_v3, %v3334_v6  ;;  %v3428_v6 = vld [vmem:[#allocation4 + $0x1e0] sm:$0xff]  ;;  %v3437_v50 = vld [vmem:[#allocation4 + $0x1f8] sm:$0xff]  ;;  %v3470_v0 = vld [vmem:[#allocation4 + $0x190] sm:$0xff] }
 0x19b   : > { %v3473_v3 = vld [vmem:[#allocation4 + $0x198] sm:$0xff] }
 0x19c   : > { %v3419_v62 = vadd.f32 %v725_v48, %v724_v61  ;;  %v712_v4 = vadd.f32 %v2562_v56, %v711_v47  ;;  %v3431_v47 = vld [vmem:[#allocation4 + $0x1e8] sm:$0xff]  ;;  %v3434_v48 = vld [vmem:[#allocation4 + $0x1f0] sm:$0xff]  ;;  %v3476_v61 = vld [vmem:[#allocation4 + $0x160] sm:$0xff] }
 0x19e   : > { %2565 = vtanh.f32 %v3419_v62  ;;  %v716_v52 = vsel %vm715_vm6, %v2562_v56, %v712_v4  ;;  %v3440_v56 = vld [vmem:[#allocation4 + $0x1c0] sm:$0xff]  ;;  %v3479_v4 = vld [vmem:[#allocation4 + $0x168] sm:$0xff] }
 0x19f   : > { %v721_v57 = vsel %vm718_vm7, %v720_v8, %v716_v52 }
 0x1a4   : > { %v2566_v1 = vpop.eup %2565 }
 0x1a5   : > { %v3422_v49 = vmul.f32 %v2566_v1, %v721_v57 }
 0x1a7   : > { %4253 = vst [vmem:[#allocation10_spill] sm:$0xff] %v3422_v49  ;;  %761 = vmatmul.f32.vlgmr.msra.gmra.mxu0 %v3422_v49  ;;  %781 = vmatmul.f32.vlgmr.msra.gmra.mxu1 %v3422_v49 }
 0x1a8   : > { %801 = vmatmul.f32.vlgmr.msra.gmra.mxu2 %v3422_v49  ;;  %821 = vmatmul.f32.vlgmr.msra.gmra.mxu3 %v3422_v49  ;;  %v3672_v49 = vld [vmem:[#allocation4 + $0x50] sm:$0xff] }
 0x1a9   : > { %1071 = vmatpush.msra.mxu0 %v3428_v6  ;;  %1091 = vmatpush.msra.mxu1 %v3431_v47 }
 0x1aa   : > { %1111 = vmatpush.msra.mxu2 %v3434_v48  ;;  %1131 = vmatpush.msra.mxu3 %v3437_v50 }
 0x1ab   : > { %1072 = vmatpush.msra.mxu0 %v3440_v56  ;;  %1092 = vmatpush.msra.mxu1 %v3443_v7 }
 0x1ac   : > { %1112 = vmatpush.msra.mxu2 %v3446_v51  ;;  %1132 = vmatpush.msra.mxu3 %v3449_v59 }
 0x1ad   : > { %1073 = vmatpush.msra.mxu0 %v3452_v60  ;;  %1093 = vmatpush.msra.mxu1 %v3455_v53 }
 0x1ae   : > { %1113 = vmatpush.msra.mxu2 %v3458_v54  ;;  %1133 = vmatpush.msra.mxu3 %v3461_v55 }
 0x1af   : > { %1074 = vmatpush.msra.mxu0 %v3464_v63  ;;  %1094 = vmatpush.msra.mxu1 %v3467_v5 }
 0x1b0   : > { %1114 = vmatpush.msra.mxu2 %v3470_v0  ;;  %1134 = vmatpush.msra.mxu3 %v3473_v3 }
 0x1b1   : > { %1075 = vmatpush.msra.mxu0 %v3476_v61  ;;  %1095 = vmatpush.msra.mxu1 %v3479_v4 }
 0x1b2   : > { %1115 = vmatpush.msra.mxu2 %v3031_v27  ;;  %1135 = vmatpush.msra.mxu3 %v3033_v28  ;;  %v4254_v27 = vld [vmem:[#allocation28_spill] sm:$0xff]  ;;  %v4255_v28 = vld [vmem:[#allocation29_spill] sm:$0xff] }
 0x1b3   : > { %1076 = vmatpush.msra.mxu0 %v3037_v29  ;;  %1096 = vmatpush.msra.mxu1 %v3039_v30  ;;  %v4256_v29 = vld [vmem:[#allocation30_spill] sm:$0xff]  ;;  %v4257_v30 = vld [vmem:[#allocation31_spill] sm:$0xff]  ;;  %4287 = vst [vmem:[#allocation28_spill] sm:$0xff] %v3672_v49 }
 0x1b4   : > { %1116 = vmatpush.msra.mxu2 %v3043_v31  ;;  %1136 = vmatpush.msra.mxu3 %v3045_v32  ;;  %v4258_v31 = vld [vmem:[#allocation32_spill] sm:$0xff]  ;;  %v4259_v32 = vld [vmem:[#allocation33_spill] sm:$0xff] }
 0x1b5   : > { %1077 = vmatpush.msra.mxu0 %v3049_v33  ;;  %1097 = vmatpush.msra.mxu1 %v3051_v34  ;;  %v4260_v33 = vld [vmem:[#allocation34_spill] sm:$0xff]  ;;  %v4261_v34 = vld [vmem:[#allocation35_spill] sm:$0xff] }
 0x1b6   : > { %1117 = vmatpush.msra.mxu2 %v3055_v35  ;;  %1137 = vmatpush.msra.mxu3 %v3057_v36  ;;  %v735_v35 = vpop.permute.xlu1 %734  ;;  %v4262_v36 = vld [vmem:[#allocation36_spill] sm:$0xff] }
 0x1b7   : > { %1078 = vmatpush.msra.mxu0 %v3061_v37  ;;  %1098 = vmatpush.msra.mxu1 %v3063_v38  ;;  %v737_v37 = vmul.f32 %v735_v35, %v4262_v36  ;;  %v4263_v38 = vld [vmem:[#allocation37_spill] sm:$0xff] }
 0x1b8   : > { %1118 = vmatpush.msra.mxu2 %v3067_v39  ;;  %1138 = vmatpush.msra.mxu3 %v3069_v40  ;;  %v738_v39 = vmul.f32 %v735_v35, %v4263_v38  ;;  %v4264_v40 = vld [vmem:[#allocation38_spill] sm:$0xff] }
 0x1b9   : > { %1079 = vmatpush.msra.mxu0 %v3073_v41  ;;  %1099 = vmatpush.msra.mxu1 %v3075_v42  ;;  %v741_v41 = vadd.f32 %v737_v37, %v4264_v40  ;;  %v4265_v42 = vld [vmem:[#allocation39_spill] sm:$0xff] }
 0x1ba   : > { %1119 = vmatpush.msra.mxu2 %v3079_v43  ;;  %1139 = vmatpush.msra.mxu3 %v3081_v44  ;;  %v742_v43 = vadd.f32 %v738_v39, %v4265_v42 }
 0x1bb   : > { %1080 = vmatpush.msra.mxu0 %v3085_v45  ;;  %1100 = vmatpush.msra.mxu1 %v3087_v46 }
 0x1bc   : > { %1120 = vmatpush.msra.mxu2 %v4219_v9  ;;  %1140 = vmatpush.msra.mxu3 %v4220_v10  ;;  %v4266_v10 = vld [vmem:[#allocation40_spill] sm:$0xff] }
 0x1bd   : > { %1081 = vmatpush.msra.mxu0 %v4221_v11  ;;  %1101 = vmatpush.msra.mxu1 %v4222_v12  ;;  %v739_v11 = vmul.f32 %v735_v35, %v4266_v10 }
 0x1be   : > { %1121 = vmatpush.msra.mxu2 %v4223_v13  ;;  %1141 = vmatpush.msra.mxu3 %v4224_v14  ;;  %v4267_v14 = vld [vmem:[#allocation41_spill] sm:$0xff] }
 0x1bf   : > { %1082 = vmatpush.msra.mxu0 %v4225_v15  ;;  %1102 = vmatpush.msra.mxu1 %v4226_v16  ;;  %v743_v15 = vadd.f32 %v739_v11, %v4267_v14 }
 0x1c0   : > { %1122 = vmatpush.msra.mxu2 %v4227_v17  ;;  %1142 = vmatpush.msra.mxu3 %v4228_v18 }
 0x1c1   : > { %1083 = vmatpush.msra.mxu0 %v4229_v19  ;;  %1103 = vmatpush.msra.mxu1 %v4230_v20 }
 0x1c2   : > { %1123 = vmatpush.msra.mxu2 %v4231_v21  ;;  %1143 = vmatpush.msra.mxu3 %v4232_v22 }
 0x1c3   : > { %1084 = vmatpush.msra.mxu0 %v4233_v23  ;;  %1104 = vmatpush.msra.mxu1 %v4234_v24  ;;  %v4268_v23 = vld [vmem:[#allocation42_spill] sm:$0xff] }
 0x1c4   : > { %1124 = vmatpush.msra.mxu2 %v4235_v25  ;;  %1144 = vmatpush.msra.mxu3 %v4236_v26  ;;  %v740_v24 = vmul.f32 %v735_v35, %v4268_v23 }
 0x1c5   : > { %1085 = vmatpush.msra.mxu0 %v4254_v27  ;;  %1105 = vmatpush.msra.mxu1 %v4255_v28 }
 0x1c6   : > { %1125 = vmatpush.msra.mxu2 %v4256_v29  ;;  %1145 = vmatpush.msra.mxu3 %v4257_v30  ;;  %v744_v58 = vadd.f32 %v740_v24, %v4269_v2 }
 0x1c7   : > { %1086 = vmatpush.msra.mxu0 %v4258_v31  ;;  %1106 = vmatpush.msra.mxu1 %v4259_v32 }
 0x1c8   : > { %1126 = vmatpush.msra.mxu2 %v4260_v33  ;;  %1146 = vmatpush.msra.mxu3 %v4261_v34 }
 0x224   : > { %v762_v44 = vpop.f32.mrf.mxu0  ;;  %v782_v45 = vpop.f32.mrf.mxu1 }
 0x225   : > { %v825_v46 = vadd.f32 %v762_v44, %v741_v41  ;;  %v826_v9 = vadd.f32 %v782_v45, %v742_v43 }
 0x227   : > { %v2447_v12 = vmul.f32 -1.442695, %v825_v46  ;;  %v2448_v13 = vmul.f32 -1.442695, %v826_v9 }
 0x229   : > { %2567 = vpow2.f32 %v2447_v12 }
 0x22a   : > { %2569 = vpow2.f32 %v2448_v13 }
 0x22b   : > { %v802_v16 = vpop.f32.mrf.mxu2  ;;  %v822_v25 = vpop.f32.mrf.mxu3 }
 0x22c   : > { %v827_v17 = vadd.f32 %v802_v16, %v743_v15  ;;  %v828_v1 = vadd.f32 %v822_v25, %v744_v58 }
 0x22e   : > { %v2449_v18 = vmul.f32 -1.442695, %v827_v17 }
 0x22f   : > { %v2568_v19 = vpop.eup %2567 }
 0x230   : > { %v2570_v20 = vpop.eup %2569  ;;  %v838_v21 = vadd.f32 1.0, %v2568_v19  ;;  %2571 = vpow2.f32 %v2449_v18 }
 0x231   : > { %v839_v22 = vadd.f32 1.0, %v2570_v20 }
 0x232   : > { %2573 = vrcp.f32 %v838_v21  ;;  %v852_v31 = vand.u32 2147483648, %v838_v21  ;;  %v850_v34 = vand.u32 2147483647, %v838_v21  ;;  %vm846_vm10 = vweird.f32 %v838_v21 }
 0x233   : > { %2575 = vrcp.f32 %v839_v22  ;;  %v867_v32 = vand.u32 2147483648, %v839_v22  ;;  %v865_v37 = vand.u32 2147483647, %v839_v22  ;;  %vm861_vm11 = vweird.f32 %v839_v22 }
 0x234   : > { %v853_v44 = vor.u32 1.1754944e-38, %v852_v31  ;;  %vm851_vm14 = vcmp.eq.f32.partialorder %v850_v34, 8.507059e+37  ;;  %v3585_v31 = vld [vmem:[#allocation4 + $0x128] sm:$0xff]  ;;  %v3594_v34 = vld [vmem:[#allocation4 + $0x100] sm:$0xff] }
 0x235   : > { %v868_v46 = vor.u32 1.1754944e-38, %v867_v32  ;;  %vm866_vm15 = vcmp.eq.f32.partialorder %v865_v37, 8.507059e+37  ;;  %v3588_v32 = vld [vmem:[#allocation4 + $0x130] sm:$0xff] }
 0x236   : > { %v2572_v26 = vpop.eup %2571  ;;  %v3600_v37 = vld [vmem:[#allocation4 + $0x110] sm:$0xff] }
 0x237   : > { %v840_v52 = vadd.f32 1.0, %v2572_v26 }
 0x238   : > { %v2574_v8 = vpop.eup %2573 }
 0x239   : > { %v2576_v57 = vpop.eup %2575  ;;  %v842_v27 = vmul.f32 %v2574_v8, %v838_v21  ;;  %2577 = vrcp.f32 %v840_v52  ;;  %vm847_vm8 = vweird.f32 %v2574_v8  ;;  %vm876_vm1 = vweird.f32 %v840_v52 }
 0x23a   : > { %v857_v28 = vmul.f32 %v2576_v57, %v839_v22  ;;  %2579 = vtanh.f32 %v828_v1  ;;  %vm862_vm9 = vweird.f32 %v2576_v57  ;;  %vm848_vm12 = vmor %vm846_vm10, %vm847_vm8  ;;  %v882_v22 = vand.u32 2147483648, %v840_v52 }
 0x23b   : > { %v843_v29 = vsub.f32 1.0, %v842_v27  ;;  %vm863_vm13 = vmor %vm861_vm11, %vm862_vm9  ;;  %v880_v24 = vand.u32 2147483647, %v840_v52  ;;  %v3573_v27 = vld [vmem:[#allocation4 + $0x148] sm:$0xff] }
 0x23c   : > { %v858_v30 = vsub.f32 1.0, %v857_v28  ;;  %v883_v26 = vor.u32 1.1754944e-38, %v882_v22  ;;  %v3576_v28 = vld [vmem:[#allocation4 + $0x150] sm:$0xff]  ;;  %v3651_v22 = vld [vmem:[#allocation4 + $0x98] sm:$0xff] }
 0x23d   : > { %v844_v33 = vmul.f32 %v2574_v8, %v843_v29  ;;  %vm881_vm3 = vcmp.eq.f32.partialorder %v880_v24, 8.507059e+37  ;;  %v3579_v29 = vld [vmem:[#allocation4 + $0x158] sm:$0xff]  ;;  %4280 = vst [vmem:[#allocation21_spill] sm:$0xff] %v3651_v22  ;;  %v3654_v24 = vld [vmem:[#allocation4 + $0x60] sm:$0xff] }
 0x23e   : > { %v859_v35 = vmul.f32 %v2576_v57, %v858_v30  ;;  %v3582_v30 = vld [vmem:[#allocation4 + $0x120] sm:$0xff]  ;;  %4281 = vst [vmem:[#allocation22_spill] sm:$0xff] %v3654_v24 }
 0x23f   : > { %v2578_v39 = vpop.eup %2577  ;;  %v845_v41 = vadd.f32 %v2574_v8, %v844_v33  ;;  %v3591_v33 = vld [vmem:[#allocation4 + $0x138] sm:$0xff] }
 0x240   : > { %v872_v43 = vmul.f32 %v2578_v39, %v840_v52  ;;  %v860_v45 = vadd.f32 %v2576_v57, %v859_v35  ;;  %v2580_v11 = vpop.eup %2579  ;;  %vm877_vm0 = vweird.f32 %v2578_v39  ;;  %v3567_v52 = vld [vmem:[#allocation4 + $0x178] sm:$0xff]  ;;  %v3597_v35 = vld [vmem:[#allocation4 + $0x108] sm:$0xff] }
 0x241   : > { %v849_v9 = vsel %vm848_vm12, %v2574_v8, %v845_v41  ;;  %vm878_vm2 = vmor %vm876_vm1, %vm877_vm0  ;;  %v3606_v41 = vld [vmem:[#allocation4 + $0xe0] sm:$0xff] }
 0x242   : > { %v873_v12 = vsub.f32 1.0, %v872_v43  ;;  %v854_v13 = vsel %vm851_vm14, %v853_v44, %v849_v9  ;;  %v864_v15 = vsel %vm863_vm13, %v2576_v57, %v860_v45  ;;  %v3570_v57 = vld [vmem:[#allocation4 + $0x140] sm:$0xff]  ;;  %v3609_v43 = vld [vmem:[#allocation4 + $0xe8] sm:$0xff]  ;;  %v3612_v44 = vld [vmem:[#allocation4 + $0xf0] sm:$0xff] }
 0x243   : > { %v869_v16 = vsel %vm866_vm15, %v868_v46, %v864_v15  ;;  %v888_v17 = vmul.f32 %v2580_v11, %v854_v13  ;;  %v3615_v45 = vld [vmem:[#allocation4 + $0xf8] sm:$0xff]  ;;  %v3618_v46 = vld [vmem:[#allocation4 + $0xc0] sm:$0xff]  ;;  %v3621_v9 = vld [vmem:[#allocation4 + $0xc8] sm:$0xff] }
 0x244   : > { %v874_v18 = vmul.f32 %v2578_v39, %v873_v12  ;;  %v887_v19 = vmul.f32 %v869_v16, %v3419_v62  ;;  %v3564_v62 = vld [vmem:[#allocation4 + $0x170] sm:$0xff]  ;;  %v3627_v12 = vld [vmem:[#allocation4 + $0xd8] sm:$0xff]  ;;  %v3630_v13 = vld [vmem:[#allocation4 + $0xa0] sm:$0xff] }
 0x245   : > { %v3624_v11 = vld [vmem:[#allocation4 + $0xd0] sm:$0xff]  ;;  %4272 = vst [vmem:[#allocation13_spill] sm:$0xff] %v3627_v12  ;;  %v3633_v15 = vld [vmem:[#allocation4 + $0xa8] sm:$0xff] }
 0x246   : > { %v3537_v20 = vadd.f32 %v888_v17, %v887_v19  ;;  %v875_v21 = vadd.f32 %v2578_v39, %v874_v18  ;;  %4271 = vst [vmem:[#allocation12_spill] sm:$0xff] %v3624_v11  ;;  %v3636_v16 = vld [vmem:[#allocation4 + $0xb0] sm:$0xff]  ;;  %v3639_v17 = vld [vmem:[#allocation4 + $0xb8] sm:$0xff]  ;;  %v3642_v18 = vld [vmem:[#allocation4 + $0x80] sm:$0xff] }
 0x247   : > { %4273 = vst [vmem:[#allocation14_spill] sm:$0xff] %v3630_v13  ;;  %v3645_v19 = vld [vmem:[#allocation4 + $0x88] sm:$0xff] }
 0x248   : > { %2581 = vtanh.f32 %v3537_v20  ;;  %v879_v25 = vsel %vm878_vm2, %v2578_v39, %v875_v21  ;;  %v3603_v39 = vld [vmem:[#allocation4 + $0x118] sm:$0xff]  ;;  %4274 = vst [vmem:[#allocation15_spill] sm:$0xff] %v3633_v15  ;;  %v3648_v21 = vld [vmem:[#allocation4 + $0x90] sm:$0xff] }
 0x249   : > { %v884_v8 = vsel %vm881_vm3, %v883_v26, %v879_v25  ;;  %4275 = vst [vmem:[#allocation16_spill] sm:$0xff] %v3636_v16  ;;  %v3657_v25 = vld [vmem:[#allocation4 + $0x68] sm:$0xff]  ;;  %v3660_v26 = vld [vmem:[#allocation4 + $0x70] sm:$0xff] }
 0x24a   : > { %4276 = vst [vmem:[#allocation17_spill] sm:$0xff] %v3639_v17 }
 0x24b   : > { %4277 = vst [vmem:[#allocation18_spill] sm:$0xff] %v3642_v18 }
 0x24c   : > { %4278 = vst [vmem:[#allocation19_spill] sm:$0xff] %v3645_v19 }
 0x24d   : > { %4279 = vst [vmem:[#allocation20_spill] sm:$0xff] %v3648_v21 }
 0x24e   : > { %v2582_v58 = vpop.eup %2581  ;;  %4282 = vst [vmem:[#allocation23_spill] sm:$0xff] %v3657_v25 }
 0x24f   : > { %v3540_v1 = vmul.f32 %v2582_v58, %v884_v8  ;;  %4283 = vst [vmem:[#allocation24_spill] sm:$0xff] %v3660_v26  ;;  %v3663_v58 = vld [vmem:[#allocation4 + $0x78] sm:$0xff]  ;;  %v3666_v8 = vld [vmem:[#allocation4 + $0x40] sm:$0xff] }
 0x250   : > { %4284 = vst [vmem:[#allocation25_spill] sm:$0xff] %v3663_v58 }
 0x251   : > { %4270 = vst [vmem:[#allocation11_spill] sm:$0xff] %v3540_v1  ;;  %924 = vmatmul.f32.vlgmr.msrb.gmra.mxu0 %v3540_v1  ;;  %944 = vmatmul.f32.vlgmr.msrb.gmra.mxu1 %v3540_v1 }
 0x252   : > { %964 = vmatmul.f32.vlgmr.msrb.gmra.mxu2 %v3540_v1  ;;  %984 = vmatmul.f32.vlgmr.msrb.gmra.mxu3 %v3540_v1  ;;  %4285 = vst [vmem:[#allocation26_spill] sm:$0xff] %v3666_v8  ;;  %v3669_v1 = vld [vmem:[#allocation4 + $0x48] sm:$0xff] }
 0x253   : > { %1234 = vmatpush.msrb.mxu0 %v3428_v6  ;;  %1254 = vmatpush.msrb.mxu1 %v3431_v47  ;;  %4286 = vst [vmem:[#allocation27_spill] sm:$0xff] %v3669_v1 }
 0x254   : > { %1274 = vmatpush.msrb.mxu2 %v3434_v48  ;;  %1294 = vmatpush.msrb.mxu3 %v3437_v50 }
 0x255   : > { %1235 = vmatpush.msrb.mxu0 %v3440_v56  ;;  %1255 = vmatpush.msrb.mxu1 %v3443_v7 }
 0x256   : > { %1275 = vmatpush.msrb.mxu2 %v3446_v51  ;;  %1295 = vmatpush.msrb.mxu3 %v3449_v59 }
 0x257   : > { %1236 = vmatpush.msrb.mxu0 %v3452_v60  ;;  %1256 = vmatpush.msrb.mxu1 %v3455_v53 }
 0x258   : > { %1276 = vmatpush.msrb.mxu2 %v3458_v54  ;;  %1296 = vmatpush.msrb.mxu3 %v3461_v55 }
 0x259   : > { %1237 = vmatpush.msrb.mxu0 %v3464_v63  ;;  %1257 = vmatpush.msrb.mxu1 %v3467_v5 }
 0x25a   : > { %1277 = vmatpush.msrb.mxu2 %v3470_v0  ;;  %1297 = vmatpush.msrb.mxu3 %v3473_v3 }
 0x25b   : > { %1238 = vmatpush.msrb.mxu0 %v3476_v61  ;;  %1258 = vmatpush.msrb.mxu1 %v3479_v4 }
 0x25c   : > { %1278 = vmatpush.msrb.mxu2 %v3564_v62  ;;  %1298 = vmatpush.msrb.mxu3 %v3567_v52 }
 0x25d   : > { %1239 = vmatpush.msrb.mxu0 %v3570_v57  ;;  %1259 = vmatpush.msrb.mxu1 %v3573_v27 }
 0x25e   : > { %1279 = vmatpush.msrb.mxu2 %v3576_v28  ;;  %1299 = vmatpush.msrb.mxu3 %v3579_v29 }
 0x25f   : > { %1240 = vmatpush.msrb.mxu0 %v3582_v30  ;;  %1260 = vmatpush.msrb.mxu1 %v3585_v31 }
 0x260   : > { %1280 = vmatpush.msrb.mxu2 %v3588_v32  ;;  %1300 = vmatpush.msrb.mxu3 %v3591_v33 }
 0x261   : > { %1241 = vmatpush.msrb.mxu0 %v3594_v34  ;;  %1261 = vmatpush.msrb.mxu1 %v3597_v35 }
 0x262   : > { %1281 = vmatpush.msrb.mxu2 %v3600_v37  ;;  %1301 = vmatpush.msrb.mxu3 %v3603_v39 }
 0x263   : > { %1242 = vmatpush.msrb.mxu0 %v3606_v41  ;;  %1262 = vmatpush.msrb.mxu1 %v3609_v43 }
 0x264   : > { %1282 = vmatpush.msrb.mxu2 %v3612_v44  ;;  %1302 = vmatpush.msrb.mxu3 %v3615_v45 }
 0x265   : > { %1243 = vmatpush.msrb.mxu0 %v3618_v46  ;;  %1263 = vmatpush.msrb.mxu1 %v3621_v9 }
 0x266   : > { %1283 = vmatpush.msrb.mxu2 %v3624_v11  ;;  %1303 = vmatpush.msrb.mxu3 %v3627_v12 }
 0x267   : > { %1244 = vmatpush.msrb.mxu0 %v3630_v13  ;;  %1264 = vmatpush.msrb.mxu1 %v3633_v15 }
 0x268   : > { %1284 = vmatpush.msrb.mxu2 %v3636_v16  ;;  %1304 = vmatpush.msrb.mxu3 %v3639_v17 }
 0x269   : > { %1245 = vmatpush.msrb.mxu0 %v3642_v18  ;;  %1265 = vmatpush.msrb.mxu1 %v3645_v19 }
 0x26a   : > { %1285 = vmatpush.msrb.mxu2 %v3648_v21  ;;  %1305 = vmatpush.msrb.mxu3 %v3651_v22 }
 0x26b   : > { %1246 = vmatpush.msrb.mxu0 %v3654_v24  ;;  %1266 = vmatpush.msrb.mxu1 %v3657_v25  ;;  %v3675_v25 = vld [vmem:[#allocation4 + $0x58] sm:$0xff] }
 0x26c   : > { %1286 = vmatpush.msrb.mxu2 %v3660_v26  ;;  %1306 = vmatpush.msrb.mxu3 %v3663_v58  ;;  %4288 = vst [vmem:[#allocation29_spill] sm:$0xff] %v3675_v25  ;;  %v3678_v26 = vld [vmem:[#allocation4 + $0x20] sm:$0xff]  ;;  %v3681_v58 = vld [vmem:[#allocation4 + $0x28] sm:$0xff] }
 0x26d   : > { %1247 = vmatpush.msrb.mxu0 %v3666_v8  ;;  %1267 = vmatpush.msrb.mxu1 %v3669_v1  ;;  %4289 = vst [vmem:[#allocation30_spill] sm:$0xff] %v3678_v26  ;;  %v3684_v8 = vld [vmem:[#allocation4 + $0x30] sm:$0xff]  ;;  %v3687_v1 = vld [vmem:[#allocation4 + $0x38] sm:$0xff] }
 0x26e   : > { %1287 = vmatpush.msrb.mxu2 %v3672_v49  ;;  %1307 = vmatpush.msrb.mxu3 %v3675_v25  ;;  %4290 = vst [vmem:[#allocation31_spill] sm:$0xff] %v3681_v58  ;;  %v3690_v49 = vld [vmem:[#allocation4] sm:$0xff]  ;;  %v3693_v25 = vld [vmem:[#allocation4 + $0x8] sm:$0xff] }
 0x26f   : > { %1248 = vmatpush.msrb.mxu0 %v3678_v26  ;;  %1268 = vmatpush.msrb.mxu1 %v3681_v58  ;;  %4291 = vst [vmem:[#allocation32_spill] sm:$0xff] %v3684_v8  ;;  %v3696_v26 = vld [vmem:[#allocation4 + $0x10] sm:$0xff]  ;;  %v3699_v58 = vld [vmem:[#allocation4 + $0x18] sm:$0xff] }
 0x270   : > { %1288 = vmatpush.msrb.mxu2 %v3684_v8  ;;  %4292 = vst [vmem:[#allocation33_spill] sm:$0xff] %v3687_v1  ;;  %1308 = vmatpush.msrb.mxu3 %v3687_v1  ;;  %v898_v8 = vpop.permute.xlu1 %897 }
 0x271   : > { %4293 = vst [vmem:[#allocation34_spill] sm:$0xff] %v3690_v49  ;;  %1249 = vmatpush.msrb.mxu0 %v3690_v49  ;;  %1269 = vmatpush.msrb.mxu1 %v3693_v25  ;;  %v900_v24 = vmul.f32 %v898_v8, %v4262_v36  ;;  %v901_v1 = vmul.f32 %v898_v8, %v4263_v38 }
 0x272   : > { %4294 = vst [vmem:[#allocation35_spill] sm:$0xff] %v3693_v25  ;;  %1289 = vmatpush.msrb.mxu2 %v3696_v26  ;;  %1309 = vmatpush.msrb.mxu3 %v3699_v58  ;;  %v902_v17 = vmul.f32 %v898_v8, %v4266_v10 }
 0x273   : > { %4295 = vst [vmem:[#allocation45_spill] sm:$0xff] %v3696_v26  ;;  %v904_v22 = vadd.f32 %v900_v24, %v4264_v40  ;;  %v905_v49 = vadd.f32 %v901_v1, %v4265_v42 }
 0x274   : > { %4296 = vst [vmem:[#allocation46_spill] sm:$0xff] %v3699_v58  ;;  %v906_v58 = vadd.f32 %v902_v17, %v4267_v14 }
 0x2ce   : > { %v925_v21 = vpop.f32.mrf.mxu0  ;;  %v945_v19 = vpop.f32.mrf.mxu1 }
 0x2cf   : > { %v988_v25 = vadd.f32 %v925_v21, %v904_v22  ;;  %v989_v18 = vadd.f32 %v945_v19, %v905_v49  ;;  %v903_v49 = vmul.f32 %v898_v8, %v4268_v23  ;;  %v2454_v19 = vld [vmem:[%s2971_s7 + $0x20] sm:$0xff] }
 0x2d0   : > { %1060 = vperm.xlu2 %2529, %v2454_v19  }
 0x2d1   : > { %v2451_v26 = vmul.f32 -1.442695, %v988_v25  ;;  %v2452_v16 = vmul.f32 -1.442695, %v989_v18 }
 0x2d3   : > { %2583 = vpow2.f32 %v2451_v26 }
 0x2d4   : > { %2585 = vpow2.f32 %v2452_v16  ;;  %v907_v16 = vadd.f32 %v903_v49, %v4269_v2 }
 0x2d5   : > { %v965_v36 = vpop.f32.mrf.mxu2  ;;  %v985_v18 = vpop.f32.mrf.mxu3 }
 0x2d6   : > { %v990_v15 = vadd.f32 %v965_v36, %v906_v58  ;;  %v991_v36 = vadd.f32 %v985_v18, %v907_v16 }
 0x2d8   : > { %v2453_v38 = vmul.f32 -1.442695, %v990_v15  ;;  %v2458_v15 = vld [vmem:[%s2971_s7 + $0x28] sm:$0xff] }
 0x2d9   : > { %v2584_v13 = vpop.eup %2583  ;;  %1223 = vperm.xlu2 %2529, %v2458_v15  }
 0x2da   : > { %v2586_v24 = vpop.eup %2585  ;;  %v1001_v1 = vadd.f32 1.0, %v2584_v13  ;;  %2587 = vpow2.f32 %v2453_v38 }
 0x2db   : > { %v1002_v42 = vadd.f32 1.0, %v2586_v24 }
 0x2dc   : > { %2589 = vrcp.f32 %v1001_v1  ;;  %v1015_v24 = vand.u32 2147483648, %v1001_v1  ;;  %v1013_v19 = vand.u32 2147483647, %v1001_v1  ;;  %vm1009_vm6 = vweird.f32 %v1001_v1 }
 0x2dd   : > { %2591 = vrcp.f32 %v1002_v42  ;;  %v1030_v8 = vand.u32 2147483648, %v1002_v42  ;;  %v1028_v49 = vand.u32 2147483647, %v1002_v42  ;;  %vm1024_vm7 = vweird.f32 %v1002_v42 }
 0x2de   : > { %v1016_v16 = vor.u32 1.1754944e-38, %v1015_v24  ;;  %vm1014_vm10 = vcmp.eq.f32.partialorder %v1013_v19, 8.507059e+37  ;;  %v4303_v19 = vld [vmem:[#allocation17_spill] sm:$0xff] }
 0x2df   : > { %v1031_v15 = vor.u32 1.1754944e-38, %v1030_v8  ;;  %vm1029_vm11 = vcmp.eq.f32.partialorder %v1028_v49, 8.507059e+37  ;;  %v4302_v8 = vld [vmem:[#allocation16_spill] sm:$0xff]  ;;  %v4304_v49 = vld [vmem:[#allocation18_spill] sm:$0xff] }
 0x2e0   : > { %v2588_v21 = vpop.eup %2587 }
 0x2e1   : > { %v1003_v17 = vadd.f32 1.0, %v2588_v21 }
 0x2e2   : > { %v2590_v22 = vpop.eup %2589 }
 0x2e3   : > { %v2592_v25 = vpop.eup %2591  ;;  %v1005_v26 = vmul.f32 %v2590_v22, %v1001_v1  ;;  %2593 = vrcp.f32 %v1003_v17  ;;  %vm1010_vm4 = vweird.f32 %v2590_v22  ;;  %v1045_v24 = vand.u32 2147483648, %v1003_v17 }
 0x2e4   : > { %v1020_v13 = vmul.f32 %v2592_v25, %v1002_v42  ;;  %2595 = vtanh.f32 %v991_v36  ;;  %vm1025_vm5 = vweird.f32 %v2592_v25  ;;  %vm1011_vm8 = vmor %vm1009_vm6, %vm1010_vm4  ;;  %vm1039_vm13 = vweird.f32 %v1003_v17 }
 0x2e5   : > { %v1006_v38 = vsub.f32 1.0, %v1005_v26  ;;  %vm1026_vm9 = vmor %vm1024_vm7, %vm1025_vm5 }
 0x2e6   : > { %v1021_v58 = vsub.f32 1.0, %v1020_v13 }
 0x2e7   : > { %v1007_v23 = vmul.f32 %v2590_v22, %v1006_v38 }
 0x2e8   : > { %v1022_v14 = vmul.f32 %v2592_v25, %v1021_v58 }
 0x2e9   : > { %v2594_v21 = vpop.eup %2593  ;;  %v1008_v2 = vadd.f32 %v2590_v22, %v1007_v23 }
 0x2ea   : > { %v1035_v18 = vmul.f32 %v2594_v21, %v1003_v17  ;;  %v1023_v10 = vadd.f32 %v2592_v25, %v1022_v14  ;;  %v2596_v36 = vpop.eup %2595  ;;  %vm1040_vm12 = vweird.f32 %v2594_v21  ;;  %v1043_v14 = vand.u32 2147483647, %v1003_v17  ;;  %v4301_v17 = vld [vmem:[#allocation15_spill] sm:$0xff] }
 0x2eb   : > { %v1012_v26 = vsel %vm1011_vm8, %v2590_v22, %v1008_v2  ;;  %vm1041_vm14 = vmor %vm1039_vm13, %vm1040_vm12  ;;  %v1046_v22 = vor.u32 1.1754944e-38, %v1045_v24  ;;  %v4316_v24 = vld [vmem:[#allocation30_spill] sm:$0xff] }
 0x2ec   : > { %v1036_v13 = vsub.f32 1.0, %v1035_v18  ;;  %v1017_v38 = vsel %vm1014_vm10, %v1016_v16, %v1012_v26  ;;  %v1027_v40 = vsel %vm1026_vm9, %v2592_v25, %v1023_v10  ;;  %vm1044_vm15 = vcmp.eq.f32.partialorder %v1043_v14, 8.507059e+37  ;;  %v4306_v18 = vld [vmem:[#allocation20_spill] sm:$0xff]  ;;  %v4307_v16 = vld [vmem:[#allocation21_spill] sm:$0xff]  ;;  %v4309_v26 = vld [vmem:[#allocation23_spill] sm:$0xff] }
 0x2ed   : > { %v1032_v58 = vsel %vm1029_vm11, %v1031_v15, %v1027_v40  ;;  %v1051_v12 = vmul.f32 %v2596_v36, %v1017_v38  ;;  %v4308_v15 = vld [vmem:[#allocation22_spill] sm:$0xff]  ;;  %v4310_v36 = vld [vmem:[#allocation24_spill] sm:$0xff]  ;;  %v4317_v14 = vld [vmem:[#allocation31_spill] sm:$0xff] }
 0x2ee   : > { %v1037_v11 = vmul.f32 %v2594_v21, %v1036_v13  ;;  %v1050_v23 = vmul.f32 %v1032_v58, %v3537_v20  ;;  %v4298_v20 = vld [vmem:[#allocation12_spill] sm:$0xff]  ;;  %v4311_v13 = vld [vmem:[#allocation25_spill] sm:$0xff]  ;;  %v4312_v38 = vld [vmem:[#allocation26_spill] sm:$0xff] }
 0x2ef   : > { %v4313_v58 = vld [vmem:[#allocation27_spill] sm:$0xff] }
 0x2f0   : > { %v3713_v1 = vadd.f32 %v1051_v12, %v1050_v23  ;;  %v1038_v42 = vadd.f32 %v2594_v21, %v1037_v11  ;;  %v4299_v11 = vld [vmem:[#allocation13_spill] sm:$0xff]  ;;  %v4300_v12 = vld [vmem:[#allocation14_spill] sm:$0xff]  ;;  %v4314_v23 = vld [vmem:[#allocation28_spill] sm:$0xff] }
 0x2f2   : > { %2597 = vtanh.f32 %v3713_v1  ;;  %v1042_v2 = vsel %vm1041_vm14, %v2594_v21, %v1038_v42  ;;  %v4305_v21 = vld [vmem:[#allocation19_spill] sm:$0xff]  ;;  %v4315_v42 = vld [vmem:[#allocation29_spill] sm:$0xff] }
 0x2f3   : > { %v1047_v25 = vsel %vm1044_vm15, %v1046_v22, %v1042_v2  ;;  %v4318_v2 = vld [vmem:[#allocation32_spill] sm:$0xff]  ;;  %v4319_v22 = vld [vmem:[#allocation33_spill] sm:$0xff] }
 0x2f8   : > { %v2598_v10 = vpop.eup %2597 }
 0x2f9   : > { %v3716_v40 = vmul.f32 %v2598_v10, %v1047_v25  ;;  %v4320_v10 = vld [vmem:[#allocation34_spill] sm:$0xff]  ;;  %v4321_v25 = vld [vmem:[#allocation35_spill] sm:$0xff] }
 0x2fb   : > { %4297 = vst [vmem:[#allocation47_spill] sm:$0xff] %v3716_v40  ;;  %1087 = vmatmul.f32.vlgmr.msra.gmra.mxu0 %v3716_v40  ;;  %1107 = vmatmul.f32.vlgmr.msra.gmra.mxu1 %v3716_v40 }
 0x2fc   : > { %1127 = vmatmul.f32.vlgmr.msra.gmra.mxu2 %v3716_v40  ;;  %1147 = vmatmul.f32.vlgmr.msra.gmra.mxu3 %v3716_v40  ;;  %v4322_v40 = vld [vmem:[#allocation45_spill] sm:$0xff] }
 0x2fd   : > { %1397 = vmatpush.msra.mxu0 %v3428_v6  ;;  %1417 = vmatpush.msra.mxu1 %v3431_v47 }
 0x2fe   : > { %1437 = vmatpush.msra.mxu2 %v3434_v48  ;;  %1457 = vmatpush.msra.mxu3 %v3437_v50 }
 0x2ff   : > { %1398 = vmatpush.msra.mxu0 %v3440_v56  ;;  %1418 = vmatpush.msra.mxu1 %v3443_v7 }
 0x300   : > { %1438 = vmatpush.msra.mxu2 %v3446_v51  ;;  %1458 = vmatpush.msra.mxu3 %v3449_v59 }
 0x301   : > { %1399 = vmatpush.msra.mxu0 %v3452_v60  ;;  %1419 = vmatpush.msra.mxu1 %v3455_v53 }
 0x302   : > { %1439 = vmatpush.msra.mxu2 %v3458_v54  ;;  %1459 = vmatpush.msra.mxu3 %v3461_v55 }
 0x303   : > { %1400 = vmatpush.msra.mxu0 %v3464_v63  ;;  %1420 = vmatpush.msra.mxu1 %v3467_v5 }
 0x304   : > { %1440 = vmatpush.msra.mxu2 %v3470_v0  ;;  %1460 = vmatpush.msra.mxu3 %v3473_v3 }
 0x305   : > { %1401 = vmatpush.msra.mxu0 %v3476_v61  ;;  %1421 = vmatpush.msra.mxu1 %v3479_v4 }
 0x306   : > { %1441 = vmatpush.msra.mxu2 %v3564_v62  ;;  %1461 = vmatpush.msra.mxu3 %v3567_v52 }
 0x307   : > { %1402 = vmatpush.msra.mxu0 %v3570_v57  ;;  %1422 = vmatpush.msra.mxu1 %v3573_v27 }
 0x308   : > { %1442 = vmatpush.msra.mxu2 %v3576_v28  ;;  %1462 = vmatpush.msra.mxu3 %v3579_v29 }
 0x309   : > { %1403 = vmatpush.msra.mxu0 %v3582_v30  ;;  %1423 = vmatpush.msra.mxu1 %v3585_v31 }
 0x30a   : > { %1443 = vmatpush.msra.mxu2 %v3588_v32  ;;  %1463 = vmatpush.msra.mxu3 %v3591_v33 }
 0x30b   : > { %1404 = vmatpush.msra.mxu0 %v3594_v34  ;;  %1424 = vmatpush.msra.mxu1 %v3597_v35 }
 0x30c   : > { %1444 = vmatpush.msra.mxu2 %v3600_v37  ;;  %1464 = vmatpush.msra.mxu3 %v3603_v39 }
 0x30d   : > { %1405 = vmatpush.msra.mxu0 %v3606_v41  ;;  %1425 = vmatpush.msra.mxu1 %v3609_v43 }
 0x30e   : > { %1445 = vmatpush.msra.mxu2 %v3612_v44  ;;  %1465 = vmatpush.msra.mxu3 %v3615_v45 }
 0x30f   : > { %1406 = vmatpush.msra.mxu0 %v3618_v46  ;;  %1426 = vmatpush.msra.mxu1 %v3621_v9 }
 0x310   : > { %1446 = vmatpush.msra.mxu2 %v4298_v20  ;;  %1466 = vmatpush.msra.mxu3 %v4299_v11 }
 0x311   : > { %1407 = vmatpush.msra.mxu0 %v4300_v12  ;;  %1427 = vmatpush.msra.mxu1 %v4301_v17 }
 0x312   : > { %1447 = vmatpush.msra.mxu2 %v4302_v8  ;;  %1467 = vmatpush.msra.mxu3 %v4303_v19 }
 0x313   : > { %1408 = vmatpush.msra.mxu0 %v4304_v49  ;;  %1428 = vmatpush.msra.mxu1 %v4305_v21 }
 0x314   : > { %1448 = vmatpush.msra.mxu2 %v4306_v18  ;;  %1468 = vmatpush.msra.mxu3 %v4307_v16 }
 0x315   : > { %1409 = vmatpush.msra.mxu0 %v4308_v15  ;;  %1429 = vmatpush.msra.mxu1 %v4309_v26 }
 0x316   : > { %1449 = vmatpush.msra.mxu2 %v4310_v36  ;;  %1469 = vmatpush.msra.mxu3 %v4311_v13 }
 0x317   : > { %1410 = vmatpush.msra.mxu0 %v4312_v38  ;;  %1430 = vmatpush.msra.mxu1 %v4313_v58  ;;  %v4323_v38 = vld [vmem:[#allocation46_spill] sm:$0xff] }
 0x318   : > { %1450 = vmatpush.msra.mxu2 %v4314_v23  ;;  %1470 = vmatpush.msra.mxu3 %v4315_v42  ;;  %v4324_v23 = vld [vmem:[#allocation36_spill] sm:$0xff]  ;;  %v4325_v42 = vld [vmem:[#allocation37_spill] sm:$0xff] }
 0x319   : > { %1411 = vmatpush.msra.mxu0 %v4316_v24  ;;  %1431 = vmatpush.msra.mxu1 %v4317_v14  ;;  %v4326_v24 = vld [vmem:[#allocation38_spill] sm:$0xff]  ;;  %v4327_v14 = vld [vmem:[#allocation39_spill] sm:$0xff] }
 0x31a   : > { %1451 = vmatpush.msra.mxu2 %v4318_v2  ;;  %1471 = vmatpush.msra.mxu3 %v4319_v22 }
 0x31b   : > { %1412 = vmatpush.msra.mxu0 %v4320_v10  ;;  %1432 = vmatpush.msra.mxu1 %v4321_v25  ;;  %v4328_v10 = vld [vmem:[#allocation40_spill] sm:$0xff] }
 0x31c   : > { %1452 = vmatpush.msra.mxu2 %v4322_v40  ;;  %1472 = vmatpush.msra.mxu3 %v4323_v38  ;;  %v4329_v38 = vld [vmem:[#allocation41_spill] sm:$0xff] }
 0x32a   : > { %v1061_v58 = vpop.permute.xlu2 %1060 }
 0x32b   : > { %v1063_v13 = vmul.f32 %v1061_v58, %v4324_v23  ;;  %v1064_v36 = vmul.f32 %v1061_v58, %v4325_v42  ;;  %v1065_v21 = vmul.f32 %v1061_v58, %v4328_v10 }
 0x32d   : > { %v1067_v26 = vadd.f32 %v1063_v13, %v4326_v24  ;;  %v1068_v15 = vadd.f32 %v1064_v36, %v4327_v14  ;;  %v1069_v40 = vadd.f32 %v1065_v21, %v4329_v38  ;;  %v4330_v14 = vld [vmem:[#allocation42_spill] sm:$0xff] }
 0x378   : > { %v1088_v2 = vpop.f32.mrf.mxu0  ;;  %v1108_v16 = vpop.f32.mrf.mxu1 }
 0x379   : > { %v1151_v22 = vadd.f32 %v1088_v2, %v1067_v26  ;;  %v1152_v18 = vadd.f32 %v1108_v16, %v1068_v15  ;;  %v1066_v26 = vmul.f32 %v1061_v58, %v4330_v14  ;;  %v4331_v2 = vld [vmem:[#allocation43_spill] sm:$0xff] }
 0x37b   : > { %v2455_v25 = vmul.f32 -1.442695, %v1151_v22  ;;  %v2456_v49 = vmul.f32 -1.442695, %v1152_v18  ;;  %v1070_v18 = vadd.f32 %v1066_v26, %v4331_v2 }
 0x37d   : > { %2599 = vpow2.f32 %v2455_v25 }
 0x37e   : > { %2601 = vpow2.f32 %v2456_v49 }
 0x37f   : > { %v1128_v19 = vpop.f32.mrf.mxu2  ;;  %v1148_v16 = vpop.f32.mrf.mxu3 }
 0x380   : > { %v1153_v23 = vadd.f32 %v1128_v19, %v1069_v40  ;;  %v1154_v25 = vadd.f32 %v1148_v16, %v1070_v18 }
 0x382   : > { %v2457_v8 = vmul.f32 -1.442695, %v1153_v23 }
 0x383   : > { %v2600_v42 = vpop.eup %2599 }
 0x384   : > { %v2602_v17 = vpop.eup %2601  ;;  %v1164_v13 = vadd.f32 1.0, %v2600_v42  ;;  %2603 = vpow2.f32 %v2457_v8 }
 0x385   : > { %v1165_v36 = vadd.f32 1.0, %v2602_v17 }
 0x386   : > { %2605 = vrcp.f32 %v1164_v13  ;;  %v1178_v42 = vand.u32 2147483648, %v1164_v13  ;;  %v1176_v58 = vand.u32 2147483647, %v1164_v13  ;;  %vm1172_vm2 = vweird.f32 %v1164_v13 }
 0x387   : > { %2607 = vrcp.f32 %v1165_v36  ;;  %v1193_v17 = vand.u32 2147483648, %v1165_v36  ;;  %v1191_v10 = vand.u32 2147483647, %v1165_v36  ;;  %vm1187_vm3 = vweird.f32 %v1165_v36 }
 0x388   : > { %vm1177_vm6 = vcmp.eq.f32.partialorder %v1176_v58, 8.507059e+37 }
 0x389   : > { %vm1192_vm7 = vcmp.eq.f32.partialorder %v1191_v10, 8.507059e+37 }
 0x38a   : > { %v2604_v15 = vpop.eup %2603 }
 0x38b   : > { %v1166_v22 = vadd.f32 1.0, %v2604_v15  ;;  %v1179_v15 = vor.u32 1.1754944e-38, %v1178_v42 }
 0x38c   : > { %v2606_v49 = vpop.eup %2605 }
 0x38d   : > { %v2608_v21 = vpop.eup %2607  ;;  %v1168_v38 = vmul.f32 %v2606_v49, %v1164_v13  ;;  %2609 = vrcp.f32 %v1166_v22  ;;  %vm1173_vm0 = vweird.f32 %v2606_v49  ;;  %v1208_v42 = vand.u32 2147483648, %v1166_v22 }
 0x38e   : > { %v1183_v40 = vmul.f32 %v2608_v21, %v1165_v36  ;;  %2611 = vtanh.f32 %v1154_v25  ;;  %vm1188_vm1 = vweird.f32 %v2608_v21  ;;  %vm1174_vm4 = vmor %vm1172_vm2, %vm1173_vm0  ;;  %vm1202_vm9 = vweird.f32 %v1166_v22 }
 0x38f   : > { %v1169_v19 = vsub.f32 1.0, %v1168_v38  ;;  %vm1189_vm5 = vmor %vm1187_vm3, %vm1188_vm1  ;;  %v1194_v38 = vor.u32 1.1754944e-38, %v1193_v17  ;;  %v1209_v17 = vor.u32 1.1754944e-38, %v1208_v42  ;;  %v4365_v42 = vld [vmem:[#allocation43_spill] sm:$0xff] }
 0x390   : > { %v1184_v23 = vsub.f32 1.0, %v1183_v40 }
 0x391   : > { %v1170_v8 = vmul.f32 %v2606_v49, %v1169_v19 }
 0x392   : > { %v1185_v14 = vmul.f32 %v2608_v21, %v1184_v23 }
 0x393   : > { %v2610_v24 = vpop.eup %2609  ;;  %v1171_v26 = vadd.f32 %v2606_v49, %v1170_v8 }
 0x394   : > { %v1198_v16 = vmul.f32 %v2610_v24, %v1166_v22  ;;  %v1186_v18 = vadd.f32 %v2608_v21, %v1185_v14  ;;  %v2612_v25 = vpop.eup %2611  ;;  %vm1203_vm8 = vweird.f32 %v2610_v24  ;;  %v1206_v14 = vand.u32 2147483647, %v1166_v22  ;;  %v4363_v22 = vld [vmem:[#allocation41_spill] sm:$0xff] }
 0x395   : > { %v1175_v40 = vsel %vm1174_vm4, %v2606_v49, %v1171_v26  ;;  %vm1204_vm10 = vmor %vm1202_vm9, %vm1203_vm8 }
 0x396   : > { %v1199_v2 = vsub.f32 1.0, %v1198_v16  ;;  %v1180_v19 = vsel %vm1177_vm6, %v1179_v15, %v1175_v40  ;;  %v1190_v12 = vsel %vm1189_vm5, %v2608_v21, %v1186_v18  ;;  %vm1207_vm11 = vcmp.eq.f32.partialorder %v1206_v14, 8.507059e+37 }
 0x397   : > { %v1195_v23 = vsel %vm1192_vm7, %v1194_v38, %v1190_v12  ;;  %v1214_v11 = vmul.f32 %v2612_v25, %v1180_v19  ;;  %v4364_v19 = vld [vmem:[#allocation42_spill] sm:$0xff] }
 0x398   : > { %v1200_v20 = vmul.f32 %v2610_v24, %v1199_v2  ;;  %v1213_v8 = vmul.f32 %v1195_v23, %v3713_v1 }
 0x39a   : > { %v3795_v13 = vadd.f32 %v1214_v11, %v1213_v8  ;;  %v1201_v36 = vadd.f32 %v2610_v24, %v1200_v20  ;;  %v4362_v20 = vld [vmem:[#allocation40_spill] sm:$0xff] }
 0x39c   : > { %2613 = vtanh.f32 %v3795_v13  ;;  %v1205_v49 = vsel %vm1204_vm10, %v2610_v24, %v1201_v36 }
 0x39d   : > { %v1210_v10 = vsel %vm1207_vm11, %v1209_v17, %v1205_v49 }
 0x3a2   : > { %v2614_v21 = vpop.eup %2613 }
 0x3a3   : > { %v3798_v12 = vmul.f32 %v2614_v21, %v1210_v10 }
 0x3a5   : > { %1250 = vmatmul.f32.vlgmr.msrb.gmra.mxu0 %v3798_v12  ;;  %1270 = vmatmul.f32.vlgmr.msrb.gmra.mxu1 %v3798_v12 }
 0x3a6   : > { %1290 = vmatmul.f32.vlgmr.msrb.gmra.mxu2 %v3798_v12  ;;  %1310 = vmatmul.f32.vlgmr.msrb.gmra.mxu3 %v3798_v12 }
 0x3a7   : > { %1560 = vmatpush.msrb.mxu0 %v3428_v6  ;;  %1580 = vmatpush.msrb.mxu1 %v3431_v47  ;;  %v4332_v6 = vld [vmem:[#allocation12_spill] sm:$0xff]  ;;  %v4333_v47 = vld [vmem:[#allocation13_spill] sm:$0xff] }
 0x3a8   : > { %1600 = vmatpush.msrb.mxu2 %v3434_v48  ;;  %1620 = vmatpush.msrb.mxu3 %v3437_v50  ;;  %v4334_v48 = vld [vmem:[#allocation14_spill] sm:$0xff]  ;;  %v4335_v50 = vld [vmem:[#allocation15_spill] sm:$0xff] }
 0x3a9   : > { %1561 = vmatpush.msrb.mxu0 %v3440_v56  ;;  %1581 = vmatpush.msrb.mxu1 %v3443_v7  ;;  %v4336_v56 = vld [vmem:[#allocation16_spill] sm:$0xff]  ;;  %v4337_v7 = vld [vmem:[#allocation17_spill] sm:$0xff] }
 0x3aa   : > { %1601 = vmatpush.msrb.mxu2 %v3446_v51  ;;  %1621 = vmatpush.msrb.mxu3 %v3449_v59  ;;  %v4338_v51 = vld [vmem:[#allocation18_spill] sm:$0xff]  ;;  %v4339_v59 = vld [vmem:[#allocation19_spill] sm:$0xff] }
 0x3ab   : > { %1562 = vmatpush.msrb.mxu0 %v3452_v60  ;;  %1582 = vmatpush.msrb.mxu1 %v3455_v53  ;;  %v4340_v60 = vld [vmem:[#allocation20_spill] sm:$0xff]  ;;  %v4341_v53 = vld [vmem:[#allocation21_spill] sm:$0xff] }
 0x3ac   : > { %1602 = vmatpush.msrb.mxu2 %v3458_v54  ;;  %1622 = vmatpush.msrb.mxu3 %v3461_v55  ;;  %v4342_v54 = vld [vmem:[#allocation22_spill] sm:$0xff]  ;;  %v4343_v55 = vld [vmem:[#allocation23_spill] sm:$0xff] }
 0x3ad   : > { %1563 = vmatpush.msrb.mxu0 %v3464_v63  ;;  %1583 = vmatpush.msrb.mxu1 %v3467_v5  ;;  %v4344_v63 = vld [vmem:[#allocation24_spill] sm:$0xff]  ;;  %v4345_v5 = vld [vmem:[#allocation25_spill] sm:$0xff] }
 0x3ae   : > { %1603 = vmatpush.msrb.mxu2 %v3470_v0  ;;  %1623 = vmatpush.msrb.mxu3 %v3473_v3  ;;  %v4346_v0 = vld [vmem:[#allocation26_spill] sm:$0xff]  ;;  %v4347_v3 = vld [vmem:[#allocation27_spill] sm:$0xff] }
 0x3af   : > { %1564 = vmatpush.msrb.mxu0 %v3476_v61  ;;  %1584 = vmatpush.msrb.mxu1 %v3479_v4  ;;  %v4348_v61 = vld [vmem:[#allocation28_spill] sm:$0xff]  ;;  %v4349_v4 = vld [vmem:[#allocation29_spill] sm:$0xff] }
 0x3b0   : > { %1604 = vmatpush.msrb.mxu2 %v3564_v62  ;;  %1624 = vmatpush.msrb.mxu3 %v3567_v52  ;;  %v4350_v62 = vld [vmem:[#allocation30_spill] sm:$0xff]  ;;  %v4351_v52 = vld [vmem:[#allocation31_spill] sm:$0xff] }
 0x3b1   : > { %1565 = vmatpush.msrb.mxu0 %v3570_v57  ;;  %1585 = vmatpush.msrb.mxu1 %v3573_v27  ;;  %v4352_v57 = vld [vmem:[#allocation32_spill] sm:$0xff]  ;;  %v4353_v27 = vld [vmem:[#allocation33_spill] sm:$0xff] }
 0x3b2   : > { %1605 = vmatpush.msrb.mxu2 %v3576_v28  ;;  %1625 = vmatpush.msrb.mxu3 %v3579_v29  ;;  %v4354_v28 = vld [vmem:[#allocation34_spill] sm:$0xff]  ;;  %v4355_v29 = vld [vmem:[#allocation35_spill] sm:$0xff] }
 0x3b3   : > { %1566 = vmatpush.msrb.mxu0 %v3582_v30  ;;  %1586 = vmatpush.msrb.mxu1 %v3585_v31  ;;  %v4356_v30 = vld [vmem:[#allocation45_spill] sm:$0xff]  ;;  %v4357_v31 = vld [vmem:[#allocation46_spill] sm:$0xff] }
 0x3b4   : > { %1606 = vmatpush.msrb.mxu2 %v3588_v32  ;;  %1626 = vmatpush.msrb.mxu3 %v3591_v33  ;;  %v1224_v32 = vpop.permute.xlu2 %1223  ;;  %v4358_v33 = vld [vmem:[#allocation36_spill] sm:$0xff] }
 0x3b5   : > { %1567 = vmatpush.msrb.mxu0 %v3594_v34  ;;  %1587 = vmatpush.msrb.mxu1 %v3597_v35  ;;  %v1226_v34 = vmul.f32 %v1224_v32, %v4358_v33  ;;  %v4359_v35 = vld [vmem:[#allocation37_spill] sm:$0xff]  ;;  %v1228_v11 = vmul.f32 %v1224_v32, %v4362_v20  ;;  %v1229_v23 = vmul.f32 %v1224_v32, %v4364_v19 }
 0x3b6   : > { %1607 = vmatpush.msrb.mxu2 %v3600_v37  ;;  %1627 = vmatpush.msrb.mxu3 %v3603_v39  ;;  %v1227_v37 = vmul.f32 %v1224_v32, %v4359_v35  ;;  %v4360_v39 = vld [vmem:[#allocation38_spill] sm:$0xff] }
 0x3b7   : > { %1568 = vmatpush.msrb.mxu0 %v3606_v41  ;;  %1588 = vmatpush.msrb.mxu1 %v3609_v43  ;;  %v1230_v41 = vadd.f32 %v1226_v34, %v4360_v39  ;;  %v4361_v43 = vld [vmem:[#allocation39_spill] sm:$0xff]  ;;  %v1232_v58 = vadd.f32 %v1228_v11, %v4363_v22  ;;  %v1233_v14 = vadd.f32 %v1229_v23, %v4365_v42  ;;  %v1730_v11 = vld [vmem:[#allocation6 + $0xf0] sm:$0xff] }
 0x3b8   : > { %1608 = vmatpush.msrb.mxu2 %v3612_v44  ;;  %1628 = vmatpush.msrb.mxu3 %v3615_v45  ;;  %v1231_v44 = vadd.f32 %v1227_v37, %v4361_v43 }
 0x3b9   : > { %1569 = vmatpush.msrb.mxu0 %v3618_v46  ;;  %1589 = vmatpush.msrb.mxu1 %v3621_v9 }
 0x3ba   : > { %1609 = vmatpush.msrb.mxu2 %v4332_v6  ;;  %1629 = vmatpush.msrb.mxu3 %v4333_v47 }
 0x3bb   : > { %1570 = vmatpush.msrb.mxu0 %v4334_v48  ;;  %1590 = vmatpush.msrb.mxu1 %v4335_v50 }
 0x3bc   : > { %1610 = vmatpush.msrb.mxu2 %v4336_v56  ;;  %1630 = vmatpush.msrb.mxu3 %v4337_v7 }
 0x3bd   : > { %1571 = vmatpush.msrb.mxu0 %v4338_v51  ;;  %1591 = vmatpush.msrb.mxu1 %v4339_v59 }
 0x3be   : > { %1611 = vmatpush.msrb.mxu2 %v4340_v60  ;;  %1631 = vmatpush.msrb.mxu3 %v4341_v53 }
 0x3bf   : > { %1572 = vmatpush.msrb.mxu0 %v4342_v54  ;;  %1592 = vmatpush.msrb.mxu1 %v4343_v55 }
 0x3c0   : > { %1612 = vmatpush.msrb.mxu2 %v4344_v63  ;;  %1632 = vmatpush.msrb.mxu3 %v4345_v5 }
 0x3c1   : > { %1573 = vmatpush.msrb.mxu0 %v4346_v0  ;;  %1593 = vmatpush.msrb.mxu1 %v4347_v3 }
 0x3c2   : > { %1613 = vmatpush.msrb.mxu2 %v4348_v61  ;;  %1633 = vmatpush.msrb.mxu3 %v4349_v4 }
 0x3c3   : > { %1574 = vmatpush.msrb.mxu0 %v4350_v62  ;;  %1594 = vmatpush.msrb.mxu1 %v4351_v52 }
 0x3c4   : > { %1614 = vmatpush.msrb.mxu2 %v4352_v57  ;;  %1634 = vmatpush.msrb.mxu3 %v4353_v27 }
 0x3c5   : > { %1575 = vmatpush.msrb.mxu0 %v4354_v28  ;;  %1595 = vmatpush.msrb.mxu1 %v4355_v29 }
 0x3c6   : > { %1615 = vmatpush.msrb.mxu2 %v4356_v30  ;;  %1635 = vmatpush.msrb.mxu3 %v4357_v31 }
 0x422   : > { %v1251_v45 = vpop.f32.mrf.mxu0  ;;  %v1271_v46 = vpop.f32.mrf.mxu1 }
 0x423   : > { %v1314_v9 = vadd.f32 %v1251_v45, %v1230_v41  ;;  %v1315_v1 = vadd.f32 %v1271_v46, %v1231_v44 }
 0x425   : > { %v2459_v24 = vmul.f32 -1.442695, %v1314_v9  ;;  %v2460_v2 = vmul.f32 -1.442695, %v1315_v1  ;;  %v1387_v1 = vpop.permute.xlu0 %1386 }
 0x427   : > { %2615 = vpow2.f32 %v2459_v24  ;;  %v1729_v24 = vld [vmem:[#allocation6 + $0xe8] sm:$0xff] }
 0x428   : > { %2617 = vpow2.f32 %v2460_v2  ;;  %v1389_v2 = vmul.f32 %v1387_v1, %v4358_v33 }
 0x429   : > { %v1291_v26 = vpop.f32.mrf.mxu2  ;;  %v1311_v8 = vpop.f32.mrf.mxu3 }
 0x42a   : > { %v1316_v16 = vadd.f32 %v1291_v26, %v1232_v58  ;;  %v1317_v21 = vadd.f32 %v1311_v8, %v1233_v14  ;;  %v1390_v58 = vmul.f32 %v1387_v1, %v4359_v35  ;;  %v1728_v26 = vld [vmem:[#allocation6 + $0xe0] sm:$0xff]  ;;  %v1725_v14 = vld [vmem:[#allocation6 + $0xc8] sm:$0xff] }
 0x42c   : > { %v2461_v15 = vmul.f32 -1.442695, %v1316_v16  ;;  %v1727_v16 = vld [vmem:[#allocation6 + $0xd8] sm:$0xff] }
 0x42d   : > { %v2616_v18 = vpop.eup %2615 }
 0x42e   : > { %v2618_v38 = vpop.eup %2617  ;;  %v1327_v40 = vadd.f32 1.0, %v2616_v18  ;;  %2619 = vpow2.f32 %v2461_v15  ;;  %v1393_v15 = vadd.f32 %v1389_v2, %v4360_v39  ;;  %v1394_v18 = vadd.f32 %v1390_v58, %v4361_v43 }
 0x42f   : > { %v1328_v25 = vadd.f32 1.0, %v2618_v38 }
 0x430   : > { %2621 = vrcp.f32 %v1327_v40  ;;  %v1341_v56 = vand.u32 2147483648, %v1327_v40  ;;  %v1339_v59 = vand.u32 2147483647, %v1327_v40  ;;  %vm1335_vm14 = vweird.f32 %v1327_v40 }
 0x431   : > { %2623 = vrcp.f32 %v1328_v25  ;;  %v1356_v7 = vand.u32 2147483648, %v1328_v25  ;;  %v1354_v53 = vand.u32 2147483647, %v1328_v25  ;;  %vm1350_vm15 = vweird.f32 %v1328_v25 }
 0x432   : > { %v1342_v5 = vor.u32 1.1754944e-38, %v1341_v56  ;;  %vm1340_vm2 = vcmp.eq.f32.partialorder %v1339_v59, 8.507059e+37  ;;  %v1721_v56 = vld [vmem:[#allocation6 + $0xa8] sm:$0xff] }
 0x433   : > { %v1357_v3 = vor.u32 1.1754944e-38, %v1356_v7  ;;  %vm1355_vm3 = vcmp.eq.f32.partialorder %v1354_v53, 8.507059e+37 }
 0x434   : > { %v2620_v36 = vpop.eup %2619 }
 0x435   : > { %v1329_v49 = vadd.f32 1.0, %v2620_v36  ;;  %v1391_v36 = vmul.f32 %v1387_v1, %v4362_v20 }
 0x436   : > { %v2622_v17 = vpop.eup %2621 }
 0x437   : > { %v2624_v10 = vpop.eup %2623  ;;  %v1331_v6 = vmul.f32 %v2622_v17, %v1327_v40  ;;  %2625 = vrcp.f32 %v1329_v49  ;;  %vm1336_vm12 = vweird.f32 %v2622_v17  ;;  %v1371_v34 = vand.u32 2147483648, %v1329_v49 }
 0x438   : > { %v1346_v47 = vmul.f32 %v2624_v10, %v1328_v25  ;;  %2627 = vtanh.f32 %v1317_v21  ;;  %vm1351_vm13 = vweird.f32 %v2624_v10  ;;  %vm1337_vm0 = vmor %vm1335_vm14, %vm1336_vm12  ;;  %vm1365_vm5 = vweird.f32 %v1329_v49  ;;  %v1726_v25 = vld [vmem:[#allocation6 + $0xd0] sm:$0xff]  ;;  %v1724_v21 = vld [vmem:[#allocation6 + $0xc0] sm:$0xff] }
 0x439   : > { %v1332_v48 = vsub.f32 1.0, %v1331_v6  ;;  %vm1352_vm1 = vmor %vm1350_vm15, %vm1351_vm13  ;;  %v1369_v37 = vand.u32 2147483647, %v1329_v49  ;;  %v1372_v44 = vor.u32 1.1754944e-38, %v1371_v34  ;;  %v1395_v6 = vadd.f32 %v1391_v36, %v4363_v22 }
 0x43a   : > { %v1347_v50 = vsub.f32 1.0, %v1346_v47  ;;  %v1722_v47 = vld [vmem:[#allocation6 + $0xb0] sm:$0xff] }
 0x43b   : > { %v1333_v51 = vmul.f32 %v2622_v17, %v1332_v48  ;;  %vm1370_vm7 = vcmp.eq.f32.partialorder %v1369_v37, 8.507059e+37 }
 0x43c   : > { %v1348_v60 = vmul.f32 %v2624_v10, %v1347_v50 }
 0x43d   : > { %v2626_v54 = vpop.eup %2625  ;;  %v1334_v55 = vadd.f32 %v2622_v17, %v1333_v51  ;;  %v1720_v51 = vld [vmem:[#allocation6 + $0xa0] sm:$0xff] }
 0x43e   : > { %v1361_v63 = vmul.f32 %v2626_v54, %v1329_v49  ;;  %v1349_v0 = vadd.f32 %v2624_v10, %v1348_v60  ;;  %v2628_v4 = vpop.eup %2627  ;;  %vm1366_vm4 = vweird.f32 %v2626_v54 }
 0x43f   : > { %v1338_v61 = vsel %vm1337_vm0, %v2622_v17, %v1334_v55  ;;  %vm1367_vm6 = vmor %vm1365_vm5, %vm1366_vm4  ;;  %v1392_v55 = vmul.f32 %v1387_v1, %v4364_v19 }
 0x440   : > { %v1362_v62 = vsub.f32 1.0, %v1361_v63  ;;  %v1343_v52 = vsel %vm1340_vm2, %v1342_v5, %v1338_v61  ;;  %v1353_v57 = vsel %vm1352_vm1, %v2624_v10, %v1349_v0  ;;  %v1723_v10 = vld [vmem:[#allocation6 + $0xb8] sm:$0xff]  ;;  %v1718_v5 = vld [vmem:[#allocation6 + $0x90] sm:$0xff]  ;;  %v1717_v0 = vld [vmem:[#allocation6 + $0x88] sm:$0xff] }
 0x441   : > { %v1358_v27 = vsel %vm1355_vm3, %v1357_v3, %v1353_v57  ;;  %v1377_v28 = vmul.f32 %v2628_v4, %v1343_v52  ;;  %v1719_v63 = vld [vmem:[#allocation6 + $0x98] sm:$0xff]  ;;  %v1396_v4 = vadd.f32 %v1392_v55, %v4365_v42  ;;  %v1786_v55 = vld [vmem:[#allocation6 + $0x68] sm:$0xff] }
 0x442   : > { %v1363_v29 = vmul.f32 %v2626_v54, %v1362_v62  ;;  %v1376_v30 = vmul.f32 %v1358_v27, %v3795_v13  ;;  %v1731_v13 = vld [vmem:[#allocation6 + $0xf8] sm:$0xff]  ;;  %v1716_v62 = vld [vmem:[#allocation6 + $0x80] sm:$0xff] }
 0x444   : > { %v3877_v31 = vadd.f32 %v1377_v28, %v1376_v30  ;;  %v1364_v32 = vadd.f32 %v2626_v54, %v1363_v29 }
 0x446   : > { %2629 = vtanh.f32 %v3877_v31  ;;  %v1368_v41 = vsel %vm1367_vm6, %v2626_v54, %v1364_v32 }
 0x447   : > { %v1373_v46 = vsel %vm1370_vm7, %v1372_v44, %v1368_v41 }
 0x44c   : > { %v2630_v45 = vpop.eup %2629 }
 0x44d   : > { %v3880_v9 = vmul.f32 %v2630_v45, %v1373_v46 }
 0x44f   : > { %1413 = vmatmul.f32.vlgmr.msra.gmra.mxu0 %v3880_v9  ;;  %1433 = vmatmul.f32.vlgmr.msra.gmra.mxu1 %v3880_v9 }
 0x450   : > { %1453 = vmatmul.f32.vlgmr.msra.gmra.mxu2 %v3880_v9  ;;  %1473 = vmatmul.f32.vlgmr.msra.gmra.mxu3 %v3880_v9 }
 0x451   : > { %1732 = vmatpush.msra.mxu0 %v1731_v13 }
 0x453   : > { %1733 = vmatpush.msra.mxu0 %v1730_v11 }
 0x455   : > { %1734 = vmatpush.msra.mxu0 %v1729_v24 }
 0x457   : > { %1735 = vmatpush.msra.mxu0 %v1728_v26 }
 0x459   : > { %1736 = vmatpush.msra.mxu0 %v1727_v16 }
 0x45b   : > { %1737 = vmatpush.msra.mxu0 %v1726_v25 }
 0x45d   : > { %1738 = vmatpush.msra.mxu0 %v1725_v14 }
 0x45f   : > { %1739 = vmatpush.msra.mxu0 %v1724_v21 }
 0x461   : > { %1740 = vmatpush.msra.mxu0 %v1723_v10 }
 0x463   : > { %1741 = vmatpush.msra.mxu0 %v1722_v47 }
 0x465   : > { %1742 = vmatpush.msra.mxu0 %v1721_v56  ;;  %v4367_v56 = vld [vmem:[#allocation10_spill] sm:$0xff] }
 0x467   : > { %1743 = vmatpush.msra.mxu0 %v1720_v51  ;;  %v4369_v51 = vld [vmem:[#allocation47_spill] sm:$0xff] }
 0x469   : > { %1744 = vmatpush.msra.mxu0 %v1719_v63  ;;  %v2047_v63 = vld [vmem:[#allocation4 + $0x5a0] sm:$0xff] }
 0x46b   : > { %1745 = vmatpush.msra.mxu0 %v1718_v5  ;;  %v1785_v5 = vld [vmem:[#allocation6 + $0x60] sm:$0xff] }
 0x46d   : > { %1746 = vmatpush.msra.mxu0 %v1717_v0  ;;  %v2043_v0 = vld [vmem:[#allocation4 + $0x580] sm:$0xff] }
 0x46f   : > { %1747 = vmatpush.msra.mxu0 %v1716_v62  ;;  %v3911_v62 = vpop.permute.xlu1 %1549 }
 0x4cc   : > { %v1414_v38 = vpop.f32.mrf.mxu0  ;;  %v1434_v40 = vpop.f32.mrf.mxu1 }
 0x4cd   : > { %v1477_v23 = vadd.f32 %v1414_v38, %v1393_v15  ;;  %v1478_v8 = vadd.f32 %v1434_v40, %v1394_v18 }
 0x4cf   : > { %v2463_v49 = vmul.f32 -1.442695, %v1477_v23  ;;  %v2464_v17 = vmul.f32 -1.442695, %v1478_v8 }
 0x4d1   : > { %2631 = vpow2.f32 %v2463_v49 }
 0x4d2   : > { %2633 = vpow2.f32 %v2464_v17 }
 0x4d3   : > { %v1454_v48 = vpop.f32.mrf.mxu2  ;;  %v1474_v3 = vpop.f32.mrf.mxu3 }
 0x4d4   : > { %v1479_v50 = vadd.f32 %v1454_v48, %v1395_v6  ;;  %v1480_v27 = vadd.f32 %v1474_v3, %v1396_v4  ;;  %v1784_v3 = vld [vmem:[#allocation6 + $0x58] sm:$0xff]  ;;  %v2057_v4 = vld [vmem:[#allocation4 + $0x5f0] sm:$0xff] }
 0x4d6   : > { %v2465_v7 = vmul.f32 -1.442695, %v1479_v50 }
 0x4d7   : > { %v2632_v59 = vpop.eup %2631 }
 0x4d8   : > { %v2634_v60 = vpop.eup %2633  ;;  %v1490_v53 = vadd.f32 1.0, %v2632_v59  ;;  %2635 = vpow2.f32 %v2465_v7  ;;  %v4368_v7 = vld [vmem:[#allocation11_spill] sm:$0xff]  ;;  %v1788_v59 = vld [vmem:[#allocation6 + $0x78] sm:$0xff] }
 0x4d9   : > { %v1491_v54 = vadd.f32 1.0, %v2634_v60  ;;  %v2055_v60 = vld [vmem:[#allocation4 + $0x5e0] sm:$0xff]  ;;  %1789 = vmatpush.msra.mxu1 %v1788_v59 }
 0x4da   : > { %2637 = vrcp.f32 %v1490_v53  ;;  %v1504_v37 = vand.u32 2147483648, %v1490_v53  ;;  %v1502_v45 = vand.u32 2147483647, %v1490_v53  ;;  %vm1498_vm10 = vweird.f32 %v1490_v53  ;;  %2079 = vmatpush.msra.mxu3 %v2055_v60  ;;  %v1774_v60 = vld [vmem:[#allocation6 + $0x8] sm:$0xff] }
 0x4db   : > { %2639 = vrcp.f32 %v1491_v54  ;;  %v1519_v41 = vand.u32 2147483648, %v1491_v54  ;;  %v1517_v13 = vand.u32 2147483647, %v1491_v54  ;;  %vm1513_vm11 = vweird.f32 %v1491_v54 }
 0x4dc   : > { %v1505_v2 = vor.u32 1.1754944e-38, %v1504_v37  ;;  %vm1503_vm14 = vcmp.eq.f32.partialorder %v1502_v45, 8.507059e+37  ;;  %v1781_v37 = vld [vmem:[#allocation6 + $0x40] sm:$0xff]  ;;  %v1780_v45 = vld [vmem:[#allocation6 + $0x38] sm:$0xff] }
 0x4dd   : > { %v1520_v26 = vor.u32 1.1754944e-38, %v1519_v41  ;;  %vm1518_vm15 = vcmp.eq.f32.partialorder %v1517_v13, 8.507059e+37  ;;  %v2027_v41 = vld [vmem:[#allocation4 + $0x500] sm:$0xff]  ;;  %v2041_v13 = vld [vmem:[#allocation4 + $0x570] sm:$0xff] }
 0x4de   : > { %v2636_v61 = vpop.eup %2635 }
 0x4df   : > { %v1492_v52 = vadd.f32 1.0, %v2636_v61  ;;  %v2039_v61 = vld [vmem:[#allocation4 + $0x560] sm:$0xff] }
 0x4e0   : > { %v2638_v57 = vpop.eup %2637 }
 0x4e1   : > { %v2640_v28 = vpop.eup %2639  ;;  %v1494_v29 = vmul.f32 %v2638_v57, %v1490_v53  ;;  %2641 = vrcp.f32 %v1492_v52  ;;  %vm1499_vm8 = vweird.f32 %v2638_v57  ;;  %v1534_v17 = vand.u32 2147483648, %v1492_v52  ;;  %v1787_v53 = vld [vmem:[#allocation6 + $0x70] sm:$0xff] }
 0x4e2   : > { %v1509_v30 = vmul.f32 %v2640_v28, %v1491_v54  ;;  %2643 = vtanh.f32 %v1480_v27  ;;  %vm1514_vm9 = vweird.f32 %v2640_v28  ;;  %vm1500_vm12 = vmor %vm1498_vm10, %vm1499_vm8  ;;  %vm1528_vm1 = vweird.f32 %v1492_v52  ;;  %v2051_v54 = vld [vmem:[#allocation4 + $0x5c0] sm:$0xff]  ;;  %1790 = vmatpush.msra.mxu1 %v1787_v53  ;;  %v2053_v27 = vld [vmem:[#allocation4 + $0x5d0] sm:$0xff] }
 0x4e3   : > { %v1495_v32 = vsub.f32 1.0, %v1494_v29  ;;  %vm1515_vm13 = vmor %vm1513_vm11, %vm1514_vm9  ;;  %v1532_v21 = vand.u32 2147483647, %v1492_v52  ;;  %v1535_v6 = vor.u32 1.1754944e-38, %v1534_v17  ;;  %2080 = vmatpush.msra.mxu3 %v2051_v54  ;;  %v2031_v29 = vld [vmem:[#allocation4 + $0x520] sm:$0xff]  ;;  %v2025_v17 = vld [vmem:[#allocation4 + $0x4f0] sm:$0xff] }
 0x4e4   : > { %v1510_v34 = vsub.f32 1.0, %v1509_v30  ;;  %1791 = vmatpush.msra.mxu1 %v1786_v55  ;;  %v2049_v30 = vld [vmem:[#allocation4 + $0x5b0] sm:$0xff]  ;;  %v1999_v53 = vld [vmem:[#allocation4 + $0x420] sm:$0xff] }
 0x4e5   : > { %v1496_v44 = vmul.f32 %v2638_v57, %v1495_v32  ;;  %vm1533_vm3 = vcmp.eq.f32.partialorder %v1532_v21, 8.507059e+37  ;;  %2081 = vmatpush.msra.mxu3 %v2047_v63  ;;  %v1552_v32 = vmul.f32 %v3911_v62, %v4358_v33  ;;  %v2017_v54 = vld [vmem:[#allocation4 + $0x4b0] sm:$0xff]  ;;  %v1773_v55 = vld [vmem:[#allocation6] sm:$0xff] }
 0x4e6   : > { %v1511_v46 = vmul.f32 %v2640_v28, %v1510_v34  ;;  %1792 = vmatpush.msra.mxu1 %v1785_v5  ;;  %v1553_v34 = vmul.f32 %v3911_v62, %v4359_v35  ;;  %v1995_v63 = vld [vmem:[#allocation4 + $0x400] sm:$0xff]  ;;  %v2013_v5 = vld [vmem:[#allocation4 + $0x490] sm:$0xff] }
 0x4e7   : > { %v2642_v1 = vpop.eup %2641  ;;  %v1497_v11 = vadd.f32 %v2638_v57, %v1496_v44  ;;  %2082 = vmatpush.msra.mxu3 %v2043_v0  ;;  %v2045_v44 = vld [vmem:[#allocation4 + $0x590] sm:$0xff] }
 0x4e8   : > { %v1524_v24 = vmul.f32 %v2642_v1, %v1492_v52  ;;  %v1512_v58 = vadd.f32 %v2640_v28, %v1511_v46  ;;  %v2644_v15 = vpop.eup %2643  ;;  %vm1529_vm0 = vweird.f32 %v2642_v1  ;;  %1793 = vmatpush.msra.mxu1 %v1784_v3  ;;  %v1783_v52 = vld [vmem:[#allocation6 + $0x50] sm:$0xff]  ;;  %v2023_v46 = vld [vmem:[#allocation4 + $0x4e0] sm:$0xff] }
 0x4e9   : > { %v1501_v16 = vsel %vm1500_vm12, %v2638_v57, %v1497_v11  ;;  %vm1530_vm2 = vmor %vm1528_vm1, %vm1529_vm0  ;;  %2083 = vmatpush.msra.mxu3 %v2039_v61  ;;  %v2035_v57 = vld [vmem:[#allocation4 + $0x540] sm:$0xff]  ;;  %v1557_v11 = vadd.f32 %v1553_v34, %v4361_v43  ;;  %v1997_v34 = vld [vmem:[#allocation4 + $0x410] sm:$0xff] }
 0x4ea   : > { %v1525_v18 = vsub.f32 1.0, %v1524_v24  ;;  %v1506_v38 = vsel %vm1503_vm14, %v1505_v2, %v1501_v16  ;;  %v1516_v40 = vsel %vm1515_vm13, %v2640_v28, %v1512_v58  ;;  %1794 = vmatpush.msra.mxu1 %v1783_v52  ;;  %v1782_v28 = vld [vmem:[#allocation6 + $0x48] sm:$0xff]  ;;  %v1779_v24 = vld [vmem:[#allocation6 + $0x30] sm:$0xff]  ;;  %v2019_v2 = vld [vmem:[#allocation4 + $0x4c0] sm:$0xff] }
 0x4eb   : > { %v1521_v25 = vsel %vm1518_vm15, %v1520_v26, %v1516_v40  ;;  %v1540_v23 = vmul.f32 %v2644_v15, %v1506_v38  ;;  %2084 = vmatpush.msra.mxu3 %v2035_v57  ;;  %v2037_v58 = vld [vmem:[#allocation4 + $0x550] sm:$0xff]  ;;  %v1554_v15 = vmul.f32 %v3911_v62, %v4362_v20  ;;  %v1776_v20 = vld [vmem:[#allocation6 + $0x18] sm:$0xff] }
 0x4ec   : > { %v1526_v8 = vmul.f32 %v2642_v1, %v1525_v18  ;;  %v1539_v36 = vmul.f32 %v1521_v25, %v3877_v31  ;;  %v4366_v31 = vld [vmem:[#allocation44_spill] sm:$0xff]  ;;  %1795 = vmatpush.msra.mxu1 %v1782_v28  ;;  %v1778_v18 = vld [vmem:[#allocation6 + $0x28] sm:$0xff]  ;;  %v1777_v25 = vld [vmem:[#allocation6 + $0x20] sm:$0xff] }
 0x4ed   : > { %2085 = vmatpush.msra.mxu3 %v2031_v29  ;;  %v2033_v38 = vld [vmem:[#allocation4 + $0x530] sm:$0xff] }
 0x4ee   : > { %v3895_v14 = vadd.f32 %v1540_v23, %v1539_v36  ;;  %v1527_v49 = vadd.f32 %v2642_v1, %v1526_v8  ;;  %1796 = vmatpush.msra.mxu1 %v1781_v37  ;;  %v2011_v23 = vld [vmem:[#allocation4 + $0x480] sm:$0xff]  ;;  %v2029_v8 = vld [vmem:[#allocation4 + $0x510] sm:$0xff]  ;;  %v1558_v36 = vadd.f32 %v1554_v15, %v4363_v22 }
 0x4ef   : > { %2086 = vmatpush.msra.mxu3 %v2027_v41  ;;  %v2009_v52 = vld [vmem:[#allocation4 + $0x470] sm:$0xff] }
 0x4f0   : > { %2645 = vtanh.f32 %v3895_v14  ;;  %v1531_v10 = vsel %vm1530_vm2, %v2642_v1, %v1527_v49  ;;  %v1556_v1 = vadd.f32 %v1552_v32, %v4360_v39  ;;  %1797 = vmatpush.msra.mxu1 %v1780_v45  ;;  %v2015_v39 = vld [vmem:[#allocation4 + $0x4a0] sm:$0xff]  ;;  %v2005_v57 = vld [vmem:[#allocation4 + $0x450] sm:$0xff] }
 0x4f1   : > { %v1536_v48 = vsel %vm1533_vm3, %v1535_v6, %v1531_v10  ;;  %2087 = vmatpush.msra.mxu3 %v2023_v46  ;;  %v2007_v49 = vld [vmem:[#allocation4 + $0x460] sm:$0xff]  ;;  %v1775_v6 = vld [vmem:[#allocation6 + $0x10] sm:$0xff] }
 0x4f2   : > { %1798 = vmatpush.msra.mxu1 %v1779_v24  ;;  %v2001_v28 = vld [vmem:[#allocation4 + $0x430] sm:$0xff] }
 0x4f3   : > { %2088 = vmatpush.msra.mxu3 %v2019_v2 }
 0x4f4   : > { %1799 = vmatpush.msra.mxu1 %v1778_v18 }
 0x4f5   : > { %2089 = vmatpush.msra.mxu3 %v2015_v39 }
 0x4f6   : > { %v2646_v47 = vpop.eup %2645  ;;  %1800 = vmatpush.msra.mxu1 %v1777_v25 }
 0x4f7   : > { %v3898_v50 = vmul.f32 %v2646_v47, %v1536_v48  ;;  %2090 = vmatpush.msra.mxu3 %v2011_v23  ;;  %v2003_v47 = vld [vmem:[#allocation4 + $0x440] sm:$0xff]  ;;  %v2021_v48 = vld [vmem:[#allocation4 + $0x4d0] sm:$0xff] }
 0x4f8   : > { %1801 = vmatpush.msra.mxu1 %v1776_v20 }
 0x4f9   : > { %1576 = vmatmul.f32.vlgmr.msrb.gmra.mxu0 %v3898_v50  ;;  %1596 = vmatmul.f32.vlgmr.msrb.gmra.mxu1 %v3898_v50 }
 0x4fa   : > { %1616 = vmatmul.f32.vlgmr.msrb.gmra.mxu2 %v3898_v50  ;;  %1636 = vmatmul.f32.vlgmr.msrb.gmra.mxu3 %v3898_v50 }
 0x4fb   : > { %2159 = vmatpush.msrb.mxu0 %v2057_v4  ;;  %2091 = vmatpush.msra.mxu3 %v2007_v49  ;;  %v1555_v4 = vmul.f32 %v3911_v62, %v4364_v19 }
 0x4fc   : > { %1802 = vmatpush.msra.mxu1 %v1775_v6 }
 0x4fd   : > { %2160 = vmatpush.msrb.mxu0 %v2053_v27  ;;  %2092 = vmatpush.msra.mxu3 %v2003_v47 }
 0x4fe   : > { %1803 = vmatpush.msra.mxu1 %v1774_v60 }
 0x4ff   : > { %2161 = vmatpush.msrb.mxu0 %v2049_v30  ;;  %2093 = vmatpush.msra.mxu3 %v1999_v53  ;;  %v1559_v30 = vadd.f32 %v1555_v4, %v4365_v42 }
 0x500   : > { %1804 = vmatpush.msra.mxu1 %v1773_v55 }
 0x501   : > { %1748 = vmatmul.f32.vlgmr.msra.gmra.mxu0 %v4366_v31  ;;  %2094 = vmatpush.msra.mxu3 %v1995_v63  ;;  %v2530_v63 = vld [vmem:[%s4038_s4] ss:$0 sm:$0xff] }
 0x502   : > { %2162 = vmatpush.msrb.mxu0 %v2045_v44 }
 0x504   : > { %2163 = vmatpush.msrb.mxu0 %v2041_v13 }
 0x506   : > { %2164 = vmatpush.msrb.mxu0 %v2037_v58 }
 0x508   : > { %2165 = vmatpush.msrb.mxu0 %v2033_v38 }
 0x509   : > { %1751 = vmatmul.f32.gmra.mxu0 %v4367_v56 }
 0x50a   : > { %2166 = vmatpush.msrb.mxu0 %v2029_v8 }
 0x50c   : > { %2167 = vmatpush.msrb.mxu0 %v2025_v17 }
 0x50e   : > { %2168 = vmatpush.msrb.mxu0 %v2021_v48 }
 0x510   : > { %2169 = vmatpush.msrb.mxu0 %v2017_v54 }
 0x511   : > { %1754 = vmatmul.f32.gmra.mxu0 %v4368_v7 }
 0x512   : > { %2170 = vmatpush.msrb.mxu0 %v2013_v5 }
 0x514   : > { %2171 = vmatpush.msrb.mxu0 %v2009_v52 }
 0x516   : > { %2172 = vmatpush.msrb.mxu0 %v2005_v57 }
 0x518   : > { %2173 = vmatpush.msrb.mxu0 %v2001_v28 }
 0x519   : > { %1757 = vmatmul.f32.gmra.mxu0 %v4369_v51 }
 0x51a   : > { %2174 = vmatpush.msrb.mxu0 %v1997_v34  ;;  %v2531_v34 = vld [vmem:[%s4038_s4 + $0x1] ss:$0 sm:$0xff] }
 0x521   : > { %1760 = vmatmul.f32.gmra.mxu0 %v3798_v12 }
 0x529   : > { %1763 = vmatmul.f32.gmra.mxu0 %v3880_v9 }
 0x531   : > { %1766 = vmatmul.f32.gmra.mxu0 %v3898_v50 }
 0x576   : > { %v1577_v33 = vpop.f32.mrf.mxu0  ;;  %v1597_v35 = vpop.f32.mrf.mxu1 }
 0x577   : > { %v1640_v26 = vadd.f32 %v1577_v33, %v1556_v1  ;;  %v1641_v16 = vadd.f32 %v1597_v35, %v1557_v11 }
 0x579   : > { %v2467_v43 = vmul.f32 -1.442695, %v1640_v26  ;;  %v2468_v40 = vmul.f32 -1.442695, %v1641_v16 }
 0x57b   : > { %2647 = vpow2.f32 %v2467_v43 }
 0x57c   : > { %2649 = vpow2.f32 %v2468_v40 }
 0x57d   : > { %v1617_v21 = vpop.f32.mrf.mxu2  ;;  %v1637_v27 = vpop.f32.mrf.mxu3 }
 0x57e   : > { %v1642_v10 = vadd.f32 %v1617_v21, %v1558_v36  ;;  %v1643_v41 = vadd.f32 %v1637_v27, %v1559_v30 }
 0x580   : > { %v2469_v59 = vmul.f32 -1.442695, %v1642_v10 }
 0x581   : > { %v2648_v22 = vpop.eup %2647 }
 0x582   : > { %v2650_v0 = vpop.eup %2649  ;;  %v1653_v3 = vadd.f32 1.0, %v2648_v22  ;;  %2651 = vpow2.f32 %v2469_v59 }
 0x583   : > { %v1654_v61 = vadd.f32 1.0, %v2650_v0 }
 0x584   : > { %2653 = vrcp.f32 %v1653_v3  ;;  %v1667_v13 = vand.u32 2147483648, %v1653_v3  ;;  %v1665_v33 = vand.u32 2147483647, %v1653_v3  ;;  %vm1661_vm6 = vweird.f32 %v1653_v3 }
 0x585   : > { %2655 = vrcp.f32 %v1654_v61  ;;  %v1682_v1 = vand.u32 2147483648, %v1654_v61  ;;  %v1680_v35 = vand.u32 2147483647, %v1654_v61  ;;  %vm1676_vm7 = vweird.f32 %v1654_v61 }
 0x586   : > { %v1668_v26 = vor.u32 1.1754944e-38, %v1667_v13  ;;  %vm1666_vm10 = vcmp.eq.f32.partialorder %v1665_v33, 8.507059e+37 }
 0x587   : > { %v1683_v15 = vor.u32 1.1754944e-38, %v1682_v1  ;;  %vm1681_vm11 = vcmp.eq.f32.partialorder %v1680_v35, 8.507059e+37 }
 0x588   : > { %v2652_v29 = vpop.eup %2651 }
 0x589   : > { %v1655_v32 = vadd.f32 1.0, %v2652_v29 }
 0x58a   : > { %v2654_v37 = vpop.eup %2653 }
 0x58b   : > { %v2656_v44 = vpop.eup %2655  ;;  %v1657_v45 = vmul.f32 %v2654_v37, %v1653_v3  ;;  %2657 = vrcp.f32 %v1655_v32  ;;  %vm1662_vm4 = vweird.f32 %v2654_v37  ;;  %v1697_v17 = vand.u32 2147483648, %v1655_v32 }
 0x58c   : > { %v1672_v19 = vmul.f32 %v2656_v44, %v1654_v61  ;;  %2659 = vtanh.f32 %v1643_v41  ;;  %vm1677_vm5 = vweird.f32 %v2656_v44  ;;  %vm1663_vm8 = vmor %vm1661_vm6, %vm1662_vm4  ;;  %vm1691_vm13 = vweird.f32 %v1655_v32 }
 0x58d   : > { %v1658_v62 = vsub.f32 1.0, %v1657_v45  ;;  %vm1678_vm9 = vmor %vm1676_vm7, %vm1677_vm5  ;;  %v1695_v21 = vand.u32 2147483647, %v1655_v32  ;;  %v1698_v6 = vor.u32 1.1754944e-38, %v1697_v17  ;;  %v1975_v17 = vld [vmem:[#allocation4 + $0x360] sm:$0xff] }
 0x58e   : > { %v1673_v46 = vsub.f32 1.0, %v1672_v19 }
 0x58f   : > { %v1659_v11 = vmul.f32 %v2654_v37, %v1658_v62  ;;  %vm1696_vm15 = vcmp.eq.f32.partialorder %v1695_v21, 8.507059e+37  ;;  %v1971_v21 = vld [vmem:[#allocation4 + $0x340] sm:$0xff] }
 0x590   : > { %v1674_v42 = vmul.f32 %v2656_v44, %v1673_v46 }
 0x591   : > { %v2658_v24 = vpop.eup %2657  ;;  %v1660_v2 = vadd.f32 %v2654_v37, %v1659_v11 }
 0x592   : > { %v1687_v58 = vmul.f32 %v2658_v24, %v1655_v32  ;;  %v1675_v16 = vadd.f32 %v2656_v44, %v1674_v42  ;;  %v2660_v39 = vpop.eup %2659  ;;  %vm1692_vm12 = vweird.f32 %v2658_v24 }
 0x593   : > { %v1664_v18 = vsel %vm1663_vm8, %v2654_v37, %v1660_v2  ;;  %vm1693_vm14 = vmor %vm1691_vm13, %vm1692_vm12 }
 0x594   : > { %v1688_v38 = vsub.f32 1.0, %v1687_v58  ;;  %v1669_v43 = vsel %vm1666_vm10, %v1668_v26, %v1664_v18  ;;  %v1679_v40 = vsel %vm1678_vm9, %v2656_v44, %v1675_v16 }
 0x595   : > { %v1684_v25 = vsel %vm1681_vm11, %v1683_v15, %v1679_v40  ;;  %v1703_v23 = vmul.f32 %v2660_v39, %v1669_v43  ;;  %v1991_v40 = vld [vmem:[#allocation4 + $0x3e0] sm:$0xff] }
 0x596   : > { %v1689_v8 = vmul.f32 %v2658_v24, %v1688_v38  ;;  %v1702_v36 = vmul.f32 %v1684_v25, %v3895_v14  ;;  %v1749_v14 = vpop.f32.mrf.mxu0  ;;  %v1987_v25 = vld [vmem:[#allocation4 + $0x3c0] sm:$0xff]  ;;  %2059 = vmatpush.msra.mxu2 %v1991_v40  ;;  %v2036_v40 = vld [vmem:[#allocation4 + $0x548] sm:$0xff] }
 0x598   : > { %v3926_v20 = vadd.f32 %v1703_v23, %v1702_v36  ;;  %v1690_v49 = vadd.f32 %v2658_v24, %v1689_v8  ;;  %2060 = vmatpush.msra.mxu2 %v1987_v25  ;;  %v1983_v23 = vld [vmem:[#allocation4 + $0x3a0] sm:$0xff]  ;;  %v1992_v36 = vld [vmem:[#allocation4 + $0x3e8] sm:$0xff]  ;;  %v1973_v25 = vld [vmem:[#allocation4 + $0x350] sm:$0xff] }
 0x599   : > { %v1979_v8 = vld [vmem:[#allocation4 + $0x380] sm:$0xff]  ;;  %2099 = vmatpush.msrb.mxu1 %v1992_v36  ;;  %v1990_v36 = vld [vmem:[#allocation4 + $0x3d8] sm:$0xff] }
 0x59a   : > { %2661 = vtanh.f32 %v3926_v20  ;;  %v1694_v10 = vsel %vm1693_vm14, %v2658_v24, %v1690_v49  ;;  %2061 = vmatpush.msra.mxu2 %v1983_v23  ;;  %v1988_v49 = vld [vmem:[#allocation4 + $0x3c8] sm:$0xff] }
 0x59b   : > { %v1699_v48 = vsel %vm1696_vm15, %v1698_v6, %v1694_v10  ;;  %2100 = vmatpush.msrb.mxu1 %v1988_v49  ;;  %v1967_v10 = vld [vmem:[#allocation4 + $0x320] sm:$0xff]  ;;  %v1984_v6 = vld [vmem:[#allocation4 + $0x3a8] sm:$0xff] }
 0x59c   : > { %2062 = vmatpush.msra.mxu2 %v1979_v8  ;;  %v2032_v49 = vld [vmem:[#allocation4 + $0x528] sm:$0xff] }
 0x59d   : > { %2101 = vmatpush.msrb.mxu1 %v1984_v6  ;;  %v2028_v6 = vld [vmem:[#allocation4 + $0x508] sm:$0xff] }
 0x59e   : > { %v1752_v60 = vpop.f32.mrf.mxu0  ;;  %2063 = vmatpush.msra.mxu2 %v1975_v17 }
 0x5a0   : > { %v2662_v47 = vpop.eup %2661  ;;  %2064 = vmatpush.msra.mxu2 %v1971_v21  ;;  %v1969_v21 = vld [vmem:[#allocation4 + $0x330] sm:$0xff] }
 0x5a1   : > { %v3929_v59 = vmul.f32 %v2662_v47, %v1699_v48  ;;  %v1963_v48 = vld [vmem:[#allocation4 + $0x300] sm:$0xff] }
 0x5a2   : > { %2065 = vmatpush.msra.mxu2 %v1967_v10  ;;  %v1986_v10 = vld [vmem:[#allocation4 + $0x3b8] sm:$0xff] }
 0x5a3   : > { %1769 = vmatmul.f32.gmra.mxu0 %v3929_v59  ;;  %1805 = vmatmul.f32.vlgmr.msra.gmra.mxu1 %v3929_v59 }
 0x5a4   : > { %2095 = vmatmul.f32.vlgmr.msra.gmra.mxu3 %v3929_v59  ;;  %2066 = vmatpush.msra.mxu2 %v1963_v48 }
 0x5a6   : > { %v1755_v53 = vpop.f32.mrf.mxu0 }
 0x5ab   : > { %2175 = vmatmul.f32.vlgmr.msrb.gmra.mxu0 %v3929_v59 }
 0x5ae   : > { %v1758_v54 = vpop.f32.mrf.mxu0 }
 0x5b6   : > { %v1761_v22 = vpop.f32.mrf.mxu0 }
 0x5be   : > { %v1764_v55 = vpop.f32.mrf.mxu0 }
 0x5c6   : > { %v1767_v4 = vpop.f32.mrf.mxu0 }
 0x620   : > { %v1806_v5 = vpop.f32.mrf.mxu1  ;;  %v1770_v35 = vpop.f32.mrf.mxu0 }
 0x621   : > { %v1813_v0 = vadd.f32 %v1806_v5, %v1755_v53  ;;  %v1812_v3 = vadd.f32 %v1806_v5, %v1752_v60  ;;  %v1811_v61 = vadd.f32 %v1806_v5, %v1749_v14  ;;  %v1817_v28 = vadd.f32 %v1806_v5, %v1767_v4  ;;  %v1980_v14 = vld [vmem:[#allocation4 + $0x388] sm:$0xff]  ;;  %v1959_v60 = vld [vmem:[#allocation4 + $0x2e0] sm:$0xff] }
 0x622   : > { %v1816_v29 = vadd.f32 %v1806_v5, %v1764_v55  ;;  %v1814_v30 = vadd.f32 %v1806_v5, %v1758_v54  ;;  %v1815_v13 = vadd.f32 %v1806_v5, %v1761_v22  ;;  %v1818_v26 = vadd.f32 %v1806_v5, %v1770_v35  ;;  %2102 = vmatpush.msrb.mxu1 %v1980_v14  ;;  %v1976_v53 = vld [vmem:[#allocation4 + $0x368] sm:$0xff]  ;;  %v1955_v54 = vld [vmem:[#allocation4 + $0x2c0] sm:$0xff] }
 0x623   : > { %v1822_v52 = vadd.f32 %v2530_v63, %v1813_v0  ;;  %v1821_v57 = vadd.f32 %v2530_v63, %v1812_v3  ;;  %v1820_v27 = vadd.f32 %v2530_v63, %v1811_v61  ;;  %v1826_v32 = vadd.f32 %v2530_v63, %v1817_v28  ;;  %2067 = vmatpush.msra.mxu2 %v1959_v60  ;;  %v1972_v22 = vld [vmem:[#allocation4 + $0x348] sm:$0xff]  ;;  %v1951_v55 = vld [vmem:[#allocation4 + $0x2a0] sm:$0xff] }
 0x624   : > { %v1825_v37 = vadd.f32 %v2530_v63, %v1816_v29  ;;  %v1823_v41 = vadd.f32 %v2530_v63, %v1814_v30  ;;  %v1824_v33 = vadd.f32 %v2530_v63, %v1815_v13  ;;  %v1827_v15 = vadd.f32 %v2530_v63, %v1818_v26  ;;  %2103 = vmatpush.msrb.mxu1 %v1976_v53  ;;  %v1968_v63 = vld [vmem:[#allocation4 + $0x328] sm:$0xff]  ;;  %v1947_v0 = vld [vmem:[#allocation4 + $0x280] sm:$0xff]  ;;  %v1965_v53 = vld [vmem:[#allocation4 + $0x310] sm:$0xff] }
 0x625   : > { %2663 = vtanh.f32 %v1822_v52  ;;  %2068 = vmatpush.msra.mxu2 %v1955_v54  ;;  %v1964_v3 = vld [vmem:[#allocation4 + $0x308] sm:$0xff]  ;;  %v1943_v61 = vld [vmem:[#allocation4 + $0x260] sm:$0xff] }
 0x626   : > { %2665 = vtanh.f32 %v1821_v57  ;;  %2104 = vmatpush.msrb.mxu1 %v1972_v22  ;;  %v1960_v4 = vld [vmem:[#allocation4 + $0x2e8] sm:$0xff]  ;;  %v1935_v29 = vld [vmem:[#allocation4 + $0x220] sm:$0xff]  ;;  %v1982_v22 = vld [vmem:[#allocation4 + $0x398] sm:$0xff] }
 0x627   : > { %2667 = vtanh.f32 %v1820_v27  ;;  %2069 = vmatpush.msra.mxu2 %v1951_v55  ;;  %v1939_v27 = vld [vmem:[#allocation4 + $0x240] sm:$0xff]  ;;  %v1956_v28 = vld [vmem:[#allocation4 + $0x2c8] sm:$0xff] }
 0x628   : > { %2669 = vtanh.f32 %v1826_v32  ;;  %2105 = vmatpush.msrb.mxu1 %v1968_v63  ;;  %v1952_v30 = vld [vmem:[#allocation4 + $0x2a8] sm:$0xff] }
 0x629   : > { %2671 = vtanh.f32 %v1825_v37  ;;  %2070 = vmatpush.msra.mxu2 %v1947_v0  ;;  %v1948_v37 = vld [vmem:[#allocation4 + $0x288] sm:$0xff] }
 0x62a   : > { %2673 = vtanh.f32 %v1823_v41  ;;  %2106 = vmatpush.msrb.mxu1 %v1964_v3  ;;  %v2056_v41 = vld [vmem:[#allocation4 + $0x5e8] sm:$0xff]  ;;  %v1961_v3 = vld [vmem:[#allocation4 + $0x2f0] sm:$0xff] }
 0x62b   : > { %v2664_v44 = vpop.eup %2663  ;;  %2675 = vtanh.f32 %v1824_v33  ;;  %2071 = vmatpush.msra.mxu2 %v1943_v61  ;;  %v1985_v33 = vld [vmem:[#allocation4 + $0x3b0] sm:$0xff]  ;;  %v1936_v35 = vld [vmem:[#allocation4 + $0x228] sm:$0xff] }
 0x62c   : > { %v2666_v45 = vpop.eup %2665  ;;  %v1839_v19 = vmul.f32 %v2664_v44, %v2531_v34  ;;  %2677 = vtanh.f32 %v1827_v15  ;;  %2107 = vmatpush.msrb.mxu1 %v1960_v4  ;;  %v1993_v44 = vld [vmem:[#allocation4 + $0x3f0] sm:$0xff]  ;;  %v2024_v55 = vld [vmem:[#allocation4 + $0x4e8] sm:$0xff]  ;;  %v1978_v4 = vld [vmem:[#allocation4 + $0x378] sm:$0xff] }
 0x62d   : > { %v2668_v62 = vpop.eup %2667  ;;  %v1838_v46 = vmul.f32 %v2666_v45, %v2531_v34  ;;  %2072 = vmatpush.msra.mxu2 %v1939_v27  ;;  %2139 = vmatpush.msrb.mxu3 %v1993_v44  ;;  %v1944_v45 = vld [vmem:[#allocation4 + $0x268] sm:$0xff]  ;;  %v1949_v44 = vld [vmem:[#allocation4 + $0x290] sm:$0xff] }
 0x62e   : > { %1849 = vadd.xlane.f32.xlu1 %v1839_v19  ;;  %v1837_v1 = vmul.f32 %v2668_v62, %v2531_v34  ;;  %v2670_v11 = vpop.eup %2669  ;;  %2108 = vmatpush.msrb.mxu1 %v1956_v28  ;;  %v2052_v19 = vld [vmem:[#allocation4 + $0x5c8] sm:$0xff]  ;;  %v1989_v62 = vld [vmem:[#allocation4 + $0x3d0] sm:$0xff]  ;;  %v1974_v28 = vld [vmem:[#allocation4 + $0x358] sm:$0xff] }
 0x62f   : > { %1847 = vadd.xlane.f32.xlu0 %v1838_v46  ;;  %v2672_v42 = vpop.eup %2671  ;;  %v1843_v2 = vmul.f32 %v2670_v11, %v2531_v34  ;;  %2073 = vmatpush.msra.mxu2 %v1935_v29  ;;  %v1940_v46 = vld [vmem:[#allocation4 + $0x248] sm:$0xff] }
 0x630   : > { %1845 = vadd.xlane.f32.xlu2 %v1837_v1  ;;  %v2674_v24 = vpop.eup %2673  ;;  %v1842_v58 = vmul.f32 %v2672_v42, %v2531_v34  ;;  %2109 = vmatpush.msrb.mxu1 %v1952_v30  ;;  %v2048_v11 = vld [vmem:[#allocation4 + $0x5a8] sm:$0xff]  ;;  %v1953_v30 = vld [vmem:[#allocation4 + $0x2b0] sm:$0xff] }
 0x631   : > { %v1840_v16 = vmul.f32 %v2674_v24, %v2531_v34  ;;  %v2676_v18 = vpop.eup %2675  ;;  %2140 = vmatpush.msrb.mxu3 %v1989_v62  ;;  %v2016_v29 = vld [vmem:[#allocation4 + $0x4a8] sm:$0xff]  ;;  %v1966_v62 = vld [vmem:[#allocation4 + $0x318] sm:$0xff] }
 0x632   : > { %v1841_v39 = vmul.f32 %v2676_v18, %v2531_v34  ;;  %v2678_v38 = vpop.eup %2677  ;;  %2110 = vmatpush.msrb.mxu1 %v1948_v37  ;;  %v1932_v18 = vld [vmem:[#allocation4 + $0x208] sm:$0xff]  ;;  %v1970_v37 = vld [vmem:[#allocation4 + $0x338] sm:$0xff] }
 0x633   : > { %v1844_v43 = vmul.f32 %v2678_v38, %v2531_v34  ;;  %v1931_v34 = vld [vmem:[#allocation4 + $0x200] sm:$0xff]  ;;  %2141 = vmatpush.msrb.mxu3 %v1985_v33  ;;  %v1977_v38 = vld [vmem:[#allocation4 + $0x370] sm:$0xff] }
 0x634   : > { %2074 = vmatpush.msra.mxu2 %v1931_v34  ;;  %2111 = vmatpush.msrb.mxu1 %v1944_v45 }
 0x636   : > { %1857 = vadd.xlane.f32.xlu1 %v1843_v2  ;;  %2119 = vmatpush.msrb.mxu2 %v2056_v41  ;;  %v2044_v2 = vld [vmem:[#allocation4 + $0x588] sm:$0xff] }
 0x637   : > { %1855 = vadd.xlane.f32.xlu0 %v1842_v58  ;;  %2112 = vmatpush.msrb.mxu1 %v1940_v46  ;;  %v1981_v58 = vld [vmem:[#allocation4 + $0x390] sm:$0xff]  ;;  %v2012_v41 = vld [vmem:[#allocation4 + $0x488] sm:$0xff] }
 0x638   : > { %1851 = vadd.xlane.f32.xlu2 %v1840_v16  ;;  %2120 = vmatpush.msrb.mxu2 %v2052_v19  ;;  %v2008_v46 = vld [vmem:[#allocation4 + $0x468] sm:$0xff] }
 0x639   : > { %2113 = vmatpush.msrb.mxu1 %v1936_v35  ;;  %2142 = vmatpush.msrb.mxu3 %v1981_v58  ;;  %v2004_v35 = vld [vmem:[#allocation4 + $0x448] sm:$0xff]  ;;  %v1941_v58 = vld [vmem:[#allocation4 + $0x250] sm:$0xff] }
 0x63a   : > { %2121 = vmatpush.msrb.mxu2 %v2048_v11 }
 0x63b   : > { %2114 = vmatpush.msrb.mxu1 %v1932_v18  ;;  %2143 = vmatpush.msrb.mxu3 %v1977_v38 }
 0x63c   : > { %2122 = vmatpush.msrb.mxu2 %v2044_v2 }
 0x63d   : > { %2144 = vmatpush.msrb.mxu3 %v1973_v25  ;;  %v1954_v25 = vld [vmem:[#allocation4 + $0x2b8] sm:$0xff] }
 0x63f   : > { %2145 = vmatpush.msrb.mxu3 %v1969_v21 }
 0x640   : > { %1853 = vadd.xlane.f32.xlu2 %v1841_v39  ;;  %v2040_v39 = vld [vmem:[#allocation4 + $0x568] sm:$0xff] }
 0x641   : > { %2123 = vmatpush.msrb.mxu2 %v2040_v39  ;;  %2146 = vmatpush.msrb.mxu3 %v1965_v53  ;;  %v1942_v53 = vld [vmem:[#allocation4 + $0x258] sm:$0xff] }
 0x643   : > { %2124 = vmatpush.msrb.mxu2 %v2036_v40  ;;  %2147 = vmatpush.msrb.mxu3 %v1961_v3 }
 0x645   : > { %2125 = vmatpush.msrb.mxu2 %v2032_v49 }
 0x647   : > { %2126 = vmatpush.msrb.mxu2 %v2028_v6  ;;  %v1946_v6 = vld [vmem:[#allocation4 + $0x278] sm:$0xff] }
 0x648   : > { %1859 = vadd.xlane.f32.xlu2 %v1844_v43  ;;  %v1994_v43 = vld [vmem:[#allocation4 + $0x3f8] sm:$0xff] }
 0x649   : > { %2179 = vmatpush.msra.mxu1 %v1994_v43  ;;  %2127 = vmatpush.msrb.mxu2 %v2024_v55  ;;  %v1937_v43 = vld [vmem:[#allocation4 + $0x230] sm:$0xff] }
 0x64b   : > { %2180 = vmatpush.msra.mxu1 %v1990_v36  ;;  %v1933_v36 = vld [vmem:[#allocation4 + $0x210] sm:$0xff] }
 0x64d   : > { %2181 = vmatpush.msra.mxu1 %v1986_v10 }
 0x64f   : > { %2182 = vmatpush.msra.mxu1 %v1982_v22 }
 0x651   : > { %2183 = vmatpush.msra.mxu1 %v1978_v4 }
 0x653   : > { %2184 = vmatpush.msra.mxu1 %v1974_v28 }
 0x655   : > { %2185 = vmatpush.msra.mxu1 %v1970_v37 }
 0x657   : > { %2186 = vmatpush.msra.mxu1 %v1966_v62  ;;  %v2050_v62 = vld [vmem:[#allocation4 + $0x5b8] sm:$0xff] }
 0x6a1   : > { %v3945_v52 = vpop.xlane.xlu1 %1849 }
 0x6a2   : > { %v3947_v57 = vpop.xlane.xlu0 %1847 }
 0x6a3   : > { %v3941_v47 = vpop.xlane.xlu2 %1845 }
 0x6a9   : > { %v3951_v13 = vpop.xlane.xlu1 %1857 }
 0x6aa   : > { %v3953_v1 = vpop.xlane.xlu0 %1855  ;;  %v1863_v26 = vmax.f32 %v3945_v52, %v3951_v13 }
 0x6ab   : > { %v3943_v5 = vpop.xlane.xlu2 %1851  ;;  %v1862_v16 = vmax.f32 %v3947_v57, %v3953_v1 }
 0x6b3   : > { %v3949_v32 = vpop.xlane.xlu2 %1853 }
 0x6b4   : > { %v1861_v42 = vmax.f32 %v3941_v47, %v3949_v32 }
 0x6b6   : > { %v1865_v23 = vmax.f32 %v1861_v42, %v1862_v16  ;;  %v1962_v42 = vld [vmem:[#allocation4 + $0x2f8] sm:$0xff] }
 0x6b7   : > { %v1958_v16 = vld [vmem:[#allocation4 + $0x2d8] sm:$0xff]  ;;  %2187 = vmatpush.msra.mxu1 %v1962_v42 }
 0x6b8   : > { %v2026_v42 = vld [vmem:[#allocation4 + $0x4f8] sm:$0xff] }
 0x6b9   : > { %2188 = vmatpush.msra.mxu1 %v1958_v16  ;;  %v2002_v16 = vld [vmem:[#allocation4 + $0x438] sm:$0xff] }
 0x6bb   : > { %v3957_v24 = vpop.xlane.xlu2 %1859  ;;  %2189 = vmatpush.msra.mxu1 %v1954_v25 }
 0x6bc   : > { %v1864_v15 = vmax.f32 %v3943_v5, %v3957_v24 }
 0x6be   : > { %v1866_v8 = vmax.f32 %v1863_v26, %v1864_v15  ;;  %v2000_v15 = vld [vmem:[#allocation4 + $0x428] sm:$0xff] }
 0x6c0   : > { %v3965_v17 = vmax.f32 %v1865_v23, %v1866_v8  ;;  %v1996_v23 = vld [vmem:[#allocation4 + $0x408] sm:$0xff] }
 0x6c2   : > { %v1868_v48 = vsub.f32 %v3941_v47, %v3965_v17  ;;  %v1869_v14 = vsub.f32 %v3947_v57, %v3965_v17  ;;  %v1870_v60 = vsub.f32 %v3945_v52, %v3965_v17  ;;  %v1871_v54 = vsub.f32 %v3943_v5, %v3965_v17  ;;  %v2020_v52 = vld [vmem:[#allocation4 + $0x4c8] sm:$0xff]  ;;  %v1957_v57 = vld [vmem:[#allocation4 + $0x2d0] sm:$0xff] }
 0x6c3   : > { %v1872_v47 = vsub.f32 %v3949_v32, %v3965_v17  ;;  %v1873_v5 = vsub.f32 %v3953_v1, %v3965_v17  ;;  %2128 = vmatpush.msrb.mxu2 %v2020_v52  ;;  %v1874_v32 = vsub.f32 %v3951_v13, %v3965_v17  ;;  %2148 = vmatpush.msrb.mxu3 %v1957_v57  ;;  %v1945_v13 = vld [vmem:[#allocation4 + $0x270] sm:$0xff] }
 0x6c4   : > { %v1876_v63 = vmul.f32 1.442695, %v1868_v48  ;;  %v1878_v0 = vmul.f32 1.442695, %v1869_v14  ;;  %v1880_v61 = vmul.f32 1.442695, %v1870_v60  ;;  %v1875_v45 = vsub.f32 %v3957_v24, %v3965_v17 }
 0x6c5   : > { %v1882_v27 = vmul.f32 1.442695, %v1871_v54  ;;  %v1884_v34 = vmul.f32 1.442695, %v1872_v47  ;;  %2129 = vmatpush.msrb.mxu2 %v2016_v29  ;;  %v1886_v19 = vmul.f32 1.442695, %v1873_v5  ;;  %2149 = vmatpush.msrb.mxu3 %v1953_v30 }
 0x6c6   : > { %2679 = vpow2.f32 %v1876_v63  ;;  %v1888_v33 = vmul.f32 1.442695, %v1874_v32  ;;  %v1890_v26 = vmul.f32 1.442695, %v1875_v45  ;;  %v1950_v17 = vld [vmem:[#allocation4 + $0x298] sm:$0xff] }
 0x6c7   : > { %2681 = vpow2.f32 %v1878_v0  ;;  %2130 = vmatpush.msrb.mxu2 %v2012_v41  ;;  %2150 = vmatpush.msrb.mxu3 %v1949_v44  ;;  %v1938_v63 = vld [vmem:[#allocation4 + $0x238] sm:$0xff] }
 0x6c8   : > { %2683 = vpow2.f32 %v1880_v61  ;;  %2190 = vmatpush.msra.mxu1 %v1950_v17  ;;  %v1934_v47 = vld [vmem:[#allocation4 + $0x218] sm:$0xff] }
 0x6c9   : > { %2685 = vpow2.f32 %v1882_v27  ;;  %2131 = vmatpush.msrb.mxu2 %v2008_v46  ;;  %2151 = vmatpush.msrb.mxu3 %v1945_v13  ;;  %v2046_v46 = vld [vmem:[#allocation4 + $0x598] sm:$0xff] }
 0x6ca   : > { %2687 = vpow2.f32 %v1884_v34  ;;  %2191 = vmatpush.msra.mxu1 %v1946_v6  ;;  %v2038_v13 = vld [vmem:[#allocation4 + $0x558] sm:$0xff] }
 0x6cb   : > { %2689 = vpow2.f32 %v1886_v19  ;;  %2132 = vmatpush.msrb.mxu2 %v2004_v35  ;;  %2152 = vmatpush.msrb.mxu3 %v1941_v58  ;;  %v2058_v19 = vld [vmem:[#allocation4 + $0x5f8] sm:$0xff] }
 0x6cc   : > { %v2680_v1 = vpop.eup %2679  ;;  %2691 = vpow2.f32 %v1888_v33  ;;  %2192 = vmatpush.msra.mxu1 %v1942_v53  ;;  %v2030_v33 = vld [vmem:[#allocation4 + $0x518] sm:$0xff] }
 0x6cd   : > { %v2682_v11 = vpop.eup %2681  ;;  %v1899_v18 = vmul.f32 %v2680_v1, %v4366_v31  ;;  %2133 = vmatpush.msrb.mxu2 %v2000_v15  ;;  %2693 = vpow2.f32 %v1890_v26  ;;  %2153 = vmatpush.msrb.mxu3 %v1937_v43  ;;  %v2022_v35 = vld [vmem:[#allocation4 + $0x4d8] sm:$0xff] }
 0x6ce   : > { %v1892_v2 = vadd.f32 %v2682_v11, %v2680_v1  ;;  %v2684_v24 = vpop.eup %2683  ;;  %v1900_v39 = vmul.f32 %v2682_v11, %v4367_v56  ;;  %2193 = vmatpush.msra.mxu1 %v1938_v63  ;;  %v2042_v1 = vld [vmem:[#allocation4 + $0x578] sm:$0xff] }
 0x6cf   : > { %v2686_v40 = vpop.eup %2685  ;;  %2134 = vmatpush.msrb.mxu2 %v1996_v23  ;;  %2154 = vmatpush.msrb.mxu3 %v1933_v36  ;;  %v1901_v10 = vmul.f32 %v2684_v24, %v4368_v7  ;;  %v2034_v11 = vld [vmem:[#allocation4 + $0x538] sm:$0xff]  ;;  %v2309_v23 = vld [vmem:[#allocation6 + $0x170] sm:$0xff] }
 0x6d0   : > { %v1893_v38 = vadd.f32 %v2684_v24, %v1892_v2  ;;  %v2688_v49 = vpop.eup %2687  ;;  %v1907_v31 = vadd.f32 %v1900_v39, %v1899_v18  ;;  %v1902_v55 = vmul.f32 %v2686_v40, %v4369_v51  ;;  %2194 = vmatpush.msra.mxu1 %v1934_v47  ;;  %v2018_v2 = vld [vmem:[#allocation4 + $0x4b8] sm:$0xff]  ;;  %v2096_v18 = vpop.f32.mrf.mxu3 }
 0x6d1   : > { %v2690_v56 = vpop.eup %2689  ;;  %v1903_v7 = vmul.f32 %v2688_v49, %v3798_v12  ;;  %v2014_v58 = vld [vmem:[#allocation4 + $0x498] sm:$0xff] }
 0x6d2   : > { %v1894_v8 = vadd.f32 %v2686_v40, %v1893_v38  ;;  %v2692_v14 = vpop.eup %2691  ;;  %v1908_v60 = vadd.f32 %v1907_v31, %v1901_v10  ;;  %v1904_v4 = vmul.f32 %v2690_v56, %v3880_v9  ;;  %v2010_v24 = vld [vmem:[#allocation4 + $0x478] sm:$0xff] }
 0x6d3   : > { %v2694_v22 = vpop.eup %2693  ;;  %v1905_v27 = vmul.f32 %v2692_v14, %v3898_v50  ;;  %v2054_v50 = vld [vmem:[#allocation4 + $0x5d8] sm:$0xff] }
 0x6d4   : > { %v1895_v21 = vadd.f32 %v2688_v49, %v1894_v8  ;;  %v1909_v3 = vadd.f32 %v1908_v60, %v1902_v55  ;;  %v1906_v34 = vmul.f32 %v2694_v22, %v3929_v59  ;;  %v2006_v26 = vld [vmem:[#allocation4 + $0x458] sm:$0xff]  ;;  %v2176_v8 = vpop.f32.mrf.mxu0  ;;  %v2304_v55 = vld [vmem:[#allocation6 + $0x148] sm:$0xff] }
 0x6d5   : > { %v1998_v15 = vld [vmem:[#allocation4 + $0x418] sm:$0xff] }
 0x6d6   : > { %v1896_v48 = vadd.f32 %v2690_v56, %v1895_v21  ;;  %v1910_v61 = vadd.f32 %v1909_v3, %v1903_v7  ;;  %v3996_v39 = vld [vmem:[%s4036_s2 + $0x2] ss:$8 sm:$0xf] }
 0x6d7   : > { %v2310_v38 = vld [vmem:[#allocation6 + $0x178] sm:$0xff]  ;;  %v2220_v43 = vperm.slane %v3996_v39, 0  ;;  %v2222_v25 = vperm.slane %v3996_v39, 2  ;;  %v2307_v56 = vld [vmem:[#allocation6 + $0x160] sm:$0xff] }
 0x6d8   : > { %v1897_v54 = vadd.f32 %v2692_v14, %v1896_v48  ;;  %v1911_v57 = vadd.f32 %v1910_v61, %v1904_v4  ;;  %2313 = vmatpush.msra.mxu3 %v2310_v38  ;;  %v2306_v6 = vld [vmem:[#allocation6 + $0x158] sm:$0xff]  ;;  %v2221_v48 = vperm.slane %v3996_v39, 1  ;;  %v2301_v4 = vld [vmem:[#allocation6 + $0x130] sm:$0xff] }
 0x6d9   : > { %v2302_v61 = vld [vmem:[#allocation6 + $0x138] sm:$0xff] }
 0x6da   : > { %v1898_v0 = vadd.f32 %v2694_v22, %v1897_v54  ;;  %v1912_v29 = vadd.f32 %v1911_v57, %v1905_v27  ;;  %2314 = vmatpush.msra.mxu3 %v2309_v23  ;;  %v2305_v54 = vld [vmem:[#allocation6 + $0x150] sm:$0xff]  ;;  %v2298_v27 = vld [vmem:[#allocation6 + $0x118] sm:$0xff] }
 0x6dc   : > { %2695 = vrcp.f32 %v1898_v0  ;;  %v1925_v51 = vand.u32 2147483648, %v1898_v0  ;;  %v1923_v32 = vand.u32 2147483647, %v1898_v0  ;;  %vm1919_vm1 = vweird.f32 %v1898_v0 }
 0x6dd   : > { %v1913_v41 = vadd.f32 %v1912_v29, %v1906_v34 }
 0x6de   : > { %v1926_v12 = vor.u32 1.1754944e-38, %v1925_v51  ;;  %vm1924_vm3 = vcmp.eq.f32.partialorder %v1923_v32, 8.507059e+37  ;;  %v2297_v32 = vld [vmem:[#allocation6 + $0x110] sm:$0xff] }
 0x6e2   : > { %v2696_v52 = vpop.eup %2695 }
 0x6e3   : > { %v1915_v5 = vmul.f32 %v2696_v52, %v1898_v0  ;;  %vm1920_vm0 = vweird.f32 %v2696_v52  ;;  %v2303_v0 = vld [vmem:[#allocation6 + $0x140] sm:$0xff] }
 0x6e4   : > { %vm1921_vm2 = vmor %vm1919_vm1, %vm1920_vm0  ;;  %vm2342_vm0 = vcmask 7168  }
 0x6e5   : > { %v1916_v28 = vsub.f32 1.0, %v1915_v5  ;;  %v2299_v5 = vld [vmem:[#allocation6 + $0x120] sm:$0xff] }
 0x6e7   : > { %v1917_v30 = vmul.f32 %v2696_v52, %v1916_v28 }
 0x6e9   : > { %v1918_v37 = vadd.f32 %v2696_v52, %v1917_v30 }
 0x6eb   : > { %v1922_v44 = vsel %vm1921_vm2, %v2696_v52, %v1918_v37  ;;  %v2300_v52 = vld [vmem:[#allocation6 + $0x128] sm:$0xff] }
 0x6ec   : > { %v1927_v9 = vsel %vm1924_vm3, %v1926_v12, %v1922_v44  ;;  %v2296_v37 = vld [vmem:[#allocation6 + $0x108] sm:$0xff]  ;;  %v2295_v12 = vld [vmem:[#allocation6 + $0x100] sm:$0xff] }
 0x6ed   : > { %v1928_v45 = vmul.f32 %v1927_v9, %v1913_v41 }
 0x6ef   : > { %2075 = vmatmul.f32.vlgmr.msra.gmra.mxu2 %v1928_v45  ;;  %2115 = vmatmul.f32.vlgmr.msrb.gmra.mxu1 %v1928_v45 }
 0x6f0   : > { %2155 = vmatmul.f32.vlgmr.msrb.gmra.mxu3 %v1928_v45  ;;  %2199 = vmatpush.msra.mxu2 %v2058_v19  ;;  %v2223_v19 = vperm.slane %v3996_v39, 3 }
 0x6f2   : > { %2200 = vmatpush.msra.mxu2 %v2054_v50 }
 0x6f4   : > { %2201 = vmatpush.msra.mxu2 %v2050_v62 }
 0x6f6   : > { %2202 = vmatpush.msra.mxu2 %v2046_v46 }
 0x6f7   : > { %2135 = vmatmul.f32.vlgmr.msrb.gmra.mxu2 %v3929_v59  ;;  %2195 = vmatmul.f32.vlgmr.msra.gmra.mxu1 %v1928_v45 }
 0x6f8   : > { %2203 = vmatpush.msra.mxu2 %v2042_v1 }
 0x6fa   : > { %2204 = vmatpush.msra.mxu2 %v2038_v13 }
 0x6fc   : > { %2205 = vmatpush.msra.mxu2 %v2034_v11 }
 0x6fe   : > { %2206 = vmatpush.msra.mxu2 %v2030_v33 }
 0x700   : > { %2207 = vmatpush.msra.mxu2 %v2026_v42 }
 0x702   : > { %2208 = vmatpush.msra.mxu2 %v2022_v35 }
 0x704   : > { %2209 = vmatpush.msra.mxu2 %v2018_v2 }
 0x706   : > { %2210 = vmatpush.msra.mxu2 %v2014_v58 }
 0x708   : > { %2211 = vmatpush.msra.mxu2 %v2010_v24 }
 0x70a   : > { %2212 = vmatpush.msra.mxu2 %v2006_v26 }
 0x70c   : > { %2213 = vmatpush.msra.mxu2 %v2002_v16 }
 0x70e   : > { %2214 = vmatpush.msra.mxu2 %v1998_v15 }
 0x70f   : > { %2215 = vmatmul.f32.vlgmr.msra.gmra.mxu2 %v3929_v59  ;;  %v2308_v59 = vld [vmem:[#allocation6 + $0x168] sm:$0xff] }
 0x710   : > { %2315 = vmatpush.msra.mxu3 %v2308_v59 }
 0x712   : > { %2316 = vmatpush.msra.mxu3 %v2307_v56 }
 0x714   : > { %2317 = vmatpush.msra.mxu3 %v2306_v6 }
 0x716   : > { %2318 = vmatpush.msra.mxu3 %v2305_v54  ;;  %v2533_v54 = vld [vmem:[%s4038_s4 + $0x3] ss:$0 sm:$0xff] }
 0x718   : > { %2319 = vmatpush.msra.mxu3 %v2304_v55 }
 0x71a   : > { %2320 = vmatpush.msra.mxu3 %v2303_v0 }
 0x71c   : > { %2321 = vmatpush.msra.mxu3 %v2302_v61 }
 0x71e   : > { %2322 = vmatpush.msra.mxu3 %v2301_v4 }
 0x720   : > { %2323 = vmatpush.msra.mxu3 %v2300_v52 }
 0x722   : > { %2324 = vmatpush.msra.mxu3 %v2299_v5 }
 0x724   : > { %2325 = vmatpush.msra.mxu3 %v2298_v27 }
 0x726   : > { %2326 = vmatpush.msra.mxu3 %v2297_v32 }
 0x728   : > { %2327 = vmatpush.msra.mxu3 %v2296_v37 }
 0x72a   : > { %2328 = vmatpush.msra.mxu3 %v2295_v12 }
 0x76c   : > { %v2116_v14 = vpop.f32.mrf.mxu1 }
 0x772   : > { %v2076_v40 = vpop.f32.mrf.mxu2 }
 0x773   : > { %v2097_v36 = vadd.f32 %v2096_v18, %v2076_v40  ;;  %v2156_v49 = vpop.f32.mrf.mxu3 }
 0x774   : > { %v2177_v17 = vadd.f32 %v2176_v8, %v2156_v49  ;;  %v2196_v50 = vpop.f32.mrf.mxu1 }
 0x775   : > { %v2228_v31 = vadd.f32 %v2220_v43, %v2097_v36 }
 0x776   : > { %v2230_v21 = vadd.f32 %v2222_v25, %v2177_v17 }
 0x777   : > { %v2471_v10 = vmul.f32 -1.442695, %v2228_v31 }
 0x778   : > { %v2473_v60 = vmul.f32 -1.442695, %v2230_v21 }
 0x779   : > { %2697 = vpow2.f32 %v2471_v10 }
 0x77a   : > { %v2136_v53 = vpop.f32.mrf.mxu2  ;;  %2699 = vpow2.f32 %v2473_v60 }
 0x77b   : > { %v2137_v22 = vadd.f32 %v2136_v53, %v2116_v14  ;;  %v2532_v14 = vld [vmem:[%s4038_s4 + $0x2] ss:$0 sm:$0xff] }
 0x77d   : > { %v2229_v63 = vadd.f32 %v2221_v48, %v2137_v22 }
 0x77f   : > { %v2698_v3 = vpop.eup %2697  ;;  %v2472_v47 = vmul.f32 -1.442695, %v2229_v63  ;;  %v2534_v63 = vld [vmem:[%s4038_s4 + $0x4] ss:$0 sm:$0xff] }
 0x780   : > { %v2241_v7 = vadd.f32 1.0, %v2698_v3  ;;  %v2700_v57 = vpop.eup %2699 }
 0x781   : > { %2701 = vpow2.f32 %v2472_v47  ;;  %v4001_v51 = vadd.f32 1.0, %v2700_v57 }
 0x782   : > { %2703 = vrcp.f32 %v2241_v7  ;;  %v2255_v24 = vand.u32 2147483648, %v2241_v7  ;;  %vm2249_vm8 = vweird.f32 %v2241_v7  ;;  %v2253_v16 = vand.u32 2147483647, %v2241_v7 }
 0x783   : > { %v2285_v31 = vand.u32 2147483648, %v4001_v51  ;;  %vm2279_vm13 = vweird.f32 %v4001_v51  ;;  %v2283_v21 = vand.u32 2147483647, %v4001_v51 }
 0x784   : > { %v2256_v43 = vor.u32 1.1754944e-38, %v2255_v24  ;;  %vm2254_vm11 = vcmp.eq.f32.partialorder %v2253_v16, 8.507059e+37 }
 0x785   : > { %v2286_v10 = vor.u32 1.1754944e-38, %v2285_v31  ;;  %vm2284_vm15 = vcmp.eq.f32.partialorder %v2283_v21, 8.507059e+37 }
 0x787   : > { %v2702_v28 = vpop.eup %2701 }
 0x788   : > { %v2704_v29 = vpop.eup %2703  ;;  %v2242_v30 = vadd.f32 1.0, %v2702_v28 }
 0x789   : > { %v2245_v34 = vmul.f32 %v2704_v29, %v2241_v7  ;;  %vm2250_vm5 = vweird.f32 %v2704_v29 }
 0x78a   : > { %2705 = vrcp.f32 %v2242_v30  ;;  %v2270_v42 = vand.u32 2147483648, %v2242_v30  ;;  %v2268_v58 = vand.u32 2147483647, %v2242_v30  ;;  %vm2264_vm6 = vweird.f32 %v2242_v30  ;;  %vm2251_vm9 = vmor %vm2249_vm8, %vm2250_vm5 }
 0x78b   : > { %2707 = vrcp.f32 %v4001_v51  ;;  %v2246_v41 = vsub.f32 1.0, %v2245_v34 }
 0x78c   : > { %v2271_v18 = vor.u32 1.1754944e-38, %v2270_v42  ;;  %vm2269_vm10 = vcmp.eq.f32.partialorder %v2268_v58, 8.507059e+37 }
 0x78d   : > { %v2247_v46 = vmul.f32 %v2704_v29, %v2246_v41 }
 0x78f   : > { %v2248_v2 = vadd.f32 %v2704_v29, %v2247_v46 }
 0x790   : > { %v2706_v44 = vpop.eup %2705 }
 0x791   : > { %v2708_v9 = vpop.eup %2707  ;;  %v2260_v45 = vmul.f32 %v2706_v44, %v2242_v30  ;;  %vm2265_vm4 = vweird.f32 %v2706_v44  ;;  %v2252_v38 = vsel %vm2251_vm9, %v2704_v29, %v2248_v2 }
 0x792   : > { %v2216_v62 = vpop.f32.mrf.mxu2  ;;  %v2275_v11 = vmul.f32 %v2708_v9, %v4001_v51  ;;  %vm2266_vm7 = vmor %vm2264_vm6, %vm2265_vm4  ;;  %v2257_v23 = vsel %vm2254_vm11, %v2256_v43, %v2252_v38  ;;  %vm2280_vm12 = vweird.f32 %v2708_v9 }
 0x793   : > { %v2261_v1 = vsub.f32 1.0, %v2260_v45  ;;  %v2217_v13 = vadd.f32 %v2216_v62, %v2196_v50  ;;  %vm2281_vm14 = vmor %vm2279_vm13, %vm2280_vm12 }
 0x794   : > { %v2276_v15 = vsub.f32 1.0, %v2275_v11 }
 0x795   : > { %v2262_v33 = vmul.f32 %v2706_v44, %v2261_v1  ;;  %v2231_v35 = vadd.f32 %v2223_v19, %v2217_v13 }
 0x796   : > { %v2277_v8 = vmul.f32 %v2708_v9, %v2276_v15 }
 0x797   : > { %v2263_v26 = vadd.f32 %v2706_v44, %v2262_v33  ;;  %2709 = vtanh.f32 %v2231_v35 }
 0x798   : > { %v2278_v59 = vadd.f32 %v2708_v9, %v2277_v8 }
 0x799   : > { %v2267_v39 = vsel %vm2266_vm7, %v2706_v44, %v2263_v26 }
 0x79a   : > { %v2272_v40 = vsel %vm2269_vm10, %v2271_v18, %v2267_v39  ;;  %v2282_v56 = vsel %vm2281_vm14, %v2708_v9, %v2278_v59 }
 0x79b   : > { %v2290_v36 = vmul.f32 %v2272_v40, %v3926_v20  ;;  %v2287_v48 = vsel %vm2284_vm15, %v2286_v10, %v2282_v56 }
 0x79d   : > { %v2710_v25 = vpop.eup %2709 }
 0x79e   : > { %v2291_v49 = vmul.f32 %v2710_v25, %v2257_v23 }
 0x7a0   : > { %v2292_v17 = vadd.f32 %v2291_v49, %v2290_v36 }
 0x7a2   : > { %2711 = vtanh.f32 %v2292_v17 }
 0x7a8   : > { %v2712_v6 = vpop.eup %2711 }
 0x7a9   : > { %v2294_v20 = vmul.f32 %v2712_v6, %v2287_v48 }
 0x7ab   : > { %2329 = vmatmul.f32.vlgmr.msra.gmra.mxu3 %v2294_v20 }
 0x82e   : > { %v2330_v60 = vpop.f32.mrf.mxu3 }
 0x82f   : > { %v2331_v53 = vadd.f32 %v2532_v14, %v2330_v60 }
 0x831   : > { %2713 = vtanh.f32 %v2331_v53 }
 0x837   : > { %v2714_v22 = vpop.eup %2713 }
 0x838   : > { %v2336_v55 = vmul.f32 %v2714_v22, %v2533_v54 }
 0x83a   : > { %2337 = vadd.xlane.f32.xlu0 %v2336_v55 }
 0x8ad   : > { %v2338_v0 = vpop.xlane.xlu0 %2337 }
 0x8ae   : > { %v2341_v3 = vadd.f32 %v2534_v63, %v2338_v0 }
 0x8b0   : > { %2343 = vst.msk [vmem:[%s319_s26] sm:$0xff] %vm2342_vm0, %v2341_v3 }
 0x8b1 PF: > { %p14_p12 = scmp.ge.s32.totalorder %s2928_s22, 4   ;;  %s4370_s18 = smov %s2865_s19 }
 0x8b2   : > { %s4371_s19 = smov %s2938_s25  ;;  %s4372_s20 = smov %s2928_s22 }
 0x8b3   :  { %16 = sbr.rel (!%p14_p12) target bundleno = 3 (0x3), region = 131 }
 0x8b8   :  { %2363 = vsyncpa [#allocation5], 1 }
 0x8b9   :  { %2365 = vsyncpa [#allocation5 + $0x1], 1 }
 0x8ba   :  { %2366 = vsyncpa [#allocation7], 1 }

</bundles_post_ra>
